<compile_context>
chip_gen: v5e
topology: v5e:2x2
jax: 0.10.0
libtpu: 0.0.40
codegen_flags: <defaults>
</compile_context>

<pallas_src>
from functools import partial

import jax
import jax.numpy as jnp
from jax.experimental import pallas as pl
from jax.experimental.pallas import tpu as pltpu

EMBED_DIM = 32
NUM_HEADS = 4
HEAD_DIM = EMBED_DIM // NUM_HEADS


def _mha_kernel(x_ref, wqkv_ref, bqkv_ref, wo_ref, bo_ref, o_ref, *,
                num_heads, head_dim):
    """One grid step = Nb batch rows: fused QKV proj + per-head attention + out proj."""
    Nb, L, E = x_ref.shape
    R = Nb * L

    x2 = x_ref[...].reshape(R, E)                                # (Nb*L, E)

    # Fused QKV projection. wqkv is pre-transposed (E, 3E); the 1/sqrt(head_dim)
    # scale is already folded into the q columns and the q bias.
    qkv = jnp.dot(x2, wqkv_ref[...],
                  preferred_element_type=jnp.float32) + bqkv_ref[...]
    qkv = qkv.reshape(Nb, L, 3 * E)

    wo = wo_ref[...]                                             # (E, E), pre-transposed
    acc = jnp.zeros((R, E), jnp.float32)

    for h in range(num_heads):                                   # static, unrolled (4)
        lo = h * head_dim
        qh = qkv[:, :, lo:lo + head_dim]                         # (Nb, L, D) (pre-scaled)
        kh = qkv[:, :, E + lo:E + lo + head_dim]                 # (Nb, L, D)
        vh = qkv[:, :, 2 * E + lo:2 * E + lo + head_dim]         # (Nb, L, D)

        s = jnp.einsum('nld,nmd->nlm', qh, kh,
                       preferred_element_type=jnp.float32)       # (Nb, L, L)
        m = jnp.max(s, axis=-1, keepdims=True)
        p = jnp.exp(s - m)
        l_sum = jnp.sum(p, axis=-1, keepdims=True)               # (Nb, L, 1)
        ctx = jnp.einsum('nlm,nmd->nld', p, vh,
                         preferred_element_type=jnp.float32)     # (Nb, L, D)
        ctx = ctx * pl.reciprocal(l_sum, approx=False)           # deferred softmax norm

        # Head concatenate replaced by summing per-head output-projection slices.
        acc = acc + jnp.dot(ctx.reshape(R, head_dim),
                            wo[lo:lo + head_dim, :],
                            preferred_element_type=jnp.float32)

    o_ref[...] = (acc + bo_ref[...]).reshape(Nb, L, E)


def mha_pallas(x_nle, w_qkv_t, b_qkv, wo_t, bo):
    """x_nle: (N, L, E) float32. Returns (N, L, E)."""
    N, L, E = x_nle.shape
    # Collapse the grid: one big block per step. Keep 2 parallel steps when
    # possible so both v7x TensorCores get work; on v5e/v6e (1 TC) it is ~free.
    n_blocks = 2 if (N % 2 == 0 and N >= 2) else 1
    Nb = N // n_blocks

    kern = partial(_mha_kernel, num_heads=NUM_HEADS, head_dim=HEAD_DIM)

    return pl.pallas_call(
        kern,
        out_shape=jax.ShapeDtypeStruct((N, L, E), jnp.float32),
        grid=(n_blocks,),
        in_specs=[
            pl.BlockSpec((Nb, L, E), lambda n: (n, 0, 0)),       # x block
            pl.BlockSpec((E, 3 * E), lambda n: (0, 0)),          # fused Wqkv^T (q pre-scaled)
            pl.BlockSpec((1, 3 * E), lambda n: (0, 0)),          # fused b_qkv (q pre-scaled)
            pl.BlockSpec((E, E), lambda n: (0, 0)),              # Wo^T
            pl.BlockSpec((1, E), lambda n: (0, 0)),              # bo
        ],
        out_specs=pl.BlockSpec((Nb, L, E), lambda n: (n, 0, 0)),
        compiler_params=pltpu.CompilerParams(
            dimension_semantics=("parallel",)),
    )(x_nle, w_qkv_t, b_qkv, wo_t, bo)


def init_params(key, embed_dim):
    """Deterministic stand-in for nn.MultiheadAttention parameters (raw form)."""
    k1, k2, k3 = jax.random.split(key, 3)
    bound = 1.0 / (embed_dim ** 0.5)
    in_proj_w = jax.random.uniform(k1, (3 * embed_dim, embed_dim),
                                   jnp.float32, -bound, bound)
    in_proj_b = jax.random.uniform(k2, (3 * embed_dim,),
                                   jnp.float32, -bound, bound)
    out_proj_w = jax.random.uniform(k3, (embed_dim, embed_dim),
                                    jnp.float32, -bound, bound)
    out_proj_b = jnp.zeros((embed_dim,), jnp.float32)
    return in_proj_w, in_proj_b, out_proj_w, out_proj_b


def prepare_kernel_params(raw):
    """Fuse + pre-transpose + pre-scale the raw MHA weights for the kernel (host-side, one-time)."""
    in_proj_w, in_proj_b, out_proj_w, out_proj_b = raw
    E = out_proj_w.shape[0]
    scale = 1.0 / (HEAD_DIM ** 0.5)
    # Fold the q scaling into the q columns of the fused, pre-transposed weight
    # (and the q bias):  (x @ Wq^T + bq) * s  ==  x @ (Wq^T * s) + bq * s.
    col_scale = jnp.concatenate(
        [jnp.full((E,), scale, jnp.float32), jnp.ones((2 * E,), jnp.float32)])
    w_qkv_t = in_proj_w.T * col_scale[None, :]                   # (E, 3E)
    b_qkv = (in_proj_b * col_scale).reshape(1, 3 * E)            # (1, 3E)
    wo_t = out_proj_w.T                                          # (E, E)
    bo = out_proj_b.reshape(1, E)                                # (1, E)
    return w_qkv_t, b_qkv, wo_t, bo


def custom_multihead_attention(x, kernel_params):
    """Forward of CustomMultiHeadAttention. x: (B, T, C, H, E) float32."""
    B, T, C, H, E = x.shape
    # permute(1,0,2,3,4) + fold (B,C,H) into the batch axis, expressed as a
    # single HBM transpose to a batch-major (N, L, E) layout.
    x_nle = jnp.transpose(x, (0, 2, 3, 1, 4)).reshape(B * C * H, T, E)
    out_nle = mha_pallas(x_nle, *kernel_params)
    out = out_nle.reshape(B, C, H, T, E)
    return jnp.transpose(out, (0, 3, 1, 2, 4))                   # -> (B, T, C, H, E)


def _reference(x, raw):
    """Pure-JAX reference (same math as PyTorch MHA with dropout=0)."""
    in_proj_w, in_proj_b, out_proj_w, out_proj_b = raw
    E = out_proj_w.shape[0]
    wq, wk, wv = in_proj_w[:E], in_proj_w[E:2 * E], in_proj_w[2 * E:]
    bq, bk, bv = in_proj_b[:E], in_proj_b[E:2 * E], in_proj_b[2 * E:]

    B, T, C, H, Ed = x.shape
    xt = jnp.transpose(x, (1, 0, 2, 3, 4)).reshape(T, B * C * H, Ed)
    x_nle = jnp.transpose(xt, (1, 0, 2))                         # (N, L, E)
    q = x_nle @ wq.T + bq
    k = x_nle @ wk.T + bk
    v = x_nle @ wv.T + bv
    N, L, _ = q.shape
    D = HEAD_DIM
    qh = q.reshape(N, L, NUM_HEADS, D).transpose(0, 2, 1, 3)
    kh = k.reshape(N, L, NUM_HEADS, D).transpose(0, 2, 1, 3)
    vh = v.reshape(N, L, NUM_HEADS, D).transpose(0, 2, 1, 3)
    s = jnp.einsum("nhld,nhmd->nhlm", qh, kh) / (D ** 0.5)
    p = jax.nn.softmax(s, axis=-1)
    ctx = jnp.einsum("nhlm,nhmd->nhld", p, vh).transpose(0, 2, 1, 3).reshape(N, L, E)
    out = ctx @ out_proj_w.T + out_proj_b
    out = jnp.transpose(out, (1, 0, 2)).reshape(T, B, C, H, E)
    return jnp.transpose(out, (1, 0, 2, 3, 4))


if __name__ == "__main__":
    key = jax.random.PRNGKey(0)
    kx, kp = jax.random.split(key)

    B, T, C, H, E = 2, 8, 4, 4, EMBED_DIM
    x = jax.random.normal(kx, (B, T, C, H, E), jnp.float32)

    raw = init_params(kp, EMBED_DIM)
    kernel_params = prepare_kernel_params(raw)

    out = jax.block_until_ready(custom_multihead_attention(x, kernel_params))
    ref = jax.block_until_ready(_reference(x, raw))

    assert out.shape == (B, T, C, H, E), out.shape
    assert jnp.allclose(out, ref, atol=1e-4, rtol=1e-4), "mismatch vs reference"

    print("KERNEL_OK")
</pallas_src>

<mosaic_0001>
module attributes {stable_mosaic.version = 11 : i64} {
  func.func @_mha_kernel(%arg0: i32, %arg1: memref<16x8x32xf32, #tpu.memory_space<vmem>>, %arg2: memref<32x96xf32, #tpu.memory_space<vmem>>, %arg3: memref<1x96xf32, #tpu.memory_space<vmem>>, %arg4: memref<32x32xf32, #tpu.memory_space<vmem>>, %arg5: memref<1x32xf32, #tpu.memory_space<vmem>>, %arg6: memref<16x8x32xf32, #tpu.memory_space<vmem>>) attributes {dimension_semantics = [#tpu.dimension_semantics<parallel>], iteration_bounds = array<i64: 2>, scalar_prefetch = 0 : i64, scratch_operands = 0 : i64, tpu.core_type = #tpu.core_type<tc>, window_params = [{transform_indices = @transform_0, window_bounds = array<i64: 16, 8, 32>}, {pipeline_mode = #tpu.pipeline_mode<synchronous>, transform_indices = @transform_1, window_bounds = array<i64: 32, 96>}, {pipeline_mode = #tpu.pipeline_mode<synchronous>, transform_indices = @transform_2, window_bounds = array<i64: 1, 96>}, {pipeline_mode = #tpu.pipeline_mode<synchronous>, transform_indices = @transform_3, window_bounds = array<i64: 32, 32>}, {pipeline_mode = #tpu.pipeline_mode<synchronous>, transform_indices = @transform_4, window_bounds = array<i64: 1, 32>}, {transform_indices = @transform_5, window_bounds = array<i64: 16, 8, 32>}]} {
    %c0 = arith.constant 0 : index
    %c0_0 = arith.constant 0 : index
    %c0_1 = arith.constant 0 : index
    %0 = vector.load %arg1[%c0, %c0_0, %c0_1] : memref<16x8x32xf32, #tpu.memory_space<vmem>>, vector<16x8x32xf32>
    %1 = vector.shape_cast %0 : vector<16x8x32xf32> to vector<128x32xf32>
    %c0_2 = arith.constant 0 : index
    %c0_3 = arith.constant 0 : index
    %2 = vector.load %arg2[%c0_2, %c0_3] : memref<32x96xf32, #tpu.memory_space<vmem>>, vector<32x96xf32>
    %cst = arith.constant dense<0.000000e+00> : vector<128x96xf32>
    %3 = tpu.matmul %1, %2, %cst {dimension_numbers = #tpu.dot_dimension_numbers<[1], [0], [0], [1], [0, 0, 1, 1], [], []>} : vector<128x32xf32>, vector<32x96xf32>, vector<128x96xf32> -> vector<128x96xf32>
    %c0_4 = arith.constant 0 : index
    %c0_5 = arith.constant 0 : index
    %4 = vector.load %arg3[%c0_4, %c0_5] : memref<1x96xf32, #tpu.memory_space<vmem>>, vector<1x96xf32>
    %5 = vector.broadcast %4 : vector<1x96xf32> to vector<128x96xf32>
    %6 = arith.addf %3, %5 : vector<128x96xf32>
    %7 = vector.shape_cast %6 : vector<128x96xf32> to vector<16x8x96xf32>
    %c0_6 = arith.constant 0 : index
    %c0_7 = arith.constant 0 : index
    %8 = vector.load %arg4[%c0_6, %c0_7] : memref<32x32xf32, #tpu.memory_space<vmem>>, vector<32x32xf32>
    %cst_8 = arith.constant 0.000000e+00 : f32
    %9 = vector.broadcast %cst_8 : f32 to vector<128x32xf32>
    %10 = vector.extract_strided_slice %7 {offsets = [0, 0, 0], sizes = [16, 8, 8], strides = [1, 1, 1]} : vector<16x8x96xf32> to vector<16x8x8xf32>
    %11 = vector.extract_strided_slice %7 {offsets = [0, 0, 32], sizes = [16, 8, 8], strides = [1, 1, 1]} : vector<16x8x96xf32> to vector<16x8x8xf32>
    %12 = vector.extract_strided_slice %7 {offsets = [0, 0, 64], sizes = [16, 8, 8], strides = [1, 1, 1]} : vector<16x8x96xf32> to vector<16x8x8xf32>
    "tpu.trace_start"() <{level = 10 : i32, message = "nld,nmd->nlm"}> : () -> ()
    %cst_9 = arith.constant dense<0.000000e+00> : vector<16x8x8xf32>
    %13 = tpu.matmul %10, %11, %cst_9 {dimension_numbers = #tpu.dot_dimension_numbers<[2], [2], [1], [1], [0, 0, 0, 1, 1, 1], [0], [0]>} : vector<16x8x8xf32>, vector<16x8x8xf32>, vector<16x8x8xf32> -> vector<16x8x8xf32>
    "tpu.trace_stop"() : () -> ()
    %cst_10 = arith.constant dense<0xFF800000> : vector<16x8xf32>
    %14 = vector.multi_reduction <maximumf>, %13, %cst_10 [2] : vector<16x8x8xf32> to vector<16x8xf32>
    %15 = vector.shape_cast %14 : vector<16x8xf32> to vector<16x8x1xf32>
    %16 = vector.broadcast %15 : vector<16x8x1xf32> to vector<16x8x8xf32>
    %17 = arith.subf %13, %16 : vector<16x8x8xf32>
    %18 = math.exp %17 : vector<16x8x8xf32>
    %cst_11 = arith.constant dense<0.000000e+00> : vector<16x8xf32>
    %19 = vector.multi_reduction <add>, %18, %cst_11 [2] : vector<16x8x8xf32> to vector<16x8xf32>
    %20 = vector.shape_cast %19 : vector<16x8xf32> to vector<16x8x1xf32>
    "tpu.trace_start"() <{level = 10 : i32, message = "nlm,nmd->nld"}> : () -> ()
    %cst_12 = arith.constant dense<0.000000e+00> : vector<16x8x8xf32>
    %21 = tpu.matmul %18, %12, %cst_12 {dimension_numbers = #tpu.dot_dimension_numbers<[2], [1], [1], [2], [0, 0, 0, 1, 1, 2], [0], [0]>} : vector<16x8x8xf32>, vector<16x8x8xf32>, vector<16x8x8xf32> -> vector<16x8x8xf32>
    "tpu.trace_stop"() : () -> ()
    %22 = tpu.reciprocal %20 : vector<16x8x1xf32> -> vector<16x8x1xf32>
    %23 = vector.broadcast %22 : vector<16x8x1xf32> to vector<16x8x8xf32>
    %24 = arith.mulf %21, %23 : vector<16x8x8xf32>
    %25 = vector.shape_cast %24 : vector<16x8x8xf32> to vector<128x8xf32>
    %26 = vector.extract_strided_slice %8 {offsets = [0, 0], sizes = [8, 32], strides = [1, 1]} : vector<32x32xf32> to vector<8x32xf32>
    %cst_13 = arith.constant dense<0.000000e+00> : vector<128x32xf32>
    %27 = tpu.matmul %25, %26, %cst_13 {dimension_numbers = #tpu.dot_dimension_numbers<[1], [0], [0], [1], [0, 0, 1, 1], [], []>} : vector<128x8xf32>, vector<8x32xf32>, vector<128x32xf32> -> vector<128x32xf32>
    %28 = arith.addf %9, %27 : vector<128x32xf32>
    %29 = vector.extract_strided_slice %7 {offsets = [0, 0, 8], sizes = [16, 8, 8], strides = [1, 1, 1]} : vector<16x8x96xf32> to vector<16x8x8xf32>
    %30 = vector.extract_strided_slice %7 {offsets = [0, 0, 40], sizes = [16, 8, 8], strides = [1, 1, 1]} : vector<16x8x96xf32> to vector<16x8x8xf32>
    %31 = vector.extract_strided_slice %7 {offsets = [0, 0, 72], sizes = [16, 8, 8], strides = [1, 1, 1]} : vector<16x8x96xf32> to vector<16x8x8xf32>
    "tpu.trace_start"() <{level = 10 : i32, message = "nld,nmd->nlm"}> : () -> ()
    %cst_14 = arith.constant dense<0.000000e+00> : vector<16x8x8xf32>
    %32 = tpu.matmul %29, %30, %cst_14 {dimension_numbers = #tpu.dot_dimension_numbers<[2], [2], [1], [1], [0, 0, 0, 1, 1, 1], [0], [0]>} : vector<16x8x8xf32>, vector<16x8x8xf32>, vector<16x8x8xf32> -> vector<16x8x8xf32>
    "tpu.trace_stop"() : () -> ()
    %cst_15 = arith.constant dense<0xFF800000> : vector<16x8xf32>
    %33 = vector.multi_reduction <maximumf>, %32, %cst_15 [2] : vector<16x8x8xf32> to vector<16x8xf32>
    %34 = vector.shape_cast %33 : vector<16x8xf32> to vector<16x8x1xf32>
    %35 = vector.broadcast %34 : vector<16x8x1xf32> to vector<16x8x8xf32>
    %36 = arith.subf %32, %35 : vector<16x8x8xf32>
    %37 = math.exp %36 : vector<16x8x8xf32>
    %cst_16 = arith.constant dense<0.000000e+00> : vector<16x8xf32>
    %38 = vector.multi_reduction <add>, %37, %cst_16 [2] : vector<16x8x8xf32> to vector<16x8xf32>
    %39 = vector.shape_cast %38 : vector<16x8xf32> to vector<16x8x1xf32>
    "tpu.trace_start"() <{level = 10 : i32, message = "nlm,nmd->nld"}> : () -> ()
    %cst_17 = arith.constant dense<0.000000e+00> : vector<16x8x8xf32>
    %40 = tpu.matmul %37, %31, %cst_17 {dimension_numbers = #tpu.dot_dimension_numbers<[2], [1], [1], [2], [0, 0, 0, 1, 1, 2], [0], [0]>} : vector<16x8x8xf32>, vector<16x8x8xf32>, vector<16x8x8xf32> -> vector<16x8x8xf32>
    "tpu.trace_stop"() : () -> ()
    %41 = tpu.reciprocal %39 : vector<16x8x1xf32> -> vector<16x8x1xf32>
    %42 = vector.broadcast %41 : vector<16x8x1xf32> to vector<16x8x8xf32>
    %43 = arith.mulf %40, %42 : vector<16x8x8xf32>
    %44 = vector.shape_cast %43 : vector<16x8x8xf32> to vector<128x8xf32>
    %45 = vector.extract_strided_slice %8 {offsets = [8, 0], sizes = [8, 32], strides = [1, 1]} : vector<32x32xf32> to vector<8x32xf32>
    %cst_18 = arith.constant dense<0.000000e+00> : vector<128x32xf32>
    %46 = tpu.matmul %44, %45, %cst_18 {dimension_numbers = #tpu.dot_dimension_numbers<[1], [0], [0], [1], [0, 0, 1, 1], [], []>} : vector<128x8xf32>, vector<8x32xf32>, vector<128x32xf32> -> vector<128x32xf32>
    %47 = arith.addf %28, %46 : vector<128x32xf32>
    %48 = vector.extract_strided_slice %7 {offsets = [0, 0, 16], sizes = [16, 8, 8], strides = [1, 1, 1]} : vector<16x8x96xf32> to vector<16x8x8xf32>
    %49 = vector.extract_strided_slice %7 {offsets = [0, 0, 48], sizes = [16, 8, 8], strides = [1, 1, 1]} : vector<16x8x96xf32> to vector<16x8x8xf32>
    %50 = vector.extract_strided_slice %7 {offsets = [0, 0, 80], sizes = [16, 8, 8], strides = [1, 1, 1]} : vector<16x8x96xf32> to vector<16x8x8xf32>
    "tpu.trace_start"() <{level = 10 : i32, message = "nld,nmd->nlm"}> : () -> ()
    %cst_19 = arith.constant dense<0.000000e+00> : vector<16x8x8xf32>
    %51 = tpu.matmul %48, %49, %cst_19 {dimension_numbers = #tpu.dot_dimension_numbers<[2], [2], [1], [1], [0, 0, 0, 1, 1, 1], [0], [0]>} : vector<16x8x8xf32>, vector<16x8x8xf32>, vector<16x8x8xf32> -> vector<16x8x8xf32>
    "tpu.trace_stop"() : () -> ()
    %cst_20 = arith.constant dense<0xFF800000> : vector<16x8xf32>
    %52 = vector.multi_reduction <maximumf>, %51, %cst_20 [2] : vector<16x8x8xf32> to vector<16x8xf32>
    %53 = vector.shape_cast %52 : vector<16x8xf32> to vector<16x8x1xf32>
    %54 = vector.broadcast %53 : vector<16x8x1xf32> to vector<16x8x8xf32>
    %55 = arith.subf %51, %54 : vector<16x8x8xf32>
    %56 = math.exp %55 : vector<16x8x8xf32>
    %cst_21 = arith.constant dense<0.000000e+00> : vector<16x8xf32>
    %57 = vector.multi_reduction <add>, %56, %cst_21 [2] : vector<16x8x8xf32> to vector<16x8xf32>
    %58 = vector.shape_cast %57 : vector<16x8xf32> to vector<16x8x1xf32>
    "tpu.trace_start"() <{level = 10 : i32, message = "nlm,nmd->nld"}> : () -> ()
    %cst_22 = arith.constant dense<0.000000e+00> : vector<16x8x8xf32>
    %59 = tpu.matmul %56, %50, %cst_22 {dimension_numbers = #tpu.dot_dimension_numbers<[2], [1], [1], [2], [0, 0, 0, 1, 1, 2], [0], [0]>} : vector<16x8x8xf32>, vector<16x8x8xf32>, vector<16x8x8xf32> -> vector<16x8x8xf32>
    "tpu.trace_stop"() : () -> ()
    %60 = tpu.reciprocal %58 : vector<16x8x1xf32> -> vector<16x8x1xf32>
    %61 = vector.broadcast %60 : vector<16x8x1xf32> to vector<16x8x8xf32>
    %62 = arith.mulf %59, %61 : vector<16x8x8xf32>
    %63 = vector.shape_cast %62 : vector<16x8x8xf32> to vector<128x8xf32>
    %64 = vector.extract_strided_slice %8 {offsets = [16, 0], sizes = [8, 32], strides = [1, 1]} : vector<32x32xf32> to vector<8x32xf32>
    %cst_23 = arith.constant dense<0.000000e+00> : vector<128x32xf32>
    %65 = tpu.matmul %63, %64, %cst_23 {dimension_numbers = #tpu.dot_dimension_numbers<[1], [0], [0], [1], [0, 0, 1, 1], [], []>} : vector<128x8xf32>, vector<8x32xf32>, vector<128x32xf32> -> vector<128x32xf32>
    %66 = arith.addf %47, %65 : vector<128x32xf32>
    %67 = vector.extract_strided_slice %7 {offsets = [0, 0, 24], sizes = [16, 8, 8], strides = [1, 1, 1]} : vector<16x8x96xf32> to vector<16x8x8xf32>
    %68 = vector.extract_strided_slice %7 {offsets = [0, 0, 56], sizes = [16, 8, 8], strides = [1, 1, 1]} : vector<16x8x96xf32> to vector<16x8x8xf32>
    %69 = vector.extract_strided_slice %7 {offsets = [0, 0, 88], sizes = [16, 8, 8], strides = [1, 1, 1]} : vector<16x8x96xf32> to vector<16x8x8xf32>
    "tpu.trace_start"() <{level = 10 : i32, message = "nld,nmd->nlm"}> : () -> ()
    %cst_24 = arith.constant dense<0.000000e+00> : vector<16x8x8xf32>
    %70 = tpu.matmul %67, %68, %cst_24 {dimension_numbers = #tpu.dot_dimension_numbers<[2], [2], [1], [1], [0, 0, 0, 1, 1, 1], [0], [0]>} : vector<16x8x8xf32>, vector<16x8x8xf32>, vector<16x8x8xf32> -> vector<16x8x8xf32>
    "tpu.trace_stop"() : () -> ()
    %cst_25 = arith.constant dense<0xFF800000> : vector<16x8xf32>
    %71 = vector.multi_reduction <maximumf>, %70, %cst_25 [2] : vector<16x8x8xf32> to vector<16x8xf32>
    %72 = vector.shape_cast %71 : vector<16x8xf32> to vector<16x8x1xf32>
    %73 = vector.broadcast %72 : vector<16x8x1xf32> to vector<16x8x8xf32>
    %74 = arith.subf %70, %73 : vector<16x8x8xf32>
    %75 = math.exp %74 : vector<16x8x8xf32>
    %cst_26 = arith.constant dense<0.000000e+00> : vector<16x8xf32>
    %76 = vector.multi_reduction <add>, %75, %cst_26 [2] : vector<16x8x8xf32> to vector<16x8xf32>
    %77 = vector.shape_cast %76 : vector<16x8xf32> to vector<16x8x1xf32>
    "tpu.trace_start"() <{level = 10 : i32, message = "nlm,nmd->nld"}> : () -> ()
    %cst_27 = arith.constant dense<0.000000e+00> : vector<16x8x8xf32>
    %78 = tpu.matmul %75, %69, %cst_27 {dimension_numbers = #tpu.dot_dimension_numbers<[2], [1], [1], [2], [0, 0, 0, 1, 1, 2], [0], [0]>} : vector<16x8x8xf32>, vector<16x8x8xf32>, vector<16x8x8xf32> -> vector<16x8x8xf32>
    "tpu.trace_stop"() : () -> ()
    %79 = tpu.reciprocal %77 : vector<16x8x1xf32> -> vector<16x8x1xf32>
    %80 = vector.broadcast %79 : vector<16x8x1xf32> to vector<16x8x8xf32>
    %81 = arith.mulf %78, %80 : vector<16x8x8xf32>
    %82 = vector.shape_cast %81 : vector<16x8x8xf32> to vector<128x8xf32>
    %83 = vector.extract_strided_slice %8 {offsets = [24, 0], sizes = [8, 32], strides = [1, 1]} : vector<32x32xf32> to vector<8x32xf32>
    %cst_28 = arith.constant dense<0.000000e+00> : vector<128x32xf32>
    %84 = tpu.matmul %82, %83, %cst_28 {dimension_numbers = #tpu.dot_dimension_numbers<[1], [0], [0], [1], [0, 0, 1, 1], [], []>} : vector<128x8xf32>, vector<8x32xf32>, vector<128x32xf32> -> vector<128x32xf32>
    %85 = arith.addf %66, %84 : vector<128x32xf32>
    %c0_29 = arith.constant 0 : index
    %c0_30 = arith.constant 0 : index
    %86 = vector.load %arg5[%c0_29, %c0_30] : memref<1x32xf32, #tpu.memory_space<vmem>>, vector<1x32xf32>
    %87 = vector.broadcast %86 : vector<1x32xf32> to vector<128x32xf32>
    %88 = arith.addf %85, %87 : vector<128x32xf32>
    %89 = vector.shape_cast %88 : vector<128x32xf32> to vector<16x8x32xf32>
    %c0_31 = arith.constant 0 : index
    %c0_32 = arith.constant 0 : index
    %c0_33 = arith.constant 0 : index
    %90 = vector.load %arg6[%c0_31, %c0_32, %c0_33] : memref<16x8x32xf32, #tpu.memory_space<vmem>>, vector<16x8x32xf32>
    tpu.vector_store %arg6[%c0_31, %c0_32, %c0_33], %89 {strides = array<i32>} : memref<16x8x32xf32, #tpu.memory_space<vmem>>, vector<16x8x32xf32>,
    return
  }
  func.func @transform_0(%arg0: i32) -> (i32, i32, i32) {
    %c0_i32 = arith.constant 0 : i32
    %c0_i32_0 = arith.constant 0 : i32
    %c0_i32_1 = arith.constant 0 : i32
    return %arg0, %c0_i32, %c0_i32_0 : i32, i32, i32
  }
  func.func @transform_1(%arg0: i32) -> (i32, i32) {
    %c0_i32 = arith.constant 0 : i32
    %c0_i32_0 = arith.constant 0 : i32
    %c0_i32_1 = arith.constant 0 : i32
    return %c0_i32, %c0_i32_0 : i32, i32
  }
  func.func @transform_2(%arg0: i32) -> (i32, i32) {
    %c0_i32 = arith.constant 0 : i32
    %c0_i32_0 = arith.constant 0 : i32
    %c0_i32_1 = arith.constant 0 : i32
    return %c0_i32, %c0_i32_0 : i32, i32
  }
  func.func @transform_3(%arg0: i32) -> (i32, i32) {
    %c0_i32 = arith.constant 0 : i32
    %c0_i32_0 = arith.constant 0 : i32
    %c0_i32_1 = arith.constant 0 : i32
    return %c0_i32, %c0_i32_0 : i32, i32
  }
  func.func @transform_4(%arg0: i32) -> (i32, i32) {
    %c0_i32 = arith.constant 0 : i32
    %c0_i32_0 = arith.constant 0 : i32
    %c0_i32_1 = arith.constant 0 : i32
    return %c0_i32, %c0_i32_0 : i32, i32
  }
  func.func @transform_5(%arg0: i32) -> (i32, i32, i32) {
    %c0_i32 = arith.constant 0 : i32
    %c0_i32_0 = arith.constant 0 : i32
    %c0_i32_1 = arith.constant 0 : i32
    return %arg0, %c0_i32, %c0_i32_0 : i32, i32, i32
  }
}

</mosaic_0001>

<bundles_post_ra>
// kernel: tpu_custom_call.1
= control target key start
LH: loop header
LB: loop body
LE: loop exit
PB: predicated region body
PF: predicated region fallthrough
CT: control target
= control target key end

     0   :  { %10 = vsyncpa [#allocation3], 0  ;;  %s10143_s0 = inlined_call_operand.hbm [shape: f32[32,8,32], index: 0, kind: input, shape index: {}]   ;;  %s10144_s1 = inlined_call_operand.hbm [shape: f32[32,96], index: 1, kind: input, shape index: {}]   ;;  %s10145_s2 = inlined_call_operand.vmem [shape: f32[1,96], index: 2, kind: input, shape index: {}]   ;;  %s10146_s3 = inlined_call_operand.hbm [shape: f32[32,32], index: 3, kind: input, shape index: {}]   ;;  %s10147_s4 = inlined_call_operand.vmem [shape: f32[1,32], index: 4, kind: input, shape index: {}]   ;;  %s10148_s5 = inlined_call_operand.hbm [shape: f32[32,8,32], index: 5, kind: output, shape index: {}]  }
   0x1   :  { %12 = vsyncpa [#allocation3 + $0x1], 0 }
   0x2   :  { %13 = vsyncpa [#allocation6], 0 }
   0x3   :  { %14 = vsyncpa [#allocation4], 0 }
   0x4   :  { %16 = vsyncpa [#allocation4 + $0x1], 0  ;;  %s7030_s18 = smov 0   ;;  %s7032_s19 = smov 0  }
   0x5   :  { %s7034_s20 = smov 0   ;;  %s7036_s21 = smov 0  }
   0x6 LB: > { %s7051_s22 = sadd.s32 4294967295, %s6981_s21   ;;  %s6027_s23 = sadd.s32 4294967294, %s6981_s21   ;;  %s6981_s21 = sphi %s7036_s21, %s10470_s21   ;;  %s6977_s20 = sphi %s7034_s20, %s10469_s20   ;;  %s6973_s19 = sphi %s7032_s19, %s10468_s19   ;;  %s6969_s18 = sphi %s7030_s18, %s10467_s18  }
   0x7   : > { %p42_p0 = scmp.ne.s32.totalorder %s6973_s19, %s6969_s18  ;;  %p43_p1 = scmp.eq.s32.totalorder %s7051_s22, 0 }
   0x8   : > { %p150_p2 = scmp.eq.s32.totalorder %s7051_s22, 1  ;;  %p156_p3 = scmp.eq.s32.totalorder %s6027_s23, 1 }
   0x9   : > { %p7060_p4 = por %p43_p1, %p42_p0  ;;  %p6028_p5 = scmp.ge.s32.totalorder %s6981_s21, 1 }
   0xa   : > { %p7065_p6 = por %p156_p3, %p42_p0  ;;  %p163_p7 = scmp.lt.s32.totalorder %s6981_s21, 3 }
   0xb   : > { %s174_s28 = sshll.u32 %s10144_s1, 4  ;;  %s6983_s30 = smov [#allocation5]   ;;  %s175_s28 = int_to_ptr.hbm [resolvable:$true] %s174_s28 }
   0xc   : > { %p7073_p8 = pnand %p6028_p5, %p163_p7  ;;  %s176_s6 = sshll.u32 %s6983_s30, 4  ;;  %s177_s6 = int_to_ptr.vmem [resolvable:$true] %s176_s6 }
   0xd   : > { %s191_s9 = sshll.u32 %s10146_s3, 4  ;;  %s10149_s10 = smov 128   ;;  %s192_s9 = int_to_ptr.hbm [resolvable:$true] %s191_s9 }
   0xe   : > { %p6333_p9 = pneg %p7073_p8  ;;  %s6985_s11 = smov 8  }
   0xf   : > { %s6986_s12 = smov [#allocation7]   ;;  %s7092_s14 = sadd.s32 1, %s6981_s21  }
  0x10   : > { %p6334_p10 = pnand %p6333_p9, %p43_p1  ;;  %s193_s13 = sshll.u32 %s6986_s12, 4  ;;  %s194_s13 = int_to_ptr.vmem [resolvable:$true] %s193_s13 }
  0x11   : > { %s29_s15 = sadd.s32 1, %s6977_s20  ;;  %s26_s16 = ssub.s32 %s6981_s21, %s7092_s14 }
  0x12   : > { %6336 = dma.hbm_to_vmem [thread:$0]  (!%p6334_p10), %s175_s28, 512, %s177_s6, [#allocation6], %s10149_s10, %s10149_s10, %s6985_s11  }
  0x13   : > { %6339 = dma.hbm_to_vmem [thread:$0]  (!%p6334_p10), %s192_s9, 512, %s194_s13, [#allocation6], %s10149_s10, %s10149_s10, %s6985_s11  }
  0x14   : > { %p36_p12 = scmp.ne.s32.totalorder %s6977_s20, %s6973_s19  ;;  %p27_p13 = scmp.eq.s32.totalorder %s26_s16, 0 }
  0x15   : > { %p37_p0 = scmp.eq.s32.totalorder %s6981_s21, 0  ;;  %p6350_p5 = scmp.lt.s32.totalorder %s6981_s21, 2 }
  0x16   : > { %p7102_p3 = por %p150_p2, %p36_p12  ;;  %s210_s26 = sand.u32 1, %s6977_s20  }
  0x17   : > { %s7108_s23 = scalar_select %p27_p13, %s6977_s20, %s29_s15  }
  0x18   : > { %p38_p7 = por %p37_p0, %p36_p12  ;;  %s6032_s27 = sshll.u32 %s210_s26, 7 }
  0x19   : > { %s6317_s28 = sshll.u32 %s6981_s21, 7  ;;  %s214_s8 = scalar_lea.vmem [#allocation2], %s6032_s27 }
  0x1a   : > { %s219_s7 = scalar_lea.hbm %s10143_s0, %s6317_s28  ;;  %s222_s9 = sshll.u32 %s214_s8, 4  ;;  %s223_s9 = int_to_ptr.vmem [resolvable:$true] %s222_s9 }
  0x1b   : > { %s220_s12 = sshll.u32 %s219_s7, 4  ;;  %p7115_p2 = pnand %p6350_p5, %p38_p7  ;;  %s221_s12 = int_to_ptr.hbm [resolvable:$true] %s220_s12 }
  0x1c   : > { %s211_s15 = scalar_lea.sflag [#allocation3], %s210_s26  ;;  %s6881_s16 = sshra.s32 %s221_s12, 4  ;;  %s6882_s16 = int_to_ptr.hbm [resolvable:$true] %s6881_s16 }
  0x1d   : > { %s6883_s10 = scalar_lea.hbm %s6882_s16, 128  ;;  %p6885_p10 = pneg %p7115_p2 }
  0x1e   : > { %p6884_p9 = scmp.ne.s32.totalorder %s6882_s16, %s6883_s10  ;;  %s6888_s30 = scalar_lea.hbm %s10143_s0, 256 }
  0x1f   : > { %p6889_p0 = scmp.lt.s32.totalorder %s6882_s16, %s10143_s0  ;;  %p6890_p5 = scmp.lt.s32.totalorder %s6888_s30, %s6883_s10 }
  0x20   : > { %p6886_p12 = pnand %p6885_p10, %p6884_p9 }
  0x21   : > { %p6891_p7 = por %p6890_p5, %p6889_p0 }
  0x22   : > { %p6887_p13 = pneg %p6886_p12 }
  0x24   : > { %p6892_p11 = pnand %p6891_p7, %p6887_p13 }
  0x26   : > { %6895 = shalt.err (!%p6892_p11)
}
  0x27   : > { %s10193_s26 = smov 128   ;;  %234 = sbr.rel (%p7073_p8) target bundleno = 2087 (0x827), region = 40 }
  0x28   : > { %6343 = dma.hbm_to_vmem [thread:$0]  (!%p7115_p2), %s221_s12, 2048, %s223_s9, %s211_s15, %s10193_s26, %s10193_s26, %s6985_s11  }
  0x2c   : > { %s7135_s8 = sand.u32 1, %s6973_s19  }
  0x2d   : > { %s6036_s10 = sshll.u32 %s7135_s8, 7  ;;  %s237_s16 = scalar_lea.sflag [#allocation3], %s7135_s8 }
  0x2e   : > { %s7141_s28 = scalar_lea.vmem [#allocation2], %s6036_s10 }
  0x2f   : > { %6956 = dma.done.wait (%p7060_p4), %s237_s16, 2048  }
  0x30   : > { %6958 = vsyncadd (%p7060_p4), %s237_s16, 4294965248 }
  0x31   : > { %6960 = dma.done.wait (%p43_p1), [#allocation6], 1024  }
  0x32   : > { %6962 = vsyncadd (%p43_p1), [#allocation6], 4294966272  ;;  %v299_v0 = vld [vmem:[#allocation5 + $0x18] sm:$0xff]  ;;  %v298_v1 = vld [vmem:[#allocation5 + $0x10] sm:$0xff]  ;;  %vm304_vm0 = vcmask 261120   ;;  %s6987_s11 = smov 96  }
  0x33   : > { %365 = vmatpush.msra.mxu0 %v299_v0  ;;  %v297_v2 = vld [vmem:[#allocation5 + $0x8] sm:$0xff]  ;;  %v296_v3 = vld [vmem:[#allocation5] sm:$0xff]  ;;  %v282_v6 = vld [vmem:[%s7141_s28 + $0x10] sm:$0xff]  ;;  %s6988_s9 = smov 64   ;;  %vm425_vm1 = vcmask 64512   ;;  %s6989_s12 = smov 88  }
  0x34   : > { %v280_v4 = vld [vmem:[%s7141_s28] sm:$0xff]  ;;  %v281_v5 = vld [vmem:[%s7141_s28 + $0x8] sm:$0xff]  ;;  %v283_v7 = vld [vmem:[%s7141_s28 + $0x18] sm:$0xff]  ;;  %s6990_s13 = smov 120   ;;  %s6991_s15 = smov 56  }
  0x35   : > { %366 = vmatpush.msra.mxu0 %v298_v1  ;;  %v284_v8 = vld [vmem:[%s7141_s28 + $0x20] sm:$0xff]  ;;  %v285_v9 = vld [vmem:[%s7141_s28 + $0x28] sm:$0xff]  ;;  %v286_v10 = vld [vmem:[%s7141_s28 + $0x30] sm:$0xff]  ;;  %s6992_s27 = smov 112   ;;  %s6993_s30 = smov 80  }
  0x36   : > { %v287_v11 = vld [vmem:[%s7141_s28 + $0x38] sm:$0xff]  ;;  %v288_v12 = vld [vmem:[%s7141_s28 + $0x40] sm:$0xff]  ;;  %v289_v13 = vld [vmem:[%s7141_s28 + $0x48] sm:$0xff]  ;;  %s6994_s6 = smov 48   ;;  %s6995_s7 = smov 72  }
  0x37   : > { %367 = vmatpush.msra.mxu0 %v297_v2  ;;  %v290_v14 = vld [vmem:[%s7141_s28 + $0x50] sm:$0xff]  ;;  %v291_v15 = vld [vmem:[%s7141_s28 + $0x58] sm:$0xff]  ;;  %v292_v16 = vld [vmem:[%s7141_s28 + $0x60] sm:$0xff]  ;;  %s6996_s26 = smov 104   ;;  %s6997_s16 = smov 40  }
  0x38   : > { %v293_v17 = vld [vmem:[%s7141_s28 + $0x68] sm:$0xff]  ;;  %v294_v18 = vld [vmem:[%s7141_s28 + $0x70] sm:$0xff]  ;;  %v295_v19 = vld [vmem:[%s7141_s28 + $0x78] sm:$0xff]  ;;  %s10032_s29 = scalar_lea.vmem [#allocation8], %s6036_s10  ;;  %s6318_s10 = sshll.u32 %s7051_s22, 7 }
  0x39   : > { %368 = vmatpush.msra.mxu0 %v296_v3  ;;  %v7186_v20 = vld [vmem:[%s10145_s2] ss:$0 sm:$0xff]  ;;  %s5920_s22 = scalar_lea.sflag [#allocation4], %s7135_s8 }
  0x3a   : > { %6040 = vmatmul.msk.f32.vlgmr.msra.gmra.mxu0 %vm304_vm0, %v280_v4 }
  0x42   : > { %6041 = vmatmul.msk.f32.gmra.mxu0 %vm304_vm0, %v281_v5 }
  0x4a   : > { %6042 = vmatmul.msk.f32.gmra.mxu0 %vm304_vm0, %v282_v6 }
  0x52   : > { %6043 = vmatmul.msk.f32.gmra.mxu0 %vm304_vm0, %v283_v7 }
  0x5a   : > { %6044 = vmatmul.msk.f32.gmra.mxu0 %vm304_vm0, %v284_v8 }
  0x62   : > { %6045 = vmatmul.msk.f32.gmra.mxu0 %vm304_vm0, %v285_v9 }
  0x6a   : > { %6046 = vmatmul.msk.f32.gmra.mxu0 %vm304_vm0, %v286_v10 }
  0x72   : > { %6047 = vmatmul.msk.f32.gmra.mxu0 %vm304_vm0, %v287_v11 }
  0x7a   : > { %6048 = vmatmul.msk.f32.gmra.mxu0 %vm304_vm0, %v288_v12 }
  0x82   : > { %6049 = vmatmul.msk.f32.gmra.mxu0 %vm304_vm0, %v289_v13 }
  0x8a   : > { %6050 = vmatmul.msk.f32.gmra.mxu0 %vm304_vm0, %v290_v14 }
  0x92   : > { %6051 = vmatmul.msk.f32.gmra.mxu0 %vm304_vm0, %v291_v15 }
  0x9a   : > { %6052 = vmatmul.msk.f32.gmra.mxu0 %vm304_vm0, %v292_v16 }
  0xa2   : > { %6053 = vmatmul.msk.f32.gmra.mxu0 %vm304_vm0, %v293_v17 }
  0xaa   : > { %6054 = vmatmul.msk.f32.gmra.mxu0 %vm304_vm0, %v294_v18 }
  0xb2   : > { %6055 = vmatmul.msk.f32.gmra.mxu0 %vm304_vm0, %v295_v19 }
  0xb7   : > { %v370_v21 = vpop.f32.mrf.mxu0 }
  0xb8   : > { %v7189_v22 = vadd.f32 %v7186_v20, %v370_v21 }
  0xba   : > { %10194 = vst [vmem:[#allocation12_spill] sm:$0xff] %v7189_v22  ;;  %423 = vrot.lane.b32.xlu0 %v7189_v22, %s6987_s11 }
  0xbf   : > { %v373_v23 = vpop.f32.mrf.mxu0 }
  0xc0   : > { %v7194_v24 = vadd.f32 %v7186_v20, %v373_v23 }
  0xc2   : > { %10195 = vst [vmem:[#allocation13_spill] sm:$0xff] %v7194_v24  ;;  %451 = vrot.lane.b32.xlu0 %v7194_v24, %s6987_s11  ;;  %v7253_v47 = vpack.i.bf16 %v7194_v24, %v7189_v22 }
  0xc7   : > { %v376_v25 = vpop.f32.mrf.mxu0 }
  0xc8   : > { %v7199_v26 = vadd.f32 %v7186_v20, %v376_v25 }
  0xca   : > { %10196 = vst [vmem:[#allocation14_spill] sm:$0xff] %v7199_v26  ;;  %478 = vrot.lane.b32.xlu1 %v7199_v26, %s6987_s11 }
  0xcf   : > { %v379_v27 = vpop.f32.mrf.mxu0 }
  0xd0   : > { %v7204_v28 = vadd.f32 %v7186_v20, %v379_v27 }
  0xd2   : > { %10197 = vst [vmem:[#allocation15_spill] sm:$0xff] %v7204_v28  ;;  %505 = vrot.lane.b32.xlu1 %v7204_v28, %s6987_s11  ;;  %v6408_v50 = vpack.i.bf16 %v7199_v26, %v7204_v28 }
  0xd7   : > { %v382_v29 = vpop.f32.mrf.mxu0 }
  0xd8   : > { %v7209_v30 = vadd.f32 %v7186_v20, %v382_v29 }
  0xda   : > { %10198 = vst [vmem:[#allocation16_spill] sm:$0xff] %v7209_v30  ;;  %532 = vrot.lane.b32.xlu2 %v7209_v30, %s6987_s11 }
  0xdf   : > { %v385_v31 = vpop.f32.mrf.mxu0 }
  0xe0   : > { %v7214_v32 = vadd.f32 %v7186_v20, %v385_v31 }
  0xe2   : > { %559 = vrot.lane.b32.xlu2 %v7214_v32, %s6987_s11 }
  0xe7   : > { %v388_v33 = vpop.f32.mrf.mxu0 }
  0xe8   : > { %v7219_v34 = vadd.f32 %v7186_v20, %v388_v33 }
  0xea   : > { %10199 = vst [vmem:[#allocation17_spill] sm:$0xff] %v7219_v34  ;;  %586 = vrot.lane.b32.xlu0 %v7219_v34, %s6987_s11  ;;  %v6413_v53 = vpack.i.bf16 %v7219_v34, %v7209_v30 }
  0xef   : > { %v391_v35 = vpop.f32.mrf.mxu0 }
  0xf0   : > { %v7224_v36 = vadd.f32 %v7186_v20, %v391_v35 }
  0xf2   : > { %613 = vrot.lane.b32.xlu1 %v7224_v36, %s6987_s11  ;;  %v7285_v57 = vpack.i.bf16 %v7224_v36, %v7214_v32 }
  0xf4   : > { %10205 = vst [vmem:[#allocation23_spill] sm:$0xff] %v7285_v57 }
  0xf7   : > { %v394_v37 = vpop.f32.mrf.mxu0 }
  0xf8   : > { %v7229_v38 = vadd.f32 %v7186_v20, %v394_v37 }
  0xfa   : > { %640 = vrot.lane.b32.xlu2 %v7229_v38, %s6987_s11 }
  0xff   : > { %v397_v39 = vpop.f32.mrf.mxu0 }
 0x100   : > { %v7234_v40 = vadd.f32 %v7186_v20, %v397_v39 }
 0x102   : > { %667 = vrot.lane.b32.xlu0 %v7234_v40, %s6987_s11  ;;  %v6423_v54 = vpack.i.bf16 %v7229_v38, %v7234_v40 }
 0x107   : > { %v400_v41 = vpop.f32.mrf.mxu0 }
 0x108   : > { %v7239_v42 = vadd.f32 %v7186_v20, %v400_v41 }
 0x10a   : > { %10200 = vst [vmem:[#allocation18_spill] sm:$0xff] %v7239_v42  ;;  %694 = vrot.lane.b32.xlu1 %v7239_v42, %s6987_s11 }
 0x10f   : > { %v403_v43 = vpop.f32.mrf.mxu0 }
 0x110   : > { %v7244_v44 = vadd.f32 %v7186_v20, %v403_v43 }
 0x112   : > { %10201 = vst [vmem:[#allocation19_spill] sm:$0xff] %v7244_v44  ;;  %721 = vrot.lane.b32.xlu2 %v7244_v44, %s6987_s11 }
 0x117   : > { %v406_v45 = vpop.f32.mrf.mxu0 }
 0x118   : > { %v7249_v46 = vadd.f32 %v7186_v20, %v406_v45 }
 0x11a   : > { %10202 = vst [vmem:[#allocation20_spill] sm:$0xff] %v7249_v46  ;;  %6404 = vrot.lane.b32.xlu2 %v7253_v47, %s6988_s9  ;;  %748 = vrot.lane.b32.xlu0 %v7249_v46, %s6987_s11  ;;  %v6428_v56 = vpack.i.bf16 %v7249_v46, %v7239_v42 }
 0x11f   : > { %v409_v48 = vpop.f32.mrf.mxu0 }
 0x120   : > { %v7260_v49 = vadd.f32 %v7186_v20, %v409_v48 }
 0x122   : > { %10203 = vst [vmem:[#allocation21_spill] sm:$0xff] %v7260_v49  ;;  %775 = vrot.lane.b32.xlu1 %v7260_v49, %s6987_s11  ;;  %6409 = vrot.lane.b32.xlu0 %v6408_v50, %s6988_s9  ;;  %v6433_v60 = vpack.i.bf16 %v7260_v49, %v7244_v44 }
 0x127   : > { %v412_v51 = vpop.f32.mrf.mxu0 }
 0x128   : > { %v7268_v52 = vadd.f32 %v7186_v20, %v412_v51 }
 0x12a   : > { %10204 = vst [vmem:[#allocation22_spill] sm:$0xff] %v7268_v52  ;;  %6414 = vrot.lane.b32.xlu1 %v6413_v53, %s6988_s9  ;;  %802 = vrot.lane.b32.xlu2 %v7268_v52, %s6987_s11 }
 0x12b   : > { %6424 = vrot.lane.b32.xlu0 %v6423_v54, %s6988_s9 }
 0x12c   : > { %v424_v55 = vpop.permute.xlu0 %423 }
 0x12d   : > { %6056 = vmatpush.xpose.msk.msra.mxu1 %vm425_vm1, %v424_v55 }
 0x12f   : > { %v415_v63 = vpop.f32.mrf.mxu0 }
 0x130   : > { %6057 = vmatmul.msk.f32.vlgmr.msra.gmra.mxu1 %vm425_vm1, %v7189_v22  ;;  %v7310_v0 = vadd.f32 %v7186_v20, %v415_v63 }
 0x132   : > { %6429 = vrot.lane.b32.xlu1 %v6428_v56, %s6988_s9  ;;  %6419 = vrot.lane.b32.xlu2 %v7285_v57, %s6988_s9  ;;  %10206 = vst [vmem:[#allocation24_spill] sm:$0xff] %v7310_v0  ;;  %v6438_v12 = vpack.i.bf16 %v7268_v52, %v7310_v0 }
 0x133   : > { %1657 = vrot.lane.b32.xlu0 %v7189_v22, %s6989_s12 }
 0x134   : > { %v533_v58 = vpop.permute.xlu2 %532  ;;  %v452_v59 = vpop.permute.xlu0 %451 }
 0x135   : > { %6058 = vmatpush.xpose.msk.msra.mxu3 %vm425_vm1, %v452_v59  ;;  %6064 = vmatpush.xpose.msk.msra.mxu2 %vm425_vm1, %v533_v58 }
 0x138   : > { %6059 = vmatmul.msk.f32.vlgmr.msra.gmra.mxu3 %vm425_vm1, %v7194_v24  ;;  %6065 = vmatmul.msk.f32.vlgmr.msra.gmra.mxu2 %vm425_vm1, %v7209_v30 }
 0x13a   : > { %1685 = vrot.lane.b32.xlu1 %v7194_v24, %s6989_s12  ;;  %6434 = vrot.lane.b32.xlu2 %v6433_v60, %s6988_s9 }
 0x13b   : > { %1655 = vrot.lane.b32.xlu0 %v7189_v22, %s6990_s13 }
 0x13c   : > { %v560_v61 = vpop.permute.xlu2 %559  ;;  %v479_v62 = vpop.permute.xlu1 %478 }
 0x13d   : > { %6060 = vmatpush.xpose.msk.msrb.mxu3 %vm425_vm1, %v479_v62 }
 0x140   : > { %6061 = vmatmul.msk.f32.vlgmr.msrb.gmra.mxu3 %vm425_vm1, %v7199_v26 }
 0x141   : > { %6066 = vmatpush.xpose.msk.msra.mxu3 %vm425_vm1, %v560_v61 }
 0x142   : > { %1825 = vrot.lane.b32.xlu1 %v7219_v34, %s6989_s12  ;;  %1713 = vrot.lane.b32.xlu2 %v7199_v26, %s6989_s12 }
 0x143   : > { %829 = vrot.lane.b32.xlu0 %v7310_v0, %s6987_s11 }
 0x144   : > { %v506_v1 = vpop.permute.xlu1 %505 }
 0x145   : > { %6062 = vmatpush.xpose.msk.msrb.mxu1 %vm425_vm1, %v506_v1 }
 0x148   : > { %6063 = vmatmul.msk.f32.vlgmr.msrb.gmra.mxu1 %vm425_vm1, %v7204_v28  ;;  %6067 = vmatmul.msk.f32.vlgmr.msra.gmra.mxu3 %vm425_vm1, %v7214_v32 }
 0x14a   : > { %1823 = vrot.lane.b32.xlu1 %v7219_v34, %s6990_s13  ;;  %1711 = vrot.lane.b32.xlu2 %v7199_v26, %s6990_s13 }
 0x14b   : > { %1741 = vrot.lane.b32.xlu0 %v7204_v28, %s6989_s12 }
 0x152   : > { %1965 = vrot.lane.b32.xlu1 %v7244_v44, %s6989_s12  ;;  %1797 = vrot.lane.b32.xlu2 %v7214_v32, %s6989_s12 }
 0x153   : > { %1683 = vrot.lane.b32.xlu0 %v7194_v24, %s6990_s13 }
 0x154   : > { %v641_v2 = vpop.permute.xlu2 %640 }
 0x155   : > { %6072 = vmatpush.xpose.msk.msrb.mxu3 %vm425_vm1, %v641_v2 }
 0x158   : > { %6073 = vmatmul.msk.f32.vlgmr.msrb.gmra.mxu3 %vm425_vm1, %v7229_v38 }
 0x15a   : > { %1937 = vrot.lane.b32.xlu1 %v7239_v42, %s6989_s12  ;;  %1739 = vrot.lane.b32.xlu2 %v7204_v28, %s6990_s13 }
 0x15b   : > { %1795 = vrot.lane.b32.xlu0 %v7214_v32, %s6990_s13 }
 0x15c   : > { %v587_v3 = vpop.permute.xlu0 %586 }
 0x15d   : > { %6068 = vmatpush.xpose.msk.msra.mxu1 %vm425_vm1, %v587_v3 }
 0x160   : > { %6069 = vmatmul.msk.f32.vlgmr.msra.gmra.mxu1 %vm425_vm1, %v7219_v34 }
 0x162   : > { %2047 = vrot.lane.b32.xlu1 %v7268_v52, %s6990_s13  ;;  %1769 = vrot.lane.b32.xlu2 %v7209_v30, %s6989_s12 }
 0x163   : > { %1881 = vrot.lane.b32.xlu0 %v7229_v38, %s6989_s12 }
 0x164   : > { %v614_v4 = vpop.permute.xlu1 %613 }
 0x165   : > { %6070 = vmatpush.xpose.msk.msrb.mxu2 %vm425_vm1, %v614_v4 }
 0x168   : > { %6071 = vmatmul.msk.f32.vlgmr.msrb.gmra.mxu2 %vm425_vm1, %v7224_v36 }
 0x16a   : > { %1993 = vrot.lane.b32.xlu1 %v7249_v46, %s6989_s12  ;;  %1767 = vrot.lane.b32.xlu2 %v7209_v30, %s6990_s13 }
 0x16b   : > { %1879 = vrot.lane.b32.xlu0 %v7229_v38, %s6990_s13 }
 0x16c   : > { %v722_v5 = vpop.permute.xlu2 %721 }
 0x16d   : > { %6078 = vmatpush.xpose.msk.msra.mxu3 %vm425_vm1, %v722_v5 }
 0x170   : > { %6079 = vmatmul.msk.f32.vlgmr.msra.gmra.mxu3 %vm425_vm1, %v7244_v44 }
 0x172   : > { %2075 = vrot.lane.b32.xlu1 %v7310_v0, %s6990_s13  ;;  %1853 = vrot.lane.b32.xlu2 %v7224_v36, %s6989_s12 }
 0x173   : > { %1851 = vrot.lane.b32.xlu0 %v7224_v36, %s6990_s13 }
 0x174   : > { %v668_v6 = vpop.permute.xlu0 %667  ;;  %v6405_v7 = vpop.permute.xlu2 %6404 }
 0x175   : > { %6074 = vmatpush.xpose.msk.msrb.mxu1 %vm425_vm1, %v668_v6  ;;  %v6407_v9 = vunpack.i.h.bf16 %v6405_v7  ;;  %v6406_v13 = vunpack.i.l.bf16 %v6405_v7 }
 0x178   : > { %6075 = vmatmul.msk.f32.vlgmr.msrb.gmra.mxu1 %vm425_vm1, %v7234_v40 }
 0x17a   : > { %1963 = vrot.lane.b32.xlu2 %v7244_v44, %s6990_s13 }
 0x17b   : > { %2049 = vrot.lane.b32.xlu0 %v7268_v52, %s6989_s12 }
 0x17c   : > { %v695_v8 = vpop.permute.xlu1 %694 }
 0x17d   : > { %6076 = vmatpush.xpose.msk.msra.mxu2 %vm425_vm1, %v695_v8 }
 0x180   : > { %6077 = vmatmul.msk.f32.vlgmr.msra.gmra.mxu2 %vm425_vm1, %v7239_v42 }
 0x182   : > { %1935 = vrot.lane.b32.xlu2 %v7239_v42, %s6990_s13 }
 0x183   : > { %1909 = vrot.lane.b32.xlu0 %v7234_v40, %s6989_s12 }
 0x184   : > { %v803_v10 = vpop.permute.xlu2 %802 }
 0x185   : > { %6084 = vmatpush.xpose.msk.msrb.mxu3 %vm425_vm1, %v803_v10 }
 0x188   : > { %6085 = vmatmul.msk.f32.vlgmr.msrb.gmra.mxu3 %vm425_vm1, %v7268_v52 }
 0x189   : > { %1046 = vmatpush.msra.mxu3 %v6407_v9 }
 0x18a   : > { %1907 = vrot.lane.b32.xlu2 %v7234_v40, %s6990_s13 }
 0x18b   : > { %1991 = vrot.lane.b32.xlu0 %v7249_v46, %s6990_s13 }
 0x18c   : > { %v749_v11 = vpop.permute.xlu0 %748  ;;  %v7416_v27 = vpop.permute.xlu2 %6419 }
 0x18d   : > { %6080 = vmatpush.xpose.msk.msra.mxu1 %vm425_vm1, %v749_v11  ;;  %v6421_v33 = vunpack.i.l.bf16 %v7416_v27 }
 0x190   : > { %6081 = vmatmul.msk.f32.vlgmr.msra.gmra.mxu1 %vm425_vm1, %v7249_v46 }
 0x192   : > { %2077 = vrot.lane.b32.xlu2 %v7310_v0, %s6989_s12 }
 0x193   : > { %6439 = vrot.lane.b32.xlu0 %v6438_v12, %s6988_s9 }
 0x194   : > { %v776_v14 = vpop.permute.xlu1 %775  ;;  %v6410_v15 = vpop.permute.xlu0 %6409 }
 0x195   : > { %6082 = vmatpush.xpose.msk.msrb.mxu2 %vm425_vm1, %v776_v14  ;;  %v6411_v16 = vunpack.i.l.bf16 %v6410_v15  ;;  %v6412_v29 = vunpack.i.h.bf16 %v6410_v15  ;;  %v7422_v35 = vpop.permute.xlu2 %6434 }
 0x198   : > { %6083 = vmatmul.msk.f32.vlgmr.msrb.gmra.mxu2 %vm425_vm1, %v7260_v49 }
 0x199   : > { %1020 = vmatpush.msra.mxu2 %v6406_v13 }
 0x19b   : > { %1098 = vmatpush.msrb.mxu2 %v6411_v16 }
 0x19c   : > { %v7403_v17 = vpop.permute.xlu1 %6414 }
 0x19d   : > { %v6416_v18 = vunpack.i.l.bf16 %v7403_v17  ;;  %v7406_v19 = vpop.permute.xlu0 %6424  ;;  %v7430_v43 = vpop.permute.xlu2 %1713 }
 0x19f   : > { %1124 = vmatpush.msrb.mxu3 %v6416_v18 }
 0x1a4   : > { %v7438_v51 = vpop.permute.xlu1 %6429 }
 0x1a5   : > { %v7408_v20 = vpop.permute.xlu0 %1657  ;;  %v7446_v56 = vpop.permute.xlu2 %1711 }
 0x1a6   : > { %10207 = vst [vmem:[#allocation25_spill] sm:$0xff] %v7446_v56  ;;  %v6417_v56 = vunpack.i.h.bf16 %v7403_v17 }
 0x1ac   : > { %v7450_v59 = vpop.permute.xlu1 %1685 }
 0x1ad   : > { %v7410_v21 = vpop.permute.xlu0 %1655  ;;  %v7412_v23 = vpop.f32.mrf.mxu1 }
 0x1ae   : > { %v855_v25 = vsel %vm425_vm1, %v7412_v23, -inf  ;;  %v7452_v60 = vpop.permute.xlu2 %1797 }
 0x1af   : > { %856 = vmax.xlane.f32.xlu1 %v855_v25 }
 0x1b4   : > { %v7462_v2 = vpop.permute.xlu1 %1825 }
 0x1b5   : > { %v830_v31 = vpop.permute.xlu0 %829 }
 0x1b6   : > { %6086 = vmatpush.xpose.msk.msrb.mxu1 %vm425_vm1, %v830_v31  ;;  %v7466_v4 = vpop.permute.xlu2 %1739 }
 0x1b9   : > { %6087 = vmatmul.msk.f32.vlgmr.msrb.gmra.mxu1 %vm425_vm1, %v7310_v0 }
 0x1ba   : > { %1072 = vmatpush.msra.mxu1 %v6412_v29 }
 0x1bb   : > { %v7424_v37 = vpop.f32.mrf.mxu3  ;;  %v7440_v53 = vpop.f32.mrf.mxu2 }
 0x1bc   : > { %1150 = vmatpush.msrb.mxu1 %v6421_v33  ;;  %v858_v39 = vsel %vm425_vm1, %v7424_v37, -inf  ;;  %v867_v58 = vsel %vm425_vm1, %v7440_v53, -inf  ;;  %v7470_v6 = vpop.permute.xlu1 %1823 }
 0x1bd   : > { %859 = vmax.xlane.f32.xlu2 %v858_v39  ;;  %v7454_v61 = vpop.permute.xlu0 %1741 }
 0x1be   : > { %v7474_v8 = vpop.permute.xlu2 %1769 }
 0x1c3   : > { %v7428_v41 = vpop.f32.mrf.mxu3 }
 0x1c4   : > { %v861_v45 = vsel %vm425_vm1, %v7428_v41, -inf  ;;  %v7480_v11 = vpop.permute.xlu1 %1965 }
 0x1c5   : > { %v7434_v48 = vpop.f32.mrf.mxu1  ;;  %862 = vmax.xlane.f32.xlu1 %v861_v45  ;;  %v7468_v5 = vpop.permute.xlu0 %1683  ;;  %10209 = vst [vmem:[#allocation27_spill] sm:$0xff] %v7480_v11 }
 0x1c6   : > { %v864_v50 = vsel %vm425_vm1, %v7434_v48, -inf  ;;  %v7488_v15 = vpop.permute.xlu2 %1767 }
 0x1c7   : > { %865 = vmax.xlane.f32.xlu0 %v864_v50 }
 0x1cb   : > { %v7442_v54 = vpop.f32.mrf.mxu3 }
 0x1cc   : > { %v870_v55 = vsel %vm425_vm1, %v7442_v54, -inf  ;;  %v7494_v25 = vpop.permute.xlu1 %1937 }
 0x1cd   : > { %871 = vmax.xlane.f32.xlu1 %v870_v55  ;;  %v7476_v9 = vpop.permute.xlu0 %1795 }
 0x1ce   : > { %10208 = vst [vmem:[#allocation26_spill] sm:$0xff] %v7476_v9  ;;  %v7496_v29 = vpop.permute.xlu2 %1853 }
 0x1cf   : > { %868 = vmax.xlane.f32.xlu0 %v867_v58 }
 0x1d4   : > { %v7504_v45 = vpop.permute.xlu1 %2047 }
 0x1d5   : > { %v7490_v16 = vpop.permute.xlu0 %1881  ;;  %10212 = vst [vmem:[#allocation30_spill] sm:$0xff] %v7504_v45 }
 0x1d6   : > { %10210 = vst [vmem:[#allocation28_spill] sm:$0xff] %v7490_v16  ;;  %v7506_v50 = vpop.permute.xlu2 %1963  ;;  %v6448_v16 = vpack.i.bf16 %v7268_v52, %v7239_v42 }
 0x1d7   : > { %10213 = vst [vmem:[#allocation31_spill] sm:$0xff] %v7506_v50 }
 0x1db   : > { %v7456_v62 = vpop.f32.mrf.mxu3 }
 0x1dc   : > { %v879_v63 = vsel %vm425_vm1, %v7456_v62, -inf }
 0x1dd   : > { %880 = vmax.xlane.f32.xlu0 %v879_v63  ;;  %v7460_v1 = vpop.f32.mrf.mxu1  ;;  %v7498_v31 = vpop.permute.xlu0 %1879 }
 0x1de   : > { %v873_v3 = vsel %vm425_vm1, %v7460_v1, -inf  ;;  %10211 = vst [vmem:[#allocation29_spill] sm:$0xff] %v7498_v31 }
 0x1df   : > { %874 = vmax.xlane.f32.xlu1 %v873_v3 }
 0x1e5   : > { %v7508_v55 = vpop.permute.xlu0 %1851 }
 0x1eb   : > { %v7472_v7 = vpop.f32.mrf.mxu2 }
 0x1ec   : > { %v876_v10 = vsel %vm425_vm1, %v7472_v7, -inf }
 0x1ed   : > { %877 = vmax.xlane.f32.xlu2 %v876_v10 }
 0x1f3   : > { %v7482_v12 = vpop.f32.mrf.mxu3 }
 0x1f4   : > { %v888_v13 = vsel %vm425_vm1, %v7482_v12, -inf }
 0x1f5   : > { %889 = vmax.xlane.f32.xlu2 %v888_v13  ;;  %v7486_v14 = vpop.f32.mrf.mxu1  ;;  %v7518_v13 = vpop.permute.xlu1 %1993 }
 0x1f6   : > { %v882_v18 = vsel %vm425_vm1, %v7486_v14, -inf }
 0x1f7   : > { %883 = vmax.xlane.f32.xlu1 %v882_v18  ;;  %v7520_v18 = vpop.permute.xlu2 %1935 }
 0x1fd   : > { %v7524_v57 = vpop.permute.xlu1 %2075 }
 0x1fe   : > { %10215 = vst [vmem:[#allocation33_spill] sm:$0xff] %v7524_v57 }
 0x203   : > { %v7500_v33 = vpop.f32.mrf.mxu2 }
 0x204   : > { %v885_v39 = vsel %vm425_vm1, %v7500_v33, -inf }
 0x205   : > { %886 = vmax.xlane.f32.xlu1 %v885_v39  ;;  %v7522_v39 = vpop.permute.xlu0 %2049 }
 0x206   : > { %10214 = vst [vmem:[#allocation32_spill] sm:$0xff] %v7522_v39 }
 0x20b   : > { %v7510_v58 = vpop.f32.mrf.mxu3 }
 0x20c   : > { %v897_v63 = vsel %vm425_vm1, %v7510_v58, -inf }
 0x20d   : > { %898 = vmax.xlane.f32.xlu1 %v897_v63  ;;  %v7514_v3 = vpop.f32.mrf.mxu1  ;;  %v7530_v63 = vpop.permute.xlu2 %1907 }
 0x20e   : > { %v891_v10 = vsel %vm425_vm1, %v7514_v3, -inf  ;;  %10216 = vst [vmem:[#allocation34_spill] sm:$0xff] %v7530_v63  ;;  %v7532_v31 = vpop.permute.xlu0 %1909  ;;  %v6458_v63 = vpack.i.bf16 %v7310_v0, %v7244_v44 }
 0x20f   : > { %892 = vmax.xlane.f32.xlu2 %v891_v10 }
 0x215   : > { %v7538_v39 = vpop.permute.xlu2 %2077 }
 0x216   : > { %10217 = vst [vmem:[#allocation35_spill] sm:$0xff] %v7538_v39  ;;  %v7540_v57 = vpop.permute.xlu0 %1991 }
 0x217   : > { %10218 = vst [vmem:[#allocation36_spill] sm:$0xff] %v7540_v57 }
 0x21b   : > { %v7526_v45 = vpop.f32.mrf.mxu2 }
 0x21c   : > { %v894_v50 = vsel %vm425_vm1, %v7526_v45, -inf }
 0x21d   : > { %895 = vmax.xlane.f32.xlu0 %v894_v50 }
 0x222   : > { %v857_v11 = vpop.xlane.xlu1 %856 }
 0x223   : > { %v903_v10 = vsub.f32 %v7412_v23, %v857_v11  ;;  %v7553_v11 = vpop.permute.xlu0 %6439 }
 0x225   : > { %v919_v9 = vmul.f32 1.442695, %v903_v10 }
 0x227   : > { %6565 = vpow2.f32 %v919_v9  ;;  %6449 = vrot.lane.b32.xlu2 %v6448_v16, %s6991_s15 }
 0x22d   : > { %v7542_v50 = vpop.eup %6565 }
 0x22e   : > { %10219 = vst [vmem:[#allocation37_spill] sm:$0xff] %v7542_v50  ;;  %6088 = vmatmul.msk.f32.vlgmr.msra.gmra.mxu2 %vm425_vm1, %v7542_v50 }
 0x22f   : > { %1176 = vmatpush.msra.mxu2 %v6417_v56  ;;  %6459 = vrot.lane.b32.xlu2 %v6458_v63, %s6991_s15  ;;  %v6453_v63 = vpack.i.bf16 %v7224_v36, %v7204_v28 }
 0x230   : > { %v860_v23 = vpop.xlane.xlu2 %859 }
 0x231   : > { %v904_v9 = vsub.f32 %v7424_v37, %v860_v23  ;;  %2021 = vrot.lane.b32.xlu0 %v7260_v49, %s6989_s12  ;;  %s5931_s12 = scalar_lea.hbm %s10148_s5, %s6318_s10 }
 0x233   : > { %v921_v16 = vmul.f32 1.442695, %v904_v9 }
 0x235   : > { %6567 = vpow2.f32 %v921_v16  ;;  %v6422_v16 = vunpack.i.h.bf16 %v7416_v27 }
 0x236   : > { %v7555_v17 = vpop.f32.mrf.mxu1 }
 0x237   : > { %3185 = vrot.lane.b32.xlu2 %v7199_v26, %s6992_s27  ;;  %v900_v56 = vsel %vm425_vm1, %v7555_v17, -inf }
 0x238   : > { %901 = vmax.xlane.f32.xlu1 %v900_v56  ;;  %v863_v37 = vpop.xlane.xlu1 %862 }
 0x239   : > { %v905_v10 = vsub.f32 %v7428_v41, %v863_v37  ;;  %6454 = vrot.lane.b32.xlu0 %v6453_v63, %s6991_s15 }
 0x23a   : > { %v866_v23 = vpop.xlane.xlu0 %865 }
 0x23b   : > { %v7565_v9 = vpop.eup %6567  ;;  %v923_v50 = vmul.f32 1.442695, %v905_v10  ;;  %v906_v57 = vsub.f32 %v7434_v48, %v866_v23  ;;  %v6427_v48 = vunpack.i.h.bf16 %v7406_v19  ;;  %v6436_v10 = vunpack.i.l.bf16 %v7422_v35 }
 0x23c   : > { %6089 = vmatmul.msk.f32.vlgmr.msra.gmra.mxu3 %vm425_vm1, %v7565_v9  ;;  %v6431_v23 = vunpack.i.l.bf16 %v7438_v51 }
 0x23d   : > { %6569 = vpow2.f32 %v923_v50  ;;  %v925_v39 = vmul.f32 1.442695, %v906_v57  ;;  %1202 = vmatpush.msra.mxu3 %v6422_v16  ;;  %v6443_v16 = vpack.i.bf16 %v7219_v34, %v7199_v26 }
 0x23f   : > { %6571 = vpow2.f32 %v925_v39  ;;  %3157 = vrot.lane.b32.xlu2 %v7194_v24, %s6992_s27  ;;  %v6426_v39 = vunpack.i.l.bf16 %v7406_v19 }
 0x240   : > { %v872_v41 = vpop.xlane.xlu1 %871 }
 0x241   : > { %v908_v56 = vsub.f32 %v7442_v54, %v872_v41  ;;  %3129 = vrot.lane.b32.xlu0 %v7189_v22, %s6992_s27 }
 0x242   : > { %v869_v27 = vpop.xlane.xlu0 %868 }
 0x243   : > { %v7576_v63 = vpop.eup %6569  ;;  %v929_v37 = vmul.f32 1.442695, %v908_v56  ;;  %v907_v50 = vsub.f32 %v7440_v53, %v869_v27 }
 0x244   : > { %6090 = vmatmul.msk.f32.vlgmr.msra.gmra.mxu1 %vm425_vm1, %v7576_v63 }
 0x245   : > { %v7582_v57 = vpop.eup %6571  ;;  %6573 = vpow2.f32 %v929_v37  ;;  %v927_v54 = vmul.f32 1.442695, %v907_v50  ;;  %1228 = vmatpush.msra.mxu1 %v6427_v48 }
 0x246   : > { %6091 = vmatmul.msk.f32.vlgmr.msrb.gmra.mxu2 %vm425_vm1, %v7582_v57 }
 0x247   : > { %6575 = vpow2.f32 %v927_v54  ;;  %1254 = vmatpush.msrb.mxu2 %v6426_v39  ;;  %3299 = vrot.lane.b32.xlu2 %v7219_v34, %s6993_s30  ;;  %v6442_v39 = vunpack.i.h.bf16 %v7553_v11  ;;  %v6432_v54 = vunpack.i.h.bf16 %v7438_v51 }
 0x249   : > { %3187 = vrot.lane.b32.xlu0 %v7199_v26, %s6993_s30 }
 0x24b   : > { %v7591_v53 = vpop.eup %6573 }
 0x24c   : > { %6093 = vmatmul.msk.f32.vlgmr.msrb.gmra.mxu1 %vm425_vm1, %v7591_v53 }
 0x24d   : > { %v7596_v19 = vpop.eup %6575  ;;  %1306 = vmatpush.msrb.mxu1 %v6436_v10 }
 0x24e   : > { %6092 = vmatmul.msk.f32.vlgmr.msrb.gmra.mxu3 %vm425_vm1, %v7596_v19 }
 0x24f   : > { %1280 = vmatpush.msrb.mxu3 %v6431_v23  ;;  %3271 = vrot.lane.b32.xlu2 %v7214_v32, %s6993_s30 }
 0x250   : > { %v881_v41 = vpop.xlane.xlu0 %880 }
 0x251   : > { %6444 = vrot.lane.b32.xlu1 %v6443_v16, %s6991_s15  ;;  %v911_v56 = vsub.f32 %v7456_v62, %v881_v41  ;;  %3159 = vrot.lane.b32.xlu0 %v7194_v24, %s6993_s30 }
 0x252   : > { %v875_v27 = vpop.xlane.xlu1 %874 }
 0x253   : > { %v935_v48 = vmul.f32 1.442695, %v911_v56  ;;  %v909_v37 = vsub.f32 %v7460_v1, %v875_v27  ;;  %v6437_v27 = vunpack.i.h.bf16 %v7422_v35 }
 0x255   : > { %6577 = vpow2.f32 %v935_v48  ;;  %v931_v50 = vmul.f32 1.442695, %v909_v37 }
 0x257   : > { %6579 = vpow2.f32 %v931_v50  ;;  %3353 = vrot.lane.b32.xlu2 %v7229_v38, %s6992_s27 }
 0x259   : > { %2019 = vrot.lane.b32.xlu1 %v7260_v49, %s6990_s13  ;;  %3241 = vrot.lane.b32.xlu0 %v7209_v30, %s6992_s27  ;;  %s5932_s13 = sshll.u32 %s10032_s29, 4  ;;  %s5933_s13 = int_to_ptr.vmem [resolvable:$true] %s5932_s13 }
 0x25b   : > { %v7616_v62 = vpop.eup %6577 }
 0x25c   : > { %6096 = vmatmul.msk.f32.vlgmr.msra.gmra.mxu1 %vm425_vm1, %v7616_v62 }
 0x25d   : > { %v7621_v1 = vpop.eup %6579  ;;  %1384 = vmatpush.msra.mxu1 %v6442_v39 }
 0x25e   : > { %6094 = vmatmul.msk.f32.vlgmr.msra.gmra.mxu2 %vm425_vm1, %v7621_v1 }
 0x25f   : > { %1332 = vmatpush.msra.mxu2 %v6432_v54  ;;  %3325 = vrot.lane.b32.xlu2 %v7224_v36, %s6992_s27 }
 0x260   : > { %v878_v10 = vpop.xlane.xlu2 %877 }
 0x261   : > { %v910_v23 = vsub.f32 %v7472_v7, %v878_v10  ;;  %3131 = vrot.lane.b32.xlu1 %v7189_v22, %s6993_s30  ;;  %3213 = vrot.lane.b32.xlu0 %v7204_v28, %s6992_s27 }
 0x263   : > { %v933_v16 = vmul.f32 1.442695, %v910_v23 }
 0x265   : > { %6581 = vpow2.f32 %v933_v16 }
 0x267   : > { %3467 = vrot.lane.b32.xlu2 %v7249_v46, %s6993_s30 }
 0x268   : > { %v890_v51 = vpop.xlane.xlu2 %889 }
 0x269   : > { %v914_v41 = vsub.f32 %v7482_v12, %v890_v51  ;;  %3243 = vrot.lane.b32.xlu1 %v7209_v30, %s6993_s30  ;;  %3355 = vrot.lane.b32.xlu0 %v7229_v38, %s6993_s30 }
 0x26a   : > { %v884_v7 = vpop.xlane.xlu1 %883 }
 0x26b   : > { %v7640_v56 = vpop.eup %6581  ;;  %v941_v48 = vmul.f32 1.442695, %v914_v41  ;;  %v912_v37 = vsub.f32 %v7486_v14, %v884_v7  ;;  %v6441_v14 = vunpack.i.l.bf16 %v7553_v11 }
 0x26c   : > { %6095 = vmatmul.msk.f32.vlgmr.msra.gmra.mxu3 %vm425_vm1, %v7640_v56 }
 0x26d   : > { %6583 = vpow2.f32 %v941_v48  ;;  %v937_v50 = vmul.f32 1.442695, %v912_v37  ;;  %1358 = vmatpush.msra.mxu3 %v6437_v27  ;;  %v10221_v27 = vld [vmem:[#allocation35_spill] sm:$0xff]  ;;  %v10223_v48 = vld [vmem:[#allocation28_spill] sm:$0xff] }
 0x26f   : > { %6585 = vpow2.f32 %v937_v50  ;;  %3439 = vrot.lane.b32.xlu2 %v7244_v44, %s6993_s30  ;;  %v10224_v50 = vld [vmem:[#allocation36_spill] sm:$0xff] }
 0x271   : > { %3215 = vrot.lane.b32.xlu1 %v7204_v28, %s6993_s30  ;;  %3327 = vrot.lane.b32.xlu0 %v7224_v36, %s6993_s30 }
 0x273   : > { %v7652_v35 = vpop.eup %6583 }
 0x274   : > { %6099 = vmatmul.msk.f32.vlgmr.msrb.gmra.mxu1 %vm425_vm1, %v7652_v35 }
 0x275   : > { %v7656_v12 = vpop.eup %6585  ;;  %6106 = vmatpush.xpose.msk.msrb.mxu1 %vm425_vm1, %v7450_v59 }
 0x276   : > { %6097 = vmatmul.msk.f32.vlgmr.msrb.gmra.mxu2 %vm425_vm1, %v7656_v12 }
 0x277   : > { %1410 = vmatpush.msrb.mxu2 %v6441_v14  ;;  %3521 = vrot.lane.b32.xlu2 %v7268_v52, %s6992_s27  ;;  %v10225_v14 = vld [vmem:[#allocation26_spill] sm:$0xff] }
 0x278   : > { %v887_v39 = vpop.xlane.xlu1 %886 }
 0x279   : > { %v913_v54 = vsub.f32 %v7500_v33, %v887_v39  ;;  %3297 = vrot.lane.b32.xlu1 %v7219_v34, %s6992_s27  ;;  %3409 = vrot.lane.b32.xlu0 %v7239_v42, %s6992_s27  ;;  %v972_v39 = vsel %vm425_vm1, %v7640_v56, 0.0 }
 0x27b   : > { %v939_v11 = vmul.f32 1.442695, %v913_v54  ;;  %v10226_v54 = vld [vmem:[#allocation27_spill] sm:$0xff] }
 0x27d   : > { %6587 = vpow2.f32 %v939_v11 }
 0x27f   : > { %3551 = vrot.lane.b32.xlu2 %v7310_v0, %s6993_s30 }
 0x280   : > { %v899_v59 = vpop.xlane.xlu1 %898 }
 0x281   : > { %v917_v10 = vsub.f32 %v7510_v58, %v899_v59  ;;  %3269 = vrot.lane.b32.xlu1 %v7214_v32, %s6992_s27  ;;  %3381 = vrot.lane.b32.xlu0 %v7234_v40, %s6992_s27 }
 0x282   : > { %v893_v33 = vpop.xlane.xlu2 %892 }
 0x283   : > { %v7677_v23 = vpop.eup %6587  ;;  %v947_v16 = vmul.f32 1.442695, %v917_v10  ;;  %v915_v51 = vsub.f32 %v7514_v3, %v893_v33  ;;  %v10228_v33 = vld [vmem:[#allocation33_spill] sm:$0xff] }
 0x284   : > { %6098 = vmatmul.msk.f32.vlgmr.msrb.gmra.mxu3 %vm425_vm1, %v7677_v23 }
 0x285   : > { %6589 = vpow2.f32 %v947_v16  ;;  %v943_v41 = vmul.f32 1.442695, %v915_v51  ;;  %6104 = vmatpush.xpose.msk.msrb.mxu3 %vm425_vm1, %v7408_v20  ;;  %v10229_v16 = vld [vmem:[#allocation29_spill] sm:$0xff]  ;;  %v10230_v51 = vld [vmem:[#allocation32_spill] sm:$0xff] }
 0x287   : > { %6591 = vpow2.f32 %v943_v41  ;;  %6474 = vrot.lane.b32.xlu2 %v7253_v47, %s6994_s6 }
 0x289   : > { %3411 = vrot.lane.b32.xlu1 %v7239_v42, %s6993_s30  ;;  %3523 = vrot.lane.b32.xlu0 %v7268_v52, %s6993_s30 }
 0x28b   : > { %v7690_v58 = vpop.eup %6589 }
 0x28c   : > { %6102 = vmatmul.msk.f32.vlgmr.msra.gmra.mxu1 %vm425_vm1, %v7690_v58  ;;  %v993_v56 = vsel %vm425_vm1, %v7690_v58, 0.0 }
 0x28d   : > { %v7694_v3 = vpop.eup %6591  ;;  %6112 = vmatpush.xpose.msk.msra.mxu1 %vm425_vm1, %v7474_v8 }
 0x28e   : > { %6100 = vmatmul.msk.f32.vlgmr.msra.gmra.mxu2 %vm425_vm1, %v7694_v3 }
 0x28f   : > { %6108 = vmatpush.xpose.msk.msra.mxu2 %vm425_vm1, %v7430_v43 }
 0x290   : > { %v896_v47 = vpop.xlane.xlu0 %895 }
 0x291   : > { %3383 = vrot.lane.b32.xlu1 %v7234_v40, %s6993_s30  ;;  %v916_v20 = vsub.f32 %v7526_v45, %v896_v47  ;;  %3495 = vrot.lane.b32.xlu0 %v7260_v49, %s6993_s30  ;;  %v954_v45 = vsel %vm425_vm1, %v7565_v9, 0.0  ;;  %v10220_v9 = vld [vmem:[#allocation34_spill] sm:$0xff]  ;;  %v10231_v47 = vld [vmem:[#allocation31_spill] sm:$0xff] }
 0x293   : > { %v945_v7 = vmul.f32 1.442695, %v916_v20  ;;  %v10232_v20 = vld [vmem:[#allocation37_spill] sm:$0xff] }
 0x294   : > { %6107 = vmatmul.msk.f32.vlgmr.msrb.gmra.mxu1 %vm425_vm1, %v7468_v5  ;;  %v6463_v5 = vpack.i.bf16 %v7214_v32, %v7194_v24 }
 0x295   : > { %6593 = vpow2.f32 %v945_v7  ;;  %6118 = vmatpush.xpose.msk.msrb.mxu1 %vm425_vm1, %v7496_v29  ;;  %v951_v7 = vsel %vm425_vm1, %v10232_v20, 0.0 }
 0x299   : > { %3465 = vrot.lane.b32.xlu1 %v7249_v46, %s6992_s27  ;;  %3549 = vrot.lane.b32.xlu0 %v7310_v0, %s6992_s27 }
 0x29b   : > { %v7715_v43 = vpop.eup %6593 }
 0x29c   : > { %6101 = vmatmul.msk.f32.vlgmr.msra.gmra.mxu3 %vm425_vm1, %v7715_v43  ;;  %6113 = vmatmul.msk.f32.vlgmr.msra.gmra.mxu1 %vm425_vm1, %v7488_v15 }
 0x29d   : > { %6110 = vmatpush.xpose.msk.msra.mxu3 %vm425_vm1, %v7454_v61  ;;  %6124 = vmatpush.xpose.msk.msra.mxu1 %vm425_vm1, %v7494_v25 }
 0x2a1   : > { %3437 = vrot.lane.b32.xlu1 %v7244_v44, %s6992_s27  ;;  %6464 = vrot.lane.b32.xlu0 %v6463_v5, %s6991_s15  ;;  %v969_v5 = vsel %vm425_vm1, %v7621_v1, 0.0 }
 0x2a3   : > { %v2022_v8 = vpop.permute.xlu0 %2021 }
 0x2a4   : > { %6105 = vmatmul.msk.f32.vlgmr.msrb.gmra.mxu3 %vm425_vm1, %v7410_v21  ;;  %6119 = vmatmul.msk.f32.vlgmr.msrb.gmra.mxu1 %vm425_vm1, %v7508_v55  ;;  %v6468_v55 = vpack.i.bf16 %v7260_v49, %v7234_v40 }
 0x2a5   : > { %6116 = vmatpush.xpose.msk.msrb.mxu3 %vm425_vm1, %v7462_v2  ;;  %6130 = vmatpush.xpose.msk.msrb.mxu1 %vm425_vm1, %v2022_v8  ;;  %v10234_v8 = vld [vmem:[#allocation30_spill] sm:$0xff] }
 0x2a9   : > { %3493 = vrot.lane.b32.xlu1 %v7260_v49, %s6992_s27 }
 0x2ab   : > { %v902_v61 = vpop.xlane.xlu1 %901  ;;  %v6455_v15 = vpop.permute.xlu0 %6454 }
 0x2ac   : > { %v918_v25 = vsub.f32 %v7555_v17, %v902_v61  ;;  %v6457_v29 = vunpack.i.h.bf16 %v6455_v15  ;;  %6111 = vmatmul.msk.f32.vlgmr.msra.gmra.mxu3 %vm425_vm1, %v7466_v4  ;;  %6125 = vmatmul.msk.f32.vlgmr.msra.gmra.mxu1 %vm425_vm1, %v7520_v18  ;;  %v6456_v21 = vunpack.i.l.bf16 %v6455_v15  ;;  %v960_v18 = vsel %vm425_vm1, %v7582_v57, 0.0 }
 0x2ad   : > { %6122 = vmatpush.xpose.msk.msra.mxu3 %vm425_vm1, %v7532_v31 }
 0x2ae   : > { %v949_v2 = vmul.f32 1.442695, %v918_v25  ;;  %2346 = vmatpush.msrb.mxu0 %v6456_v21  ;;  %v978_v25 = vsel %vm425_vm1, %v7656_v12, 0.0  ;;  %v987_v21 = vsel %vm425_vm1, %v7694_v3, 0.0  ;;  %v7833_v12 = vpop.permute.xlu2 %6449 }
 0x2b0   : > { %2450 = vmatpush.msra.mxu0 %v6457_v29  ;;  %6595 = vpow2.f32 %v949_v2  ;;  %955 = vadd.xlane.f32.xlu2 %v954_v45  ;;  %v990_v45 = vsel %vm425_vm1, %v7715_v43, 0.0 }
 0x2b1   : > { %6469 = vrot.lane.b32.xlu1 %v6468_v55, %s6991_s15 }
 0x2b3   : > { %v7751_v4 = vpop.permute.xlu0 %3129 }
 0x2b4   : > { %6117 = vmatmul.msk.f32.vlgmr.msrb.gmra.mxu3 %vm425_vm1, %v7470_v6  ;;  %v10222_v6 = vld [vmem:[#allocation25_spill] sm:$0xff] }
 0x2b5   : > { %6128 = vmatpush.xpose.msk.msrb.mxu3 %vm425_vm1, %v7518_v13  ;;  %v966_v13 = vsel %vm425_vm1, %v7591_v53, 0.0  ;;  %v957_v53 = vsel %vm425_vm1, %v7576_v63, 0.0  ;;  %v963_v63 = vsel %vm425_vm1, %v7596_v19, 0.0  ;;  %v975_v19 = vsel %vm425_vm1, %v7616_v62, 0.0 }
 0x2b6   : > { %v6596_v31 = vpop.eup %6595 }
 0x2b7   : > { %6103 = vmatmul.msk.f32.vlgmr.msrb.gmra.mxu2 %vm425_vm1, %v6596_v31 }
 0x2b8   : > { %6114 = vmatpush.xpose.msk.msrb.mxu2 %vm425_vm1, %v7452_v60  ;;  %961 = vadd.xlane.f32.xlu2 %v960_v18 }
 0x2bb   : > { %v7762_v17 = vpop.permute.xlu0 %3187 }
 0x2bc   : > { %6123 = vmatmul.msk.f32.vlgmr.msra.gmra.mxu3 %vm425_vm1, %v10220_v9 }
 0x2bd   : > { %6134 = vmatpush.xpose.msk.msra.mxu3 %vm425_vm1, %v10221_v27  ;;  %v996_v27 = vsel %vm425_vm1, %v6596_v31, 0.0 }
 0x2bf   : > { %6109 = vmatmul.msk.f32.vlgmr.msra.gmra.mxu2 %vm425_vm1, %v10222_v6  ;;  %v7835_v18 = vpop.f32.mrf.mxu3  ;;  %v7842_v6 = vpop.permute.xlu2 %6459 }
 0x2c0   : > { %6120 = vmatpush.xpose.msk.msra.mxu2 %vm425_vm1, %v10223_v48  ;;  %967 = vadd.xlane.f32.xlu2 %v966_v13 }
 0x2c1   : > { %v7815_v15 = vpop.f32.mrf.mxu1 }
 0x2c3   : > { %v6445_v60 = vpop.permute.xlu1 %6444  ;;  %v7774_v57 = vpop.permute.xlu0 %3159 }
 0x2c4   : > { %v6446_v37 = vunpack.i.l.bf16 %v6445_v60  ;;  %6129 = vmatmul.msk.f32.vlgmr.msrb.gmra.mxu3 %vm425_vm1, %v10224_v50  ;;  %v6447_v11 = vunpack.i.h.bf16 %v6445_v60 }
 0x2c6   : > { %2320 = vmatpush.msrb.mxu3 %v6446_v37 }
 0x2c7   : > { %6115 = vmatmul.msk.f32.vlgmr.msrb.gmra.mxu2 %vm425_vm1, %v10225_v14  ;;  %v7852_v37 = vpop.permute.xlu2 %3185  ;;  %v7856_v14 = vpop.f32.mrf.mxu2 }
 0x2c8   : > { %6126 = vmatpush.xpose.msk.msrb.mxu2 %vm425_vm1, %v10226_v54  ;;  %973 = vadd.xlane.f32.xlu2 %v972_v39  ;;  %10243 = vst [vmem:[#allocation31_spill] sm:$0xff] %v7852_v37 }
 0x2c9   : > { %v7821_v29 = vpop.f32.mrf.mxu1 }
 0x2cb   : > { %v2020_v59 = vpop.permute.xlu1 %2019  ;;  %958 = vadd.xlane.f32.xlu0 %v957_v53  ;;  %v7786_v10 = vpop.permute.xlu0 %3241 }
 0x2cc   : > { %10227 = vst [vmem:[#allocation34_spill] sm:$0xff] %v7786_v10  ;;  %6131 = vmatmul.msk.f32.vlgmr.msrb.gmra.mxu1 %vm425_vm1, %v2020_v59  ;;  %6135 = vmatmul.msk.f32.vlgmr.msra.gmra.mxu3 %vm425_vm1, %v10228_v33 }
 0x2cd   : > { %2424 = vmatpush.msra.mxu3 %v6447_v11 }
 0x2cf   : > { %6121 = vmatmul.msk.f32.vlgmr.msra.gmra.mxu2 %vm425_vm1, %v10229_v16  ;;  %v7864_v33 = vpop.permute.xlu2 %3157  ;;  %v7866_v16 = vpop.f32.mrf.mxu2 }
 0x2d0   : > { %6132 = vmatpush.xpose.msk.msra.mxu2 %vm425_vm1, %v10230_v51  ;;  %994 = vadd.xlane.f32.xlu2 %v993_v56 }
 0x2d1   : > { %v7844_v13 = vpop.f32.mrf.mxu3 }
 0x2d3   : > { %964 = vadd.xlane.f32.xlu0 %v963_v63  ;;  %v7799_v41 = vpop.permute.xlu0 %3213  ;;  %v7858_v31 = vpop.permute.xlu1 %3131 }
 0x2d7   : > { %6127 = vmatmul.msk.f32.vlgmr.msrb.gmra.mxu2 %vm425_vm1, %v10231_v47  ;;  %v7876_v20 = vpop.permute.xlu2 %3299 }
 0x2d8   : > { %10248 = vst [vmem:[#allocation40_spill] sm:$0xff] %v7876_v20 }
 0x2d9   : > { %v7827_v62 = vpop.f32.mrf.mxu1 }
 0x2da   : > { %10237 = vst [vmem:[#allocation36_spill] sm:$0xff] %v7827_v62 }
 0x2db   : > { %952 = vadd.xlane.f32.xlu1 %v951_v7  ;;  %970 = vadd.xlane.f32.xlu0 %v969_v5  ;;  %v7807_v58 = vpop.permute.xlu0 %3355  ;;  %v7868_v56 = vpop.permute.xlu1 %3243 }
 0x2dc   : > { %10233 = vst [vmem:[#allocation35_spill] sm:$0xff] %v7807_v58 }
 0x2dd   : > { %10245 = vst [vmem:[#allocation30_spill] sm:$0xff] %v7868_v56 }
 0x2df   : > { %6133 = vmatmul.msk.f32.vlgmr.msra.gmra.mxu2 %vm425_vm1, %v10234_v8 }
 0x2e1   : > { %v7874_v47 = vpop.f32.mrf.mxu2 }
 0x2e2   : > { %10247 = vst [vmem:[#allocation39_spill] sm:$0xff] %v7874_v47 }
 0x2e3   : > { %976 = vadd.xlane.f32.xlu0 %v975_v19  ;;  %v7813_v61 = vpop.permute.xlu0 %3327  ;;  %v7878_v7 = vpop.permute.xlu1 %3215 }
 0x2eb   : > { %979 = vadd.xlane.f32.xlu0 %v978_v25  ;;  %v7819_v1 = vpop.permute.xlu0 %3409  ;;  %v7886_v25 = vpop.permute.xlu2 %3271 }
 0x2ec   : > { %10235 = vst [vmem:[#allocation25_spill] sm:$0xff] %v7819_v1 }
 0x2ef   : > { %v7850_v60 = vpop.f32.mrf.mxu3 }
 0x2f0   : > { %10242 = vst [vmem:[#allocation32_spill] sm:$0xff] %v7850_v60 }
 0x2f1   : > { %v7837_v9 = vpop.f32.mrf.mxu1 }
 0x2f2   : > { %10239 = vst [vmem:[#allocation27_spill] sm:$0xff] %v7837_v9 }
 0x2f3   : > { %988 = vadd.xlane.f32.xlu0 %v987_v21  ;;  %v7825_v2 = vpop.permute.xlu0 %3381 }
 0x2f4   : > { %10236 = vst [vmem:[#allocation28_spill] sm:$0xff] %v7825_v2  ;;  %v981_v2 = vsel %vm425_vm1, %v7677_v23, 0.0 }
 0x2f9   : > { %v7882_v8 = vpop.f32.mrf.mxu2 }
 0x2fa   : > { %10249 = vst [vmem:[#allocation41_spill] sm:$0xff] %v7882_v8 }
 0x2fb   : > { %991 = vadd.xlane.f32.xlu0 %v990_v45  ;;  %v7831_v55 = vpop.permute.xlu0 %3523  ;;  %v7890_v45 = vpop.permute.xlu1 %3297 }
 0x2fc   : > { %10238 = vst [vmem:[#allocation26_spill] sm:$0xff] %v7831_v55 }
 0x2fd   : > { %10250 = vst [vmem:[#allocation42_spill] sm:$0xff] %v7890_v45 }
 0x303   : > { %997 = vadd.xlane.f32.xlu0 %v996_v27  ;;  %v7840_v3 = vpop.permute.xlu0 %3495  ;;  %v7906_v55 = vpop.permute.xlu1 %3269 }
 0x304   : > { %10240 = vst [vmem:[#allocation33_spill] sm:$0xff] %v7840_v3 }
 0x305   : > { %10252 = vst [vmem:[#allocation44_spill] sm:$0xff] %v7906_v55 }
 0x307   : > { %v7862_v59 = vpop.f32.mrf.mxu3 }
 0x308   : > { %10244 = vst [vmem:[#allocation37_spill] sm:$0xff] %v7862_v59 }
 0x309   : > { %v7846_v48 = vpop.f32.mrf.mxu1 }
 0x30b   : > { %v7848_v43 = vpop.permute.xlu0 %3549  ;;  %v7918_v8 = vpop.permute.xlu1 %3411 }
 0x30c   : > { %10241 = vst [vmem:[#allocation29_spill] sm:$0xff] %v7848_v43 }
 0x30d   : > { %10254 = vst [vmem:[#allocation46_spill] sm:$0xff] %v7918_v8  ;;  %v6478_v8 = vpack.i.bf16 %v7204_v28, %v7199_v26 }
 0x311   : > { %v7854_v50 = vpop.f32.mrf.mxu1 }
 0x312   : > { %v2106_v39 = vsel %vm425_vm1, %v7854_v50, -inf }
 0x313   : > { %v6465_v54 = vpop.permute.xlu0 %6464  ;;  %2107 = vmax.xlane.f32.xlu1 %v2106_v39  ;;  %v7894_v39 = vpop.f32.mrf.mxu2 }
 0x314   : > { %v6467_v53 = vunpack.i.h.bf16 %v6465_v54  ;;  %v6466_v11 = vunpack.i.l.bf16 %v6465_v54  ;;  %v7930_v3 = vpop.permute.xlu1 %3383 }
 0x315   : > { %10256 = vst [vmem:[#allocation48_spill] sm:$0xff] %v7930_v3 }
 0x316   : > { %2294 = vmatpush.msrb.mxu2 %v6466_v11  ;;  %v7900_v11 = vpop.permute.xlu2 %3353 }
 0x317   : > { %10251 = vst [vmem:[#allocation43_spill] sm:$0xff] %v7900_v11 }
 0x318   : > { %2398 = vmatpush.msra.mxu2 %v6467_v53 }
 0x319   : > { %v7872_v63 = vpop.f32.mrf.mxu1 }
 0x31a   : > { %10246 = vst [vmem:[#allocation38_spill] sm:$0xff] %v7872_v63 }
 0x31c   : > { %v7941_v10 = vpop.permute.xlu1 %3465 }
 0x31d   : > { %10259 = vst [vmem:[#allocation51_spill] sm:$0xff] %v7941_v10 }
 0x31e   : > { %v7912_v1 = vpop.permute.xlu2 %3325 }
 0x31f   : > { %v7870_v51 = vpop.f32.mrf.mxu3  ;;  %10253 = vst [vmem:[#allocation45_spill] sm:$0xff] %v7912_v1 }
 0x321   : > { %v7884_v19 = vpop.f32.mrf.mxu1 }
 0x326   : > { %v7928_v62 = vpop.permute.xlu2 %3467 }
 0x327   : > { %v7880_v5 = vpop.f32.mrf.mxu3  ;;  %10255 = vst [vmem:[#allocation47_spill] sm:$0xff] %v7928_v62 }
 0x329   : > { %v7896_v54 = vpop.f32.mrf.mxu1 }
 0x32a   : > { %v2133_v9 = vsel %vm425_vm1, %v7896_v54, -inf }
 0x32e   : > { %v7939_v58 = vpop.permute.xlu2 %3439 }
 0x32f   : > { %v7888_v21 = vpop.f32.mrf.mxu3  ;;  %10258 = vst [vmem:[#allocation50_spill] sm:$0xff] %v7939_v58 }
 0x330   : > { %v2112_v27 = vsel %vm425_vm1, %v7888_v21, -inf }
 0x331   : > { %2113 = vmax.xlane.f32.xlu1 %v2112_v27  ;;  %v2124_v27 = vsel %vm425_vm1, %v7884_v19, -inf }
 0x337   : > { %v7898_v53 = vpop.f32.mrf.mxu3 }
 0x338   : > { %v2121_v63 = vsel %vm425_vm1, %v7898_v53, -inf }
 0x339   : > { %2122 = vmax.xlane.f32.xlu2 %v2121_v63  ;;  %2134 = vmax.xlane.f32.xlu1 %v2133_v9 }
 0x33a   : > { %v7908_v43 = vpop.f32.mrf.mxu2 }
 0x33e   : > { %v7960_v10 = vpop.xlane.xlu0 %958 }
 0x33f   : > { %v7920_v63 = vpop.f32.mrf.mxu3 }
 0x340   : > { %v2130_v45 = vsel %vm425_vm1, %v7920_v63, -inf }
 0x341   : > { %2125 = vmax.xlane.f32.xlu2 %v2124_v27 }
 0x342   : > { %v7914_v59 = vpop.f32.mrf.mxu2 }
 0x343   : > { %v2109_v11 = vsel %vm425_vm1, %v7914_v59, -inf }
 0x344   : > { %2110 = vmax.xlane.f32.xlu0 %v2109_v11 }
 0x349   : > { %v7949_v60 = vpop.f32.mrf.mxu1 }
 0x34a   : > { %v7922_v9 = vpop.f32.mrf.mxu2  ;;  %v2142_v23 = vsel %vm425_vm1, %v7949_v60, -inf }
 0x34b   : > { %v2118_v27 = vsel %vm425_vm1, %v7922_v9, -inf }
 0x34c   : > { %2131 = vmax.xlane.f32.xlu0 %v2130_v45  ;;  %2119 = vmax.xlane.f32.xlu2 %v2118_v27  ;;  %v7947_v27 = vpop.permute.xlu2 %3521 }
 0x34d   : > { %10260 = vst [vmem:[#allocation52_spill] sm:$0xff] %v7947_v27 }
 0x352   : > { %v7934_v11 = vpop.f32.mrf.mxu2  ;;  %6479 = vrot.lane.b32.xlu1 %v6478_v8, %s6994_s6 }
 0x353   : > { %10257 = vst [vmem:[#allocation49_spill] sm:$0xff] %v7934_v11  ;;  %v7951_v11 = vpop.permute.xlu1 %3437 }
 0x354   : > { %982 = vadd.xlane.f32.xlu0 %v981_v2  ;;  %10261 = vst [vmem:[#allocation53_spill] sm:$0xff] %v7951_v11  ;;  %v6483_v2 = vpack.i.bf16 %v7214_v32, %v7209_v30  ;;  %v7968_v11 = vpop.f32.mrf.mxu3 }
 0x355   : > { %10264 = vst [vmem:[#allocation56_spill] sm:$0xff] %v7968_v11 }
 0x35a   : > { %v7943_v62 = vpop.f32.mrf.mxu2 }
 0x35b   : > { %v2136_v45 = vsel %vm425_vm1, %v7943_v62, -inf  ;;  %v7966_v58 = vpop.permute.xlu1 %3493 }
 0x35c   : > { %2137 = vmax.xlane.f32.xlu2 %v2136_v45  ;;  %v7962_v45 = vpop.permute.xlu2 %3551  ;;  %10263 = vst [vmem:[#allocation55_spill] sm:$0xff] %v7966_v58  ;;  %v7982_v58 = vpack.i.bf16 %v7310_v0, %v7268_v52 }
 0x35d   : > { %10262 = vst [vmem:[#allocation54_spill] sm:$0xff] %v7962_v45 }
 0x35e   : > { %10266 = vst [vmem:[#allocation58_spill] sm:$0xff] %v7982_v58 }
 0x362   : > { %v7957_v8 = vpop.f32.mrf.mxu2 }
 0x363   : > { %v2145_v27 = vsel %vm425_vm1, %v7957_v8, -inf  ;;  %v7978_v45 = vpop.permute.xlu1 %6469 }
 0x364   : > { %2143 = vmax.xlane.f32.xlu2 %v2142_v23  ;;  %v7972_v23 = vpop.xlane.xlu0 %964  ;;  %v7976_v1 = vpop.permute.xlu2 %6474  ;;  %v6471_v55 = vunpack.i.l.bf16 %v7978_v45 }
 0x365   : > { %10265 = vst [vmem:[#allocation57_spill] sm:$0xff] %v7976_v1 }
 0x368   : > { %6484 = vrot.lane.b32.xlu0 %v6483_v2, %s6994_s6  ;;  %v984_v2 = vsel %vm425_vm1, %v7652_v35, 0.0 }
 0x36c   : > { %2146 = vmax.xlane.f32.xlu2 %v2145_v27  ;;  %v7984_v27 = vpop.f32.mrf.mxu3  ;;  %v7990_v20 = vpop.xlane.xlu2 %955 }
 0x36d   : > { %v2148_v11 = vsel %vm425_vm1, %v7984_v27, -inf  ;;  %v7992_v35 = vpop.xlane.xlu0 %970  ;;  %vm1434_vm7 = vweird.f32 %v7990_v20 }
 0x370   : > { %4508 = vrot.lane.b32.xlu0 %v7189_v22, %s6995_s7 }
 0x374   : > { %985 = vadd.xlane.f32.xlu2 %v984_v2  ;;  %v7994_v2 = vpop.xlane.xlu1 %952  ;;  %v7998_v0 = vpop.xlane.xlu2 %961 }
 0x375   : > { %v8000_v1 = vpop.xlane.xlu0 %976  ;;  %vm1420_vm3 = vweird.f32 %v7994_v2 }
 0x378   : > { %6509 = vrot.lane.b32.xlu0 %v7982_v58, %s6994_s6 }
 0x37c   : > { %2149 = vmax.xlane.f32.xlu1 %v2148_v11  ;;  %v6488_v11 = vpack.i.bf16 %v7224_v36, %v7219_v34  ;;  %v8008_v47 = vpop.xlane.xlu2 %967 }
 0x380   : > { %4590 = vrot.lane.b32.xlu0 %v7204_v28, %s6996_s26 }
 0x386   : > { %v2108_v52 = vpop.xlane.xlu1 %2107 }
 0x387   : > { %v2152_v58 = vsub.f32 %v7854_v50, %v2108_v52  ;;  %v8015_v52 = vpop.xlane.xlu0 %979  ;;  %v8031_v50 = vpack.i.bf16 %v7244_v44, %v7239_v42 }
 0x388   : > { %4676 = vrot.lane.b32.xlu0 %v7219_v34, %s6995_s7 }
 0x389   : > { %v2169_v37 = vmul.f32 1.442695, %v2152_v58  ;;  %v8021_v58 = vpack.i.bf16 %v7234_v40, %v7229_v38  ;;  %10269 = vst [vmem:[#allocation61_spill] sm:$0xff] %v8031_v50 }
 0x38b   : > { %6597 = vpow2.f32 %v2169_v37  ;;  %10268 = vst [vmem:[#allocation60_spill] sm:$0xff] %v8021_v58  ;;  %v8027_v37 = vpop.xlane.xlu2 %973 }
 0x38c   : > { %6489 = vrot.lane.b32.xlu2 %v6488_v11, %s6994_s6 }
 0x38f   : > { %v8033_v11 = vpop.xlane.xlu0 %988 }
 0x390   : > { %4564 = vrot.lane.b32.xlu0 %v7199_v26, %s6995_s7  ;;  %vm1588_vm10 = vweird.f32 %v8033_v11 }
 0x391   : > { %v8012_v3 = vpop.eup %6597 }
 0x392   : > { %10267 = vst [vmem:[#allocation59_spill] sm:$0xff] %v8012_v3  ;;  %6137 = vmatmul.msk.f32.vlgmr.msrb.gmra.mxu2 %vm425_vm1, %v8012_v3 }
 0x393   : > { %2502 = vmatpush.msrb.mxu2 %v6471_v55  ;;  %v8041_v55 = vpack.i.bf16 %v7260_v49, %v7249_v46 }
 0x394   : > { %6494 = vrot.lane.b32.xlu2 %v8021_v58, %s6994_s6  ;;  %v8043_v58 = vpop.xlane.xlu2 %994 }
 0x395   : > { %4506 = vrot.lane.b32.xlu1 %v7189_v22, %s6996_s26  ;;  %10270 = vst [vmem:[#allocation62_spill] sm:$0xff] %v8041_v55 }
 0x397   : > { %v8047_v42 = vpop.xlane.xlu0 %991 }
 0x39c   : > { %6499 = vrot.lane.b32.xlu2 %v8031_v50, %s6994_s6 }
 0x39d   : > { %4592 = vrot.lane.b32.xlu1 %v7204_v28, %s6995_s7 }
 0x39f   : > { %v8059_v46 = vpop.xlane.xlu0 %997 }
 0x3a4   : > { %6504 = vrot.lane.b32.xlu2 %v8041_v55, %s6994_s6  ;;  %v2114_v3 = vpop.xlane.xlu1 %2113  ;;  %v6461_v55 = vunpack.i.l.bf16 %v7842_v6 }
 0x3a5   : > { %v2154_v44 = vsub.f32 %v7888_v21, %v2114_v3  ;;  %4536 = vrot.lane.b32.xlu1 %v7194_v24, %s6995_s7 }
 0x3a7   : > { %v2173_v50 = vmul.f32 1.442695, %v2154_v44 }
 0x3a9   : > { %6599 = vpow2.f32 %v2173_v50 }
 0x3ac   : > { %4674 = vrot.lane.b32.xlu2 %v7219_v34, %s6996_s26  ;;  %v2123_v28 = vpop.xlane.xlu2 %2122  ;;  %v2103_v34 = vsel %vm425_vm1, %v7880_v5, -inf }
 0x3ad   : > { %4534 = vrot.lane.b32.xlu1 %v7194_v24, %s6996_s26 }
 0x3af   : > { %v8056_v49 = vpop.eup %6599 }
 0x3b0   : > { %10271 = vst [vmem:[#allocation63_spill] sm:$0xff] %v8056_v49  ;;  %6139 = vmatmul.msk.f32.vlgmr.msrb.gmra.mxu0 %vm425_vm1, %v8056_v49 }
 0x3b1   : > { %2554 = vmatpush.msrb.mxu0 %v6461_v55  ;;  %v2157_v55 = vsub.f32 %v7898_v53, %v2123_v28  ;;  %v6513_v53 = vpack.i.bf16 %v7209_v30, %v7189_v22 }
 0x3b4   : > { %4648 = vrot.lane.b32.xlu2 %v7214_v32, %s6995_s7  ;;  %v2126_v44 = vpop.xlane.xlu2 %2125 }
 0x3b5   : > { %v2158_v3 = vsub.f32 %v7884_v19, %v2126_v44  ;;  %4620 = vrot.lane.b32.xlu1 %v7209_v30, %s6995_s7  ;;  %v6462_v44 = vunpack.i.h.bf16 %v7842_v6 }
 0x3b7   : > { %v2181_v21 = vmul.f32 1.442695, %v2158_v3  ;;  %v2111_v50 = vpop.xlane.xlu0 %2110  ;;  %v2179_v3 = vmul.f32 1.442695, %v2157_v55 }
 0x3b8   : > { %v2153_v24 = vsub.f32 %v7914_v59, %v2111_v50 }
 0x3b9   : > { %6601 = vpow2.f32 %v2181_v21 }
 0x3ba   : > { %v2171_v56 = vmul.f32 1.442695, %v2153_v24  ;;  %2104 = vmax.xlane.f32.xlu0 %v2103_v34  ;;  %v2135_v24 = vpop.xlane.xlu1 %2134 }
 0x3bb   : > { %v2161_v6 = vsub.f32 %v7896_v54, %v2135_v24  ;;  %v6472_v54 = vunpack.i.h.bf16 %v7978_v45 }
 0x3bc   : > { %6603 = vpow2.f32 %v2171_v56  ;;  %4646 = vrot.lane.b32.xlu2 %v7214_v32, %s6996_s26  ;;  %v6451_v32 = vunpack.i.l.bf16 %v7833_v12 }
 0x3bd   : > { %4562 = vrot.lane.b32.xlu1 %v7199_v26, %s6996_s26  ;;  %6605 = vpow2.f32 %v2179_v3  ;;  %v2187_v50 = vmul.f32 1.442695, %v2161_v6 }
 0x3bf   : > { %v8076_v19 = vpop.eup %6601  ;;  %v2120_v59 = vpop.xlane.xlu2 %2119 }
 0x3c0   : > { %v2156_v21 = vsub.f32 %v7922_v9, %v2120_v59  ;;  %6143 = vmatmul.msk.f32.vlgmr.msra.gmra.mxu0 %vm425_vm1, %v8076_v19  ;;  %v2132_v34 = vpop.xlane.xlu0 %2131  ;;  %v6452_v59 = vunpack.i.h.bf16 %v7833_v12 }
 0x3c1   : > { %2658 = vmatpush.msra.mxu0 %v6462_v44  ;;  %v2160_v9 = vsub.f32 %v7920_v63, %v2132_v34  ;;  %v418_v34 = vld [vmem:[#allocation7] sm:$0xff] }
 0x3c2   : > { %v8082_v28 = vpop.eup %6603  ;;  %v2177_v56 = vmul.f32 1.442695, %v2156_v21 }
 0x3c3   : > { %6138 = vmatmul.msk.f32.vlgmr.msrb.gmra.mxu3 %vm425_vm1, %v8082_v28  ;;  %v2185_v55 = vmul.f32 1.442695, %v2160_v9  ;;  %v8094_v44 = vpop.eup %6605 }
 0x3c4   : > { %2528 = vmatpush.msrb.mxu3 %v6451_v32  ;;  %6514 = vrot.lane.b32.xlu2 %v6513_v53, %s6991_s15  ;;  %6607 = vpow2.f32 %v2177_v56 }
 0x3c5   : > { %4618 = vrot.lane.b32.xlu1 %v7209_v30, %s6996_s26  ;;  %6609 = vrcp.f32 %v7994_v2 }
 0x3c6   : > { %6611 = vpow2.f32 %v2187_v50 }
 0x3c7   : > { %6613 = vpow2.f32 %v2185_v55 }
 0x3c8   : > { %6615 = vrcp.f32 %v7990_v20  ;;  %v8118_v24 = vpop.xlane.xlu0 %982 }
 0x3c9   : > { %6617 = vrcp.f32 %v8033_v11 }
 0x3ca   : > { %v8098_v3 = vpop.eup %6607 }
 0x3cb   : > { %6142 = vmatmul.msk.f32.vlgmr.msra.gmra.mxu3 %vm425_vm1, %v8094_v44  ;;  %6141 = vmatmul.msk.f32.vlgmr.msra.gmra.mxu2 %vm425_vm1, %v8098_v3  ;;  %v8112_v63 = vpop.eup %6609 }
 0x3cc   : > { %2632 = vmatpush.msra.mxu3 %v6452_v59  ;;  %2606 = vmatpush.msra.mxu2 %v6472_v54  ;;  %v8115_v21 = vpop.eup %6611  ;;  %v1416_v53 = vmul.f32 %v8112_v63, %v7994_v2  ;;  %vm1421_vm2 = vweird.f32 %v8112_v63 }
 0x3cd   : > { %4760 = vrot.lane.b32.xlu2 %v7234_v40, %s6995_s7  ;;  %4704 = vrot.lane.b32.xlu1 %v7224_v36, %s6995_s7  ;;  %10272 = vst [vmem:[#allocation64_spill] sm:$0xff] %v8115_v21  ;;  %v8120_v56 = vpop.eup %6613  ;;  %vm1422_vm4 = vmor %vm1420_vm3, %vm1421_vm2  ;;  %vm1448_vm2 = vweird.f32 %v7960_v10 }
 0x3ce   : > { %4730 = vrot.lane.b32.xlu0 %v7229_v38, %s6996_s26  ;;  %10273 = vst [vmem:[#allocation65_spill] sm:$0xff] %v8120_v56  ;;  %v1417_v6 = vsub.f32 1.0, %v1416_v53 }
 0x3cf   : > { %v2138_v12 = vpop.xlane.xlu2 %2137 }
 0x3d0   : > { %v2162_v45 = vsub.f32 %v7943_v62, %v2138_v12  ;;  %v8128_v62 = vpop.eup %6615 }
 0x3d1   : > { %v8132_v50 = vpop.eup %6617  ;;  %v1430_v55 = vmul.f32 %v8128_v62, %v7990_v20  ;;  %vm1435_vm5 = vweird.f32 %v8128_v62 }
 0x3d2   : > { %v2189_v32 = vmul.f32 1.442695, %v2162_v45  ;;  %vm1589_vm8 = vweird.f32 %v8132_v50  ;;  %vm8188_vm9 = vmor %vm1434_vm7, %vm1435_vm5 }
 0x3d3   : > { %6146 = vmatmul.msk.f32.vlgmr.msrb.gmra.mxu3 %vm425_vm1, %v8115_v21  ;;  %6145 = vmatmul.msk.f32.vlgmr.msrb.gmra.mxu2 %vm425_vm1, %v8120_v56  ;;  %vm8209_vm11 = vmor %vm1588_vm10, %vm1589_vm8  ;;  %vm1462_vm10 = vweird.f32 %v7998_v0 }
 0x3d4   : > { %6619 = vpow2.f32 %v2189_v32  ;;  %6319 = vmatpush.msrb.mxu3 %v418_v34  ;;  %3079 = vmatpush.msrb.mxu2 %v418_v34  ;;  %v1584_v32 = vmul.f32 %v8132_v50, %v8033_v11  ;;  %v1431_v34 = vsub.f32 1.0, %v1430_v55 }
 0x3d5   : > { %4702 = vrot.lane.b32.xlu1 %v7224_v36, %s6996_s26  ;;  %6621 = vrcp.f32 %v7960_v10  ;;  %v1418_v36 = vmul.f32 %v8112_v63, %v1417_v6 }
 0x3d6   : > { %6623 = vrcp.f32 %v8047_v42  ;;  %v1585_v6 = vsub.f32 1.0, %v1584_v32 }
 0x3d7   : > { %v2144_v9 = vpop.xlane.xlu2 %2143  ;;  %v1419_v53 = vadd.f32 %v8112_v63, %v1418_v36 }
 0x3d8   : > { %v2164_v59 = vsub.f32 %v7949_v60, %v2144_v9 }
 0x3da   : > { %v8138_v54 = vpop.eup %6619  ;;  %v2193_v12 = vmul.f32 1.442695, %v2164_v59  ;;  %v8141_v45 = vpop.permute.xlu0 %6484 }
 0x3db   : > { %10274 = vst [vmem:[#allocation66_spill] sm:$0xff] %v8138_v54  ;;  %6147 = vmatmul.msk.f32.vlgmr.msrb.gmra.mxu0 %vm425_vm1, %v8138_v54  ;;  %v8152_v60 = vpop.eup %6621  ;;  %v1426_v54 = vand.u32 2147483648, %v7994_v2 }
 0x3dc   : > { %6625 = vpow2.f32 %v2193_v12  ;;  %6186 = vmatpush.xpose.msk.msrb.mxu0 %vm425_vm1, %v7774_v57  ;;  %v8156_v59 = vpop.eup %6623  ;;  %v1432_v12 = vmul.f32 %v8128_v62, %v1431_v34  ;;  %v1424_v57 = vand.u32 2147483647, %v7994_v2  ;;  %v1444_v36 = vmul.f32 %v8152_v60, %v7960_v10 }
 0x3dd   : > { %4732 = vrot.lane.b32.xlu1 %v7229_v38, %s6995_s7  ;;  %6627 = vrcp.f32 %v7998_v0  ;;  %v1586_v34 = vmul.f32 %v8132_v50, %v1585_v6  ;;  %v1427_v2 = vor.u32 1.1754944e-38, %v1426_v54  ;;  %vm1449_vm14 = vweird.f32 %v8152_v60 }
 0x3de   : > { %6629 = vrcp.f32 %v8043_v58  ;;  %v1433_v22 = vadd.f32 %v8128_v62, %v1432_v12  ;;  %vm1425_vm6 = vcmp.eq.f32.partialorder %v1424_v57, 8.507059e+37  ;;  %v1438_v57 = vand.u32 2147483647, %v7990_v20  ;;  %vm8243_vm3 = vmor %vm1448_vm2, %vm1449_vm14 }
 0x3df   : > { %v2147_v9 = vpop.xlane.xlu2 %2146  ;;  %v1587_v6 = vadd.f32 %v8132_v50, %v1586_v34  ;;  %vm1603_vm15 = vweird.f32 %v8156_v59 }
 0x3e0   : > { %v2165_v55 = vsub.f32 %v7957_v8, %v2147_v9  ;;  %v1423_v8 = vsel %vm1422_vm4, %v8112_v63, %v1419_v53  ;;  %v1598_v9 = vmul.f32 %v8156_v59, %v8047_v42  ;;  %v1440_v63 = vand.u32 2147483648, %v7990_v20 }
 0x3e1   : > { %v1428_v21 = vsel %vm1425_vm6, %v1427_v2, %v1423_v8  ;;  %v1594_v8 = vand.u32 2147483648, %v8033_v11  ;;  %v1437_v34 = vsel %vm8188_vm9, %v8128_v62, %v1433_v22  ;;  %vm1439_vm12 = vcmp.eq.f32.partialorder %v1438_v57, 8.507059e+37 }
 0x3e2   : > { %v8164_v56 = vpop.eup %6625  ;;  %v2195_v32 = vmul.f32 1.442695, %v2165_v55  ;;  %v4509_v26 = vpop.permute.xlu0 %4508  ;;  %v1445_v55 = vsub.f32 1.0, %v1444_v36  ;;  %v1599_v54 = vsub.f32 1.0, %v1598_v9  ;;  %v1592_v9 = vand.u32 2147483647, %v8033_v11 }
 0x3e3   : > { %10275 = vst [vmem:[#allocation67_spill] sm:$0xff] %v8164_v56  ;;  %6149 = vmatmul.msk.f32.vlgmr.msra.gmra.mxu2 %vm425_vm1, %v8164_v56  ;;  %v8180_v53 = vpop.eup %6627  ;;  %v1639_v2 = vmul.f32 %v1428_v21, %v7856_v14  ;;  %v1441_v22 = vor.u32 1.1754944e-38, %v1440_v63  ;;  %v1591_v14 = vsel %vm8209_vm11, %v8132_v50, %v1587_v6  ;;  %v1595_v12 = vor.u32 1.1754944e-38, %v1594_v8 }
 0x3e4   : > { %6631 = vpow2.f32 %v2195_v32  ;;  %6248 = vmatpush.xpose.msk.msra.mxu2 %vm425_vm1, %v4509_v26  ;;  %v8184_v32 = vpop.permute.xlu1 %6479  ;;  %v8193_v36 = vpop.eup %6629  ;;  %v1458_v20 = vmul.f32 %v8180_v53, %v7998_v0  ;;  %v1446_v62 = vmul.f32 %v8152_v60, %v1445_v55  ;;  %v1600_v21 = vmul.f32 %v8156_v59, %v1599_v54 }
 0x3e5   : > { %6633 = vrcp.f32 %v7972_v23  ;;  %v1612_v11 = vmul.f32 %v8193_v36, %v8043_v58  ;;  %v1442_v55 = vsel %vm1439_vm12, %v1441_v22, %v1437_v34  ;;  %vm1593_vm13 = vcmp.eq.f32.partialorder %v1592_v9, 8.507059e+37 }
 0x3e6   : > { %6635 = vrcp.f32 %v8059_v46  ;;  %v1459_v63 = vsub.f32 1.0, %v1458_v20  ;;  %v1596_v30 = vsel %vm1593_vm13, %v1595_v12, %v1591_v14  ;;  %v1447_v49 = vadd.f32 %v8152_v60, %v1446_v62 }
 0x3e7   : > { %v8186_v26 = vpop.xlane.xlu2 %985  ;;  %6637 = vrcp.f32 %v8008_v47  ;;  %v1613_v6 = vsub.f32 1.0, %v1612_v11  ;;  %v1640_v8 = vmul.f32 %v1442_v55, %v7835_v18  ;;  %v1608_v20 = vand.u32 2147483648, %v8047_v42 }
 0x3e8   : > { %v1651_v22 = vmul.f32 %v1596_v30, %v7894_v39  ;;  %v1452_v18 = vand.u32 2147483647, %v7960_v10  ;;  %vm1602_vm4 = vweird.f32 %v8047_v42  ;;  %v1606_v11 = vand.u32 2147483647, %v8047_v42 }
 0x3e9   : > { %vm8255_vm5 = vmor %vm1602_vm4, %vm1603_vm15  ;;  %v1460_v39 = vmul.f32 %v8180_v53, %v1459_v63  ;;  %v1609_v63 = vor.u32 1.1754944e-38, %v1608_v20  ;;  %vm1463_vm8 = vweird.f32 %v8180_v53  ;;  %vm1617_vm9 = vweird.f32 %v8193_v36 }
 0x3ea   : > { %v8203_v56 = vpop.eup %6631  ;;  %vm1453_vm6 = vcmp.eq.f32.partialorder %v1452_v18, 8.507059e+37  ;;  %vm1607_vm7 = vcmp.eq.f32.partialorder %v1606_v11, 8.507059e+37  ;;  %vm1616_vm11 = vweird.f32 %v8043_v58  ;;  %vm8285_vm12 = vmor %vm1462_vm10, %vm1463_vm8  ;;  %v1620_v11 = vand.u32 2147483647, %v8043_v58 }
 0x3eb   : > { %6150 = vmatmul.msk.f32.vlgmr.msra.gmra.mxu3 %vm425_vm1, %v8203_v56  ;;  %6168 = vmatmul.msk.f32.vlgmr.msrb.gmra.mxu2 %vm425_vm1, %v1639_v2  ;;  %v8229_v50 = vpop.eup %6633  ;;  %v1454_v2 = vand.u32 2147483648, %v7960_v10  ;;  %v1614_v10 = vmul.f32 %v8193_v36, %v1613_v6  ;;  %vm1618_vm13 = vmor %vm1616_vm11, %vm1617_vm9  ;;  %vm1476_vm4 = vweird.f32 %v7972_v23  ;;  %vm1490_vm11 = vweird.f32 %v8008_v47 }
 0x3ec   : > { %6184 = vmatpush.xpose.msk.msra.mxu3 %vm425_vm1, %v7858_v31  ;;  %v1601_v31 = vadd.f32 %v8156_v59, %v1600_v21  ;;  %v8236_v34 = vpop.eup %6635  ;;  %v1451_v21 = vsel %vm8243_vm3, %v8152_v60, %v1447_v49  ;;  %v1468_v49 = vand.u32 2147483648, %v7998_v0  ;;  %vm1621_vm15 = vcmp.eq.f32.partialorder %v1620_v11, 8.507059e+37 }
 0x3ed   : > { %v8260_v12 = vpop.eup %6637  ;;  %v1626_v42 = vmul.f32 %v8236_v34, %v8059_v46  ;;  %v1455_v55 = vor.u32 1.1754944e-38, %v1454_v2  ;;  %vm1477_vm2 = vweird.f32 %v8229_v50  ;;  %vm1631_vm3 = vweird.f32 %v8236_v34 }
 0x3ee   : > { %v1605_v60 = vsel %vm8255_vm5, %v8156_v59, %v1601_v31  ;;  %v1615_v59 = vadd.f32 %v8193_v36, %v1614_v10  ;;  %v1466_v31 = vand.u32 2147483647, %v7998_v0  ;;  %vm1630_vm5 = vweird.f32 %v8059_v46 }
 0x3ef   : > { %v8231_v57 = vpop.permute.xlu2 %6489  ;;  %v2150_v54 = vpop.xlane.xlu1 %2149  ;;  %v1456_v6 = vsel %vm1453_vm6, %v1455_v55, %v1451_v21  ;;  %vm8321_vm6 = vmor %vm1476_vm4, %vm1477_vm2  ;;  %vm1491_vm10 = vweird.f32 %v8260_v12  ;;  %v1496_v11 = vand.u32 2147483648, %v8008_v47 }
 0x3f0   : > { %v2166_v9 = vsub.f32 %v7984_v27, %v2150_v54  ;;  %v1472_v27 = vmul.f32 %v8229_v50, %v7972_v23  ;;  %v1610_v54 = vsel %vm1607_vm7, %v1609_v63, %v1605_v60  ;;  %v1641_v2 = vmul.f32 %v1456_v6, %v7815_v15  ;;  %vm1632_vm7 = vmor %vm1630_vm5, %vm1631_vm3 }
 0x3f1   : > { %v1652_v20 = vmul.f32 %v1610_v54, %v7870_v51  ;;  %v1469_v51 = vor.u32 1.1754944e-38, %v1468_v49  ;;  %vm1467_vm14 = vcmp.eq.f32.partialorder %v1466_v31, 8.507059e+37  ;;  %v1636_v63 = vand.u32 2147483648, %v8059_v46 }
 0x3f2   : > { %v2197_v14 = vmul.f32 1.442695, %v2166_v9  ;;  %v1473_v9 = vsub.f32 1.0, %v1472_v27  ;;  %v1482_v49 = vand.u32 2147483648, %v7972_v23  ;;  %vm1518_vm5 = vweird.f32 %v8027_v37 }
 0x3f3   : > { %6169 = vmatmul.msk.f32.gmra.mxu2 %vm425_vm1, %v1640_v8  ;;  %6180 = vmatmul.msk.f32.vlgmr.msrb.gmra.mxu3 %vm425_vm1, %v1651_v22  ;;  %v1461_v8 = vadd.f32 %v8180_v53, %v1460_v39  ;;  %v1627_v22 = vsub.f32 1.0, %v1626_v42 }
 0x3f4   : > { %6639 = vpow2.f32 %v2197_v14  ;;  %6188 = vmatpush.xpose.msk.msrb.mxu3 %vm425_vm1, %v7762_v17  ;;  %v1622_v17 = vand.u32 2147483648, %v8043_v58  ;;  %v1486_v14 = vmul.f32 %v8260_v12, %v8008_v47  ;;  %v1619_v58 = vsel %vm1618_vm13, %v8193_v36, %v1615_v59 }
 0x3f5   : > { %6641 = vrcp.f32 %v7992_v35  ;;  %v1465_v0 = vsel %vm8285_vm12, %v8180_v53, %v1461_v8  ;;  %v1628_v15 = vmul.f32 %v8236_v34, %v1627_v22  ;;  %v1474_v21 = vmul.f32 %v8229_v50, %v1473_v9  ;;  %vm1492_vm12 = vmor %vm1490_vm11, %vm1491_vm10 }
 0x3f6   : > { %v1623_v30 = vor.u32 1.1754944e-38, %v1622_v17  ;;  %v1470_v53 = vsel %vm1467_vm14, %v1469_v51, %v1465_v0  ;;  %v1487_v39 = vsub.f32 1.0, %v1486_v14  ;;  %v1480_v8 = vand.u32 2147483647, %v7972_v23  ;;  %v8343_v17 = vpop.permute.xlu0 %6509 }
 0x3f7   : > { %v8275_v62 = vpop.permute.xlu2 %6494  ;;  %v1475_v36 = vadd.f32 %v8229_v50, %v1474_v21  ;;  %v1629_v60 = vadd.f32 %v8236_v34, %v1628_v15  ;;  %v1634_v9 = vand.u32 2147483647, %v8059_v46  ;;  %6643 = vrcp.f32 %v8027_v37 }
 0x3f8   : > { %v1624_v10 = vsel %vm1621_vm15, %v1623_v30, %v1619_v58  ;;  %v1488_v22 = vmul.f32 %v8260_v12, %v1487_v39  ;;  %v1637_v23 = vor.u32 1.1754944e-38, %v1636_v63  ;;  %v1483_v59 = vor.u32 1.1754944e-38, %v1482_v49  ;;  %v10288_v49 = vld [vmem:[#allocation30_spill] sm:$0xff] }
 0x3f9   : > { %v1653_v6 = vmul.f32 %v1624_v10, %v7846_v48  ;;  %v1479_v48 = vsel %vm8321_vm6, %v8229_v50, %v1475_v36  ;;  %v1633_v46 = vsel %vm1632_vm7, %v8236_v34, %v1629_v60  ;;  %vm1481_vm8 = vcmp.eq.f32.partialorder %v1480_v8, 8.507059e+37 }
 0x3fa   : > { %v8290_v27 = vpop.eup %6639  ;;  %vm1635_vm9 = vcmp.eq.f32.partialorder %v1634_v9, 8.507059e+37  ;;  %v1484_v31 = vsel %vm1481_vm8, %v1483_v59, %v1479_v48  ;;  %v1489_v18 = vadd.f32 %v8260_v12, %v1488_v22  ;;  %v1494_v0 = vand.u32 2147483647, %v8008_v47 }
 0x3fb   : > { %6170 = vmatmul.msk.f32.gmra.mxu2 %vm425_vm1, %v1641_v2  ;;  %6181 = vmatmul.msk.f32.gmra.mxu3 %vm425_vm1, %v1652_v20  ;;  %v8313_v55 = vpop.eup %6641  ;;  %v1638_v2 = vsel %vm1635_vm9, %v1637_v23, %v1633_v46  ;;  %6645 = vrcp.f32 %v8000_v1  ;;  %v1497_v21 = vor.u32 1.1754944e-38, %v1496_v11  ;;  %vm1504_vm15 = vweird.f32 %v7992_v35  ;;  %v10295_v11 = vld [vmem:[#allocation50_spill] sm:$0xff] }
 0x3fc   : > { %6151 = vmatmul.msk.f32.vlgmr.msra.gmra.mxu0 %vm425_vm1, %v8290_v27  ;;  %v1654_v14 = vmul.f32 %v1638_v2, %v7908_v43  ;;  %v1493_v58 = vsel %vm1492_vm12, %v8260_v12, %v1489_v18  ;;  %vm1495_vm13 = vcmp.eq.f32.partialorder %v1494_v0, 8.507059e+37  ;;  %vm1505_vm14 = vweird.f32 %v8313_v55  ;;  %v10294_v18 = vld [vmem:[#allocation45_spill] sm:$0xff] }
 0x3fd   : > { %6190 = vmatpush.xpose.msk.msra.mxu0 %vm425_vm1, %v7878_v7  ;;  %v1642_v7 = vmul.f32 %v1470_v53, %v7866_v16  ;;  %v1500_v16 = vmul.f32 %v8313_v55, %v7992_v35  ;;  %v1510_v12 = vand.u32 2147483648, %v7992_v35  ;;  %v1508_v10 = vand.u32 2147483647, %v7992_v35  ;;  %vm1506_vm2 = vmor %vm1504_vm15, %vm1505_vm14  ;;  %v10290_v35 = vld [vmem:[#allocation48_spill] sm:$0xff] }
 0x3fe   : > { %6647 = vrcp.f32 %v8015_v52  ;;  %v1524_v9 = vand.u32 2147483648, %v8027_v37  ;;  %v1522_v22 = vand.u32 2147483647, %v8027_v37  ;;  %vm1532_vm9 = vweird.f32 %v8000_v1 }
 0x3ff   : > { %v8309_v42 = vpop.permute.xlu2 %6499  ;;  %v1501_v20 = vsub.f32 1.0, %v1500_v16  ;;  %vm1509_vm3 = vcmp.eq.f32.partialorder %v1508_v10, 8.507059e+37  ;;  %v10291_v16 = vld [vmem:[#allocation39_spill] sm:$0xff]  ;;  %6649 = vrcp.f32 %v8118_v24 }
 0x400   : > { %vm1523_vm7 = vcmp.eq.f32.partialorder %v1522_v22, 8.507059e+37  ;;  %6651 = vrcp.f32 %v8186_v26  ;;  %v10298_v10 = vld [vmem:[#allocation35_spill] sm:$0xff]  ;;  %v1550_v22 = vand.u32 2147483647, %v8015_v52 }
 0x401   : > { %v1502_v51 = vmul.f32 %v8313_v55, %v1501_v20  ;;  %v10293_v20 = vld [vmem:[#allocation40_spill] sm:$0xff] }
 0x402   : > { %vm1551_vm15 = vcmp.eq.f32.partialorder %v1550_v22, 8.507059e+37 }
 0x403   : > { %6171 = vmatmul.msk.f32.gmra.mxu2 %vm425_vm1, %v1642_v7  ;;  %6182 = vmatmul.msk.f32.gmra.mxu3 %vm425_vm1, %v1653_v6  ;;  %v1503_v53 = vadd.f32 %v8313_v55, %v1502_v51  ;;  %v1511_v7 = vor.u32 1.1754944e-38, %v1510_v12  ;;  %v1538_v51 = vand.u32 2147483648, %v8000_v1 }
 0x404   : > { %6187 = vmatmul.msk.f32.vlgmr.msrb.gmra.mxu0 %vm425_vm1, %v7864_v33  ;;  %v8351_v33 = vpop.eup %6643 }
 0x405   : > { %6194 = vmatpush.xpose.msk.msrb.mxu0 %vm425_vm1, %v7886_v25  ;;  %v1643_v25 = vmul.f32 %v1484_v31, %v7844_v13  ;;  %v1514_v15 = vmul.f32 %v8351_v33, %v8027_v37  ;;  %v1498_v13 = vsel %vm1495_vm13, %v1497_v21, %v1493_v58  ;;  %v8373_v39 = vpop.eup %6645  ;;  %v1507_v63 = vsel %vm1506_vm2, %v8313_v55, %v1503_v53  ;;  %v10292_v31 = vld [vmem:[#allocation31_spill] sm:$0xff]  ;;  %v10296_v58 = vld [vmem:[#allocation32_spill] sm:$0xff]  ;;  %v10297_v53 = vld [vmem:[#allocation34_spill] sm:$0xff] }
 0x406   : > { %v1528_v60 = vmul.f32 %v8373_v39, %v8000_v1  ;;  %v1512_v6 = vsel %vm1509_vm3, %v1511_v7, %v1507_v63  ;;  %vm1519_vm4 = vweird.f32 %v8351_v33  ;;  %v8400_v55 = vpop.eup %6647  ;;  %v1525_v37 = vor.u32 1.1754944e-38, %v1524_v9 }
 0x407   : > { %v8346_v50 = vpop.permute.xlu2 %6504  ;;  %v8348_v34 = vpop.permute.xlu1 %4506  ;;  %v1515_v43 = vsub.f32 1.0, %v1514_v15  ;;  %v1645_v48 = vmul.f32 %v1512_v6, %v10291_v16  ;;  %vm1520_vm6 = vmor %vm1518_vm5, %vm1519_vm4  ;;  %v1542_v23 = vmul.f32 %v8400_v55, %v8015_v52  ;;  %vm1533_vm8 = vweird.f32 %v8373_v39  ;;  %v10317_v16 = vld [vmem:[#allocation27_spill] sm:$0xff] }
 0x408   : > { %v1529_v8 = vsub.f32 1.0, %v1528_v60  ;;  %vm1534_vm10 = vmor %vm1532_vm9, %vm1533_vm8  ;;  %v10300_v60 = vld [vmem:[#allocation33_spill] sm:$0xff]  ;;  %vm1547_vm12 = vweird.f32 %v8400_v55  ;;  %vm1546_vm13 = vweird.f32 %v8015_v52  ;;  %vm1560_vm3 = vweird.f32 %v8118_v24 }
 0x409   : > { %v1516_v36 = vmul.f32 %v8351_v33, %v1515_v43  ;;  %vm8456_vm14 = vmor %vm1546_vm13, %vm1547_vm12 }
 0x40a   : > { %v1530_v46 = vmul.f32 %v8373_v39, %v1529_v8  ;;  %v10301_v8 = vld [vmem:[#allocation36_spill] sm:$0xff] }
 0x40b   : > { %6172 = vmatmul.msk.f32.gmra.mxu2 %vm425_vm1, %v1643_v25  ;;  %6183 = vmatmul.msk.f32.gmra.mxu3 %vm425_vm1, %v1654_v14  ;;  %v1517_v54 = vadd.f32 %v8351_v33, %v1516_v36  ;;  %v1543_v14 = vsub.f32 1.0, %v1542_v23 }
 0x40c   : > { %6191 = vmatmul.msk.f32.vlgmr.msra.gmra.mxu0 %vm425_vm1, %v7799_v41  ;;  %v8378_v41 = vpop.permute.xlu0 %4590  ;;  %v1531_v15 = vadd.f32 %v8373_v39, %v1530_v46 }
 0x40d   : > { %6198 = vmatpush.xpose.msk.msra.mxu0 %vm425_vm1, %v7813_v61  ;;  %v1644_v61 = vmul.f32 %v1498_v13, %v7821_v29  ;;  %v10289_v29 = vld [vmem:[#allocation44_spill] sm:$0xff]  ;;  %v1521_v2 = vsel %vm1520_vm6, %v8351_v33, %v1517_v54  ;;  %v8426_v33 = vpop.eup %6649  ;;  %v1536_v13 = vand.u32 2147483647, %v8000_v1  ;;  %v1544_v43 = vmul.f32 %v8400_v55, %v1543_v14 }
 0x40e   : > { %v1526_v25 = vsel %vm1523_vm7, %v1525_v37, %v1521_v2  ;;  %v1535_v12 = vsel %vm1534_vm10, %v8373_v39, %v1531_v15  ;;  %v10299_v1 = vld [vmem:[#allocation28_spill] sm:$0xff]  ;;  %v10304_v2 = vld [vmem:[#allocation42_spill] sm:$0xff]  ;;  %vm1561_vm2 = vweird.f32 %v8426_v33  ;;  %v1566_v15 = vand.u32 2147483648, %v8118_v24 }
 0x40f   : > { %v8370_v47 = vpop.permute.xlu2 %4674  ;;  %v4593_v30 = vpop.permute.xlu1 %4592  ;;  %v1646_v21 = vmul.f32 %v1526_v25, %v10296_v58  ;;  %vm1537_vm11 = vcmp.eq.f32.partialorder %v1536_v13, 8.507059e+37  ;;  %v1545_v39 = vadd.f32 %v8400_v55, %v1544_v43  ;;  %v10306_v37 = vld [vmem:[#allocation46_spill] sm:$0xff]  ;;  %v1564_v58 = vand.u32 2147483647, %v8118_v24  ;;  %vm1562_vm4 = vmor %vm1560_vm3, %vm1561_vm2  ;;  %v10309_v43 = vld [vmem:[#allocation57_spill] sm:$0xff] }
 0x410   : > { %6254 = vmatpush.xpose.msk.msrb.mxu2 %vm425_vm1, %v4593_v30  ;;  %v1556_v30 = vmul.f32 %v8426_v33, %v8118_v24  ;;  %v10312_v24 = vld [vmem:[#allocation47_spill] sm:$0xff]  ;;  %vm1574_vm7 = vweird.f32 %v8186_v26 }
 0x411   : > { %v1549_v23 = vsel %vm8456_vm14, %v8400_v55, %v1545_v39  ;;  %vm1565_vm5 = vcmp.eq.f32.partialorder %v1564_v58, 8.507059e+37 }
 0x412   : > { %v1557_v7 = vsub.f32 1.0, %v1556_v30  ;;  %v6477_v30 = vunpack.i.h.bf16 %v10309_v43 }
 0x413   : > { %6173 = vmatmul.msk.f32.gmra.mxu2 %vm425_vm1, %v1644_v61  ;;  %6185 = vmatmul.msk.f32.vlgmr.msra.gmra.mxu3 %vm425_vm1, %v7751_v4  ;;  %v1539_v61 = vor.u32 1.1754944e-38, %v1538_v51 }
 0x414   : > { %6192 = vmatpush.xpose.msk.msra.mxu3 %vm425_vm1, %v10288_v49  ;;  %6195 = vmatmul.msk.f32.vlgmr.msrb.gmra.mxu0 %vm425_vm1, %v10289_v29  ;;  %v8410_v59 = vpop.permute.xlu0 %4676  ;;  %v8450_v29 = vpop.eup %6651 }
 0x415   : > { %6202 = vmatpush.xpose.msk.msrb.mxu0 %vm425_vm1, %v10290_v35  ;;  %v1540_v63 = vsel %vm1537_vm11, %v1539_v61, %v1535_v12  ;;  %v1552_v35 = vand.u32 2147483648, %v8015_v52  ;;  %v1570_v46 = vmul.f32 %v8450_v29, %v8186_v26  ;;  %v10305_v52 = vld [vmem:[#allocation53_spill] sm:$0xff]  ;;  %v1567_v12 = vor.u32 1.1754944e-38, %v1566_v15  ;;  %v10310_v61 = vld [vmem:[#allocation43_spill] sm:$0xff] }
 0x416   : > { %v1647_v9 = vmul.f32 %v1540_v63, %v10301_v8  ;;  %vm1575_vm6 = vweird.f32 %v8450_v29  ;;  %v10314_v8 = vld [vmem:[#allocation25_spill] sm:$0xff] }
 0x417   : > { %v8398_v4 = vpop.permute.xlu2 %4648  ;;  %v1571_v14 = vsub.f32 1.0, %v1570_v46  ;;  %vm1576_vm8 = vmor %vm1574_vm7, %vm1575_vm6  ;;  %v6476_v46 = vunpack.i.l.bf16 %v10309_v43 }
 0x41b   : > { %6174 = vmatmul.msk.f32.gmra.mxu2 %vm425_vm1, %v1645_v48  ;;  %6189 = vmatmul.msk.f32.vlgmr.msrb.gmra.mxu3 %vm425_vm1, %v10292_v31  ;;  %v1558_v48 = vmul.f32 %v8426_v33, %v1557_v7  ;;  %v1553_v31 = vor.u32 1.1754944e-38, %v1552_v35  ;;  %v1578_v7 = vand.u32 2147483647, %v8186_v26  ;;  %v6482_v35 = vunpack.i.h.bf16 %v8184_v32 }
 0x41c   : > { %6196 = vmatpush.xpose.msk.msrb.mxu3 %vm425_vm1, %v10293_v20  ;;  %6199 = vmatmul.msk.f32.vlgmr.msra.gmra.mxu0 %vm425_vm1, %v10294_v18  ;;  %v8444_v36 = vpop.permute.xlu0 %4564  ;;  %v10307_v20 = vld [vmem:[#allocation54_spill] sm:$0xff] }
 0x41d   : > { %6206 = vmatpush.xpose.msk.msra.mxu0 %vm425_vm1, %v10295_v11  ;;  %v1554_v25 = vsel %vm1551_vm15, %v1553_v31, %v1549_v23  ;;  %v1559_v55 = vadd.f32 %v8426_v33, %v1558_v48  ;;  %vm1579_vm9 = vcmp.eq.f32.partialorder %v1578_v7, 8.507059e+37  ;;  %v6481_v23 = vunpack.i.l.bf16 %v8184_v32  ;;  %v10319_v31 = vld [vmem:[#allocation52_spill] sm:$0xff] }
 0x41f   : > { %v8423_v0 = vpop.permute.xlu2 %4646 }
 0x423   : > { %6175 = vmatmul.msk.f32.gmra.mxu2 %vm425_vm1, %v1646_v21  ;;  %6193 = vmatmul.msk.f32.vlgmr.msra.gmra.mxu3 %vm425_vm1, %v10297_v53  ;;  %v10308_v21 = vld [vmem:[#allocation41_spill] sm:$0xff]  ;;  %v1563_v53 = vsel %vm1562_vm4, %v8426_v33, %v1559_v55  ;;  %v1580_v33 = vand.u32 2147483648, %v8186_v26  ;;  %v10316_v26 = vld [vmem:[#allocation26_spill] sm:$0xff] }
 0x424   : > { %6200 = vmatpush.xpose.msk.msra.mxu3 %vm425_vm1, %v10298_v10  ;;  %6203 = vmatmul.msk.f32.vlgmr.msrb.gmra.mxu0 %vm425_vm1, %v10299_v1  ;;  %v1648_v13 = vmul.f32 %v1554_v25, %v10308_v21  ;;  %v10311_v10 = vld [vmem:[#allocation55_spill] sm:$0xff]  ;;  %v1568_v1 = vsel %vm1565_vm5, %v1567_v12, %v1563_v53 }
 0x425   : > { %6210 = vmatpush.xpose.msk.msrb.mxu0 %vm425_vm1, %v10300_v60 }
 0x427   : > { %v6515_v49 = vpop.permute.xlu2 %6514 }
 0x428   : > { %v6517_v6 = vunpack.i.h.bf16 %v6515_v49  ;;  %v6516_v54 = vunpack.i.l.bf16 %v6515_v49  ;;  %v10313_v49 = vld [vmem:[#allocation37_spill] sm:$0xff] }
 0x429   : > { %v1649_v39 = vmul.f32 %v1568_v1, %v10313_v49  ;;  %v10328_v1 = vld [vmem:[#allocation20_spill] sm:$0xff] }
 0x42a   : > { %2268 = vmatpush.msra.mxu1 %v6516_v54  ;;  %v1581_v54 = vor.u32 1.1754944e-38, %v1580_v33 }
 0x42b   : > { %6176 = vmatmul.msk.f32.gmra.mxu2 %vm425_vm1, %v1647_v9  ;;  %6197 = vmatmul.msk.f32.vlgmr.msrb.gmra.mxu3 %vm425_vm1, %v10304_v2  ;;  %v10315_v9 = vld [vmem:[#allocation29_spill] sm:$0xff] }
 0x42c   : > { %2372 = vmatpush.msrb.mxu1 %v6517_v6  ;;  %6207 = vmatmul.msk.f32.vlgmr.msra.gmra.mxu0 %vm425_vm1, %v10305_v52 }
 0x42d   : > { %6204 = vmatpush.xpose.msk.msrb.mxu3 %vm425_vm1, %v10306_v37  ;;  %6214 = vmatpush.xpose.msk.msra.mxu0 %vm425_vm1, %v10307_v20  ;;  %v2105_v18 = vpop.xlane.xlu0 %2104  ;;  %v8530_v32 = vpop.f32.mrf.mxu0 }
 0x42e   : > { %v2151_v11 = vsub.f32 %v7880_v5, %v2105_v18  ;;  %v1572_v5 = vmul.f32 %v8450_v29, %v1571_v14 }
 0x42f   : > { %v4761_v2 = vpop.permute.xlu2 %4760 }
 0x430   : > { %v2167_v51 = vmul.f32 1.442695, %v2151_v11  ;;  %v1573_v60 = vadd.f32 %v8450_v29, %v1572_v5  ;;  %v10326_v5 = vld [vmem:[#allocation19_spill] sm:$0xff] }
 0x432   : > { %6653 = vpow2.f32 %v2167_v51  ;;  %v1577_v6 = vsel %vm1576_vm8, %v8450_v29, %v1573_v60  ;;  %v10318_v29 = vld [vmem:[#allocation51_spill] sm:$0xff]  ;;  %v8583_v60 = vpop.permute.xlu1 %4536 }
 0x433   : > { %6177 = vmatmul.msk.f32.gmra.mxu2 %vm425_vm1, %v1648_v13  ;;  %6201 = vmatmul.msk.f32.vlgmr.msra.gmra.mxu3 %vm425_vm1, %v10310_v61  ;;  %v1582_v22 = vsel %vm1579_vm9, %v1581_v54, %v1577_v6 }
 0x434   : > { %6211 = vmatmul.msk.f32.vlgmr.msrb.gmra.mxu0 %vm425_vm1, %v10311_v10  ;;  %6208 = vmatpush.xpose.msk.msra.mxu3 %vm425_vm1, %v10312_v24  ;;  %v1650_v48 = vmul.f32 %v1582_v22, %v10317_v16  ;;  %v10327_v24 = vld [vmem:[#allocation18_spill] sm:$0xff] }
 0x435   : > { %3768 = vmatpush.msrb.mxu0 %v6477_v30 }
 0x438   : > { %v8494_v63 = vpop.eup %6653 }
 0x439   : > { %6136 = vmatmul.msk.f32.vlgmr.msra.gmra.mxu1 %vm425_vm1, %v8494_v63 }
 0x43a   : > { %v8589_v7 = vpop.permute.xlu1 %4534 }
 0x43b   : > { %6178 = vmatmul.msk.f32.gmra.mxu2 %vm425_vm1, %v1649_v39  ;;  %6205 = vmatmul.msk.f32.vlgmr.msrb.gmra.mxu3 %vm425_vm1, %v10314_v8 }
 0x43c   : > { %6215 = vmatmul.msk.f32.vlgmr.msra.gmra.mxu0 %vm425_vm1, %v10315_v9  ;;  %6212 = vmatpush.xpose.msk.msrb.mxu3 %vm425_vm1, %v10316_v26 }
 0x43d   : > { %3820 = vmatpush.msra.mxu0 %v6482_v35  ;;  %v8534_v37 = vpop.f32.mrf.mxu0 }
 0x442   : > { %v8597_v6 = vpop.permute.xlu1 %4620 }
 0x443   : > { %6179 = vmatmul.msk.f32.gmra.mxu2 %vm425_vm1, %v1650_v48  ;;  %6209 = vmatmul.msk.f32.vlgmr.msra.gmra.mxu3 %vm425_vm1, %v10318_v29  ;;  %v10329_v29 = vld [vmem:[#allocation38_spill] sm:$0xff] }
 0x444   : > { %3742 = vmatpush.msra.mxu3 %v6476_v46 }
 0x446   : > { %v8526_v52 = vpop.f32.mrf.mxu3 }
 0x44a   : > { %v8605_v9 = vpop.permute.xlu1 %4562 }
 0x44b   : > { %6249 = vmatmul.msk.f32.vlgmr.msra.gmra.mxu2 %vm425_vm1, %v8348_v34  ;;  %6213 = vmatmul.msk.f32.vlgmr.msrb.gmra.mxu3 %vm425_vm1, %v10319_v31  ;;  %v8619_v31 = vpop.permute.xlu0 %4730 }
 0x44c   : > { %6260 = vmatpush.xpose.msk.msra.mxu2 %vm425_vm1, %v8410_v59  ;;  %3794 = vmatpush.msrb.mxu3 %v6481_v23  ;;  %v2115_v23 = vsel %vm425_vm1, %v10329_v29, -inf }
 0x44e   : > { %v8532_v34 = vpop.f32.mrf.mxu3 }
 0x452   : > { %v8613_v48 = vpop.permute.xlu1 %4618 }
 0x453   : > { %6255 = vmatmul.msk.f32.vlgmr.msrb.gmra.mxu2 %vm425_vm1, %v8378_v41 }
 0x454   : > { %6266 = vmatpush.xpose.msk.msrb.mxu2 %vm425_vm1, %v4761_v2 }
 0x456   : > { %v8536_v20 = vpop.f32.mrf.mxu3 }
 0x458   : > { %v8538_v59 = vpop.f32.mrf.mxu0 }
 0x45b   : > { %6261 = vmatmul.msk.f32.vlgmr.msra.gmra.mxu2 %vm425_vm1, %v8370_v47 }
 0x46e   : > { %v8540_v18 = vpop.f32.mrf.mxu3 }
 0x46f   : > { %10320 = vst [vmem:[#allocation30_spill] sm:$0xff] %v8540_v18 }
 0x476   : > { %v8544_v11 = vpop.f32.mrf.mxu3 }
 0x477   : > { %10322 = vst [vmem:[#allocation48_spill] sm:$0xff] %v8544_v11 }
 0x479   : > { %v8542_v41 = vpop.f32.mrf.mxu0 }
 0x47a   : > { %10321 = vst [vmem:[#allocation44_spill] sm:$0xff] %v8542_v41 }
 0x47e   : > { %v8547_v47 = vpop.f32.mrf.mxu3 }
 0x47f   : > { %10323 = vst [vmem:[#allocation39_spill] sm:$0xff] %v8547_v47 }
 0x481   : > { %v3182_v25 = vpop.f32.mrf.mxu0 }
 0x482   : > { %v3580_v55 = vsel %vm425_vm1, %v3182_v25, -inf }
 0x483   : > { %3581 = vmax.xlane.f32.xlu0 %v3580_v55 }
 0x486   : > { %v8557_v21 = vpop.f32.mrf.mxu3 }
 0x487   : > { %10324 = vst [vmem:[#allocation31_spill] sm:$0xff] %v8557_v21 }
 0x489   : > { %v8549_v14 = vpop.f32.mrf.mxu0 }
 0x48a   : > { %v3586_v15 = vsel %vm425_vm1, %v8549_v14, -inf }
 0x48b   : > { %3587 = vmax.xlane.f32.xlu0 %v3586_v15  ;;  %v8625_v15 = vpop.permute.xlu1 %4704 }
 0x48e   : > { %v8563_v30 = vpop.f32.mrf.mxu3 }
 0x48f   : > { %10325 = vst [vmem:[#allocation40_spill] sm:$0xff] %v8563_v30 }
 0x491   : > { %v8553_v51 = vpop.f32.mrf.mxu0 }
 0x492   : > { %v3592_v58 = vsel %vm425_vm1, %v8553_v51, -inf }
 0x493   : > { %3593 = vmax.xlane.f32.xlu2 %v3592_v58 }
 0x496   : > { %v8571_v61 = vpop.f32.mrf.mxu3 }
 0x497   : > { %v3577_v10 = vsel %vm425_vm1, %v8571_v61, -inf }
 0x499   : > { %v8559_v13 = vpop.f32.mrf.mxu0 }
 0x49a   : > { %v3598_v43 = vsel %vm425_vm1, %v8559_v13, -inf }
 0x49b   : > { %3599 = vmax.xlane.f32.xlu1 %v3598_v43 }
 0x49e   : > { %v8587_v33 = vpop.f32.mrf.mxu3 }
 0x49f   : > { %4816 = vrot.lane.b32.xlu0 %v10326_v5, %s6995_s7  ;;  %v3583_v22 = vsel %vm425_vm1, %v8587_v33, -inf }
 0x4a1   : > { %v8567_v53 = vpop.f32.mrf.mxu0 }
 0x4a2   : > { %v3604_v12 = vsel %vm425_vm1, %v8567_v53, -inf }
 0x4a3   : > { %3605 = vmax.xlane.f32.xlu1 %v3604_v12 }
 0x4a6   : > { %v8593_v39 = vpop.f32.mrf.mxu3 }
 0x4a7   : > { %4814 = vrot.lane.b32.xlu0 %v10326_v5, %s6996_s26  ;;  %v3589_v26 = vsel %vm425_vm1, %v8593_v39, -inf }
 0x4a9   : > { %v8591_v49 = vpop.f32.mrf.mxu0 }
 0x4aa   : > { %v3610_v35 = vsel %vm425_vm1, %v8591_v49, -inf }
 0x4ab   : > { %4788 = vrot.lane.b32.xlu2 %v10327_v24, %s6995_s7  ;;  %3578 = vmax.xlane.f32.xlu1 %v3577_v10 }
 0x4b1   : > { %v8599_v54 = vpop.f32.mrf.mxu0 }
 0x4b2   : > { %v3616_v8 = vsel %vm425_vm1, %v8599_v54, -inf }
 0x4b3   : > { %4786 = vrot.lane.b32.xlu2 %v10327_v24, %s6996_s26  ;;  %v8631_v24 = vpop.permute.xlu1 %4702 }
 0x4bb   : > { %4844 = vrot.lane.b32.xlu2 %v10328_v1, %s6995_s7 }
 0x4c4   : > { %4758 = vrot.lane.b32.xlu1 %v7234_v40, %s6996_s26  ;;  %v8603_v40 = vpop.f32.mrf.mxu3 }
 0x4c5   : > { %v3595_v46 = vsel %vm425_vm1, %v8603_v40, -inf }
 0x4cc   : > { %v8611_v16 = vpop.f32.mrf.mxu3 }
 0x4cd   : > { %v3601_v55 = vsel %vm425_vm1, %v8611_v16, -inf }
 0x4d1   : > { %3611 = vmax.xlane.f32.xlu0 %v3610_v35 }
 0x4d4   : > { %v8621_v2 = vpop.f32.mrf.mxu3 }
 0x4d5   : > { %v3607_v58 = vsel %vm425_vm1, %v8621_v2, -inf }
 0x4d9   : > { %3617 = vmax.xlane.f32.xlu0 %v3616_v8 }
 0x4dc   : > { %v8629_v12 = vpop.f32.mrf.mxu3 }
 0x4dd   : > { %v3613_v35 = vsel %vm425_vm1, %v8629_v12, -inf }
 0x4e1   : > { %3590 = vmax.xlane.f32.xlu0 %v3589_v26 }
 0x4e4   : > { %3584 = vmax.xlane.f32.xlu2 %v3583_v22 }
 0x4e9   : > { %3596 = vmax.xlane.f32.xlu0 %v3595_v46 }
 0x4ee   : > { %2116 = vmax.xlane.f32.xlu1 %v2115_v23  ;;  %v8641_v23 = vpop.f32.mrf.mxu2 }
 0x4f1   : > { %3602 = vmax.xlane.f32.xlu0 %v3601_v55  ;;  %v8643_v55 = vpop.f32.mrf.mxu3 }
 0x4f6   : > { %v3582_v43 = vpop.xlane.xlu0 %3581  ;;  %3608 = vmax.xlane.f32.xlu1 %v3607_v58  ;;  %v10330_v58 = vld [vmem:[#allocation21_spill] sm:$0xff]  ;;  %v8657_v30 = vpop.f32.mrf.mxu2 }
 0x4f7   : > { %v3626_v5 = vsub.f32 %v3182_v25, %v3582_v43  ;;  %v6487_v25 = vunpack.i.h.bf16 %v8141_v45  ;;  %v8651_v43 = vpop.permute.xlu1 %4732 }
 0x4f9   : > { %v3643_v10 = vmul.f32 1.442695, %v3626_v5 }
 0x4fb   : > { %6655 = vpow2.f32 %v3643_v10 }
 0x4fc   : > { %4842 = vrot.lane.b32.xlu2 %v10328_v1, %s6996_s26 }
 0x4fe   : > { %v3588_v8 = vpop.xlane.xlu0 %3587  ;;  %3614 = vmax.xlane.f32.xlu1 %v3613_v35 }
 0x4ff   : > { %v3628_v26 = vsub.f32 %v8549_v14, %v3588_v8  ;;  %v3619_v14 = vsel %vm425_vm1, %v8643_v55, -inf  ;;  %v6492_v8 = vunpack.i.h.bf16 %v8231_v57 }
 0x501   : > { %v8638_v22 = vpop.eup %6655  ;;  %v3647_v46 = vmul.f32 1.442695, %v3628_v26 }
 0x502   : > { %6217 = vmatmul.msk.f32.vlgmr.msrb.gmra.mxu0 %vm425_vm1, %v8638_v22 }
 0x503   : > { %6657 = vpow2.f32 %v3647_v46  ;;  %3872 = vmatpush.msrb.mxu0 %v6487_v25  ;;  %v10332_v25 = vld [vmem:[#allocation22_spill] sm:$0xff] }
 0x505   : > { %4872 = vrot.lane.b32.xlu0 %v10330_v58, %s6995_s7 }
 0x506   : > { %v3594_v5 = vpop.xlane.xlu2 %3593  ;;  %3620 = vmax.xlane.f32.xlu1 %v3619_v14 }
 0x507   : > { %v3630_v10 = vsub.f32 %v8553_v51, %v3594_v5  ;;  %v6497_v5 = vunpack.i.h.bf16 %v8275_v62 }
 0x509   : > { %v8654_v35 = vpop.eup %6657  ;;  %v3651_v26 = vmul.f32 1.442695, %v3630_v10 }
 0x50a   : > { %10331 = vst [vmem:[#allocation45_spill] sm:$0xff] %v8654_v35  ;;  %6219 = vmatmul.msk.f32.vlgmr.msra.gmra.mxu0 %vm425_vm1, %v8654_v35 }
 0x50b   : > { %6659 = vpow2.f32 %v3651_v26  ;;  %3924 = vmatpush.msra.mxu0 %v6492_v8  ;;  %v8671_v26 = vpop.f32.mrf.mxu2 }
 0x50d   : > { %4900 = vrot.lane.b32.xlu0 %v10332_v25, %s6995_s7 }
 0x50e   : > { %v3600_v46 = vpop.xlane.xlu1 %3599  ;;  %v8663_v21 = vpop.permute.xlu2 %4788 }
 0x50f   : > { %v3632_v51 = vsub.f32 %v8559_v13, %v3600_v46  ;;  %v6502_v13 = vunpack.i.h.bf16 %v8309_v42 }
 0x511   : > { %v8666_v14 = vpop.eup %6659  ;;  %v3655_v10 = vmul.f32 1.442695, %v3632_v51 }
 0x512   : > { %10333 = vst [vmem:[#allocation50_spill] sm:$0xff] %v8666_v14  ;;  %6221 = vmatmul.msk.f32.vlgmr.msrb.gmra.mxu0 %vm425_vm1, %v8666_v14  ;;  %v8690_v14 = vpop.f32.mrf.mxu0 }
 0x513   : > { %6661 = vpow2.f32 %v3655_v10  ;;  %3976 = vmatpush.msrb.mxu0 %v6497_v5  ;;  %v8681_v51 = vpop.f32.mrf.mxu2 }
 0x514   : > { %10335 = vst [vmem:[#allocation34_spill] sm:$0xff] %v8681_v51 }
 0x516   : > { %v3606_v8 = vpop.xlane.xlu1 %3605  ;;  %v8673_v47 = vpop.permute.xlu2 %4786 }
 0x517   : > { %v3634_v11 = vsub.f32 %v8567_v53, %v3606_v8  ;;  %v10336_v53 = vld [vmem:[#allocation24_spill] sm:$0xff] }
 0x519   : > { %v8676_v41 = vpop.eup %6661  ;;  %v3659_v46 = vmul.f32 1.442695, %v3634_v11  ;;  %v6507_v11 = vunpack.i.h.bf16 %v8346_v50 }
 0x51a   : > { %10334 = vst [vmem:[#allocation32_spill] sm:$0xff] %v8676_v41  ;;  %6223 = vmatmul.msk.f32.vlgmr.msra.gmra.mxu0 %vm425_vm1, %v8676_v41 }
 0x51b   : > { %6663 = vpow2.f32 %v3659_v46  ;;  %4028 = vmatpush.msra.mxu0 %v6502_v13  ;;  %v8696_v13 = vpop.f32.mrf.mxu2 }
 0x51c   : > { %10338 = vst [vmem:[#allocation28_spill] sm:$0xff] %v8696_v13 }
 0x51e   : > { %v4845_v5 = vpop.permute.xlu2 %4844  ;;  %v3579_v10 = vpop.xlane.xlu1 %3578 }
 0x51f   : > { %v3625_v18 = vsub.f32 %v8571_v61, %v3579_v10  ;;  %6272 = vmatpush.xpose.msk.msra.mxu2 %vm425_vm1, %v4845_v5  ;;  %4926 = vrot.lane.b32.xlu1 %v10336_v53, %s6996_s26  ;;  %v3622_v61 = vsel %vm425_vm1, %v8690_v14, -inf  ;;  %v6486_v5 = vunpack.i.l.bf16 %v8141_v45  ;;  %v8705_v10 = vpop.permute.xlu0 %4816  ;;  %v10342_v45 = vld [vmem:[#allocation59_spill] sm:$0xff] }
 0x521   : > { %v8687_v8 = vpop.eup %6663  ;;  %v3641_v41 = vmul.f32 1.442695, %v3625_v18 }
 0x522   : > { %10337 = vst [vmem:[#allocation35_spill] sm:$0xff] %v8687_v8  ;;  %6225 = vmatmul.msk.f32.vlgmr.msrb.gmra.mxu0 %vm425_vm1, %v8687_v8 }
 0x523   : > { %6665 = vpow2.f32 %v3641_v41  ;;  %4080 = vmatpush.msrb.mxu0 %v6507_v11  ;;  %v8703_v18 = vpop.f32.mrf.mxu2  ;;  %v10340_v11 = vld [vmem:[#allocation49_spill] sm:$0xff] }
 0x524   : > { %10339 = vst [vmem:[#allocation33_spill] sm:$0xff] %v8703_v18  ;;  %v2127_v51 = vsel %vm425_vm1, %v10340_v11, -inf }
 0x525   : > { %3623 = vmax.xlane.f32.xlu2 %v3622_v61 }
 0x527   : > { %v8712_v13 = vpop.permute.xlu0 %4814 }
 0x529   : > { %v8698_v46 = vpop.eup %6665 }
 0x52a   : > { %6216 = vmatmul.msk.f32.vlgmr.msra.gmra.mxu3 %vm425_vm1, %v8698_v46 }
 0x52b   : > { %3846 = vmatpush.msra.mxu3 %v6486_v5  ;;  %v8710_v61 = vpop.f32.mrf.mxu2  ;;  %v2202_v5 = vsel %vm425_vm1, %v10342_v45, 0.0 }
 0x52c   : > { %10341 = vst [vmem:[#allocation36_spill] sm:$0xff] %v8710_v61 }
 0x533   : > { %v8718_v18 = vpop.f32.mrf.mxu2 }
 0x534   : > { %10343 = vst [vmem:[#allocation42_spill] sm:$0xff] %v8718_v18 }
 0x536   : > { %v4759_v41 = vpop.permute.xlu1 %4758 }
 0x537   : > { %6267 = vmatmul.msk.f32.vlgmr.msrb.gmra.mxu2 %vm425_vm1, %v4759_v41  ;;  %2128 = vmax.xlane.f32.xlu0 %v2127_v51  ;;  %v2205_v51 = vsel %vm425_vm1, %v8082_v28, 0.0  ;;  %v6512_v28 = vunpack.i.h.bf16 %v8343_v17 }
 0x53d   : > { %4870 = vrot.lane.b32.xlu2 %v10330_v58, %s6996_s26  ;;  %v2199_v58 = vsel %vm425_vm1, %v8494_v63, 0.0  ;;  %v2214_v63 = vsel %vm425_vm1, %v8098_v3, 0.0  ;;  %v2217_v3 = vsel %vm425_vm1, %v8094_v44, 0.0 }
 0x53f   : > { %2203 = vadd.xlane.f32.xlu0 %v2202_v5 }
 0x544   : > { %v3612_v8 = vpop.xlane.xlu0 %3611 }
 0x545   : > { %v3636_v35 = vsub.f32 %v8591_v49, %v3612_v8  ;;  %4928 = vrot.lane.b32.xlu2 %v10336_v53, %s6995_s7  ;;  %v8730_v49 = vpop.f32.mrf.mxu2  ;;  %v2220_v53 = vsel %vm425_vm1, %v8076_v19, 0.0 }
 0x546   : > { %10344 = vst [vmem:[#allocation53_spill] sm:$0xff] %v8730_v49 }
 0x547   : > { %v3663_v41 = vmul.f32 1.442695, %v3636_v35  ;;  %2206 = vadd.xlane.f32.xlu0 %v2205_v51 }
 0x549   : > { %6667 = vpow2.f32 %v3663_v41  ;;  %2200 = vadd.xlane.f32.xlu1 %v2199_v58 }
 0x54c   : > { %v3618_v45 = vpop.xlane.xlu0 %3617 }
 0x54d   : > { %v3638_v5 = vsub.f32 %v8599_v54, %v3618_v45  ;;  %4898 = vrot.lane.b32.xlu2 %v10332_v25, %s6996_s26  ;;  %v6518_v54 = vpack.i.bf16 %v10328_v1, %v7229_v38  ;;  %v8746_v41 = vpop.f32.mrf.mxu2  ;;  %s6931_s26 = scalar_lea.hbm %s10148_s5, 256 }
 0x54e   : > { %10345 = vst [vmem:[#allocation46_spill] sm:$0xff] %v8746_v41 }
 0x54f   : > { %v8734_v8 = vpop.eup %6667  ;;  %v3667_v35 = vmul.f32 1.442695, %v3638_v5  ;;  %2221 = vadd.xlane.f32.xlu0 %v2220_v53 }
 0x550   : > { %6227 = vmatmul.msk.f32.vlgmr.msra.gmra.mxu0 %vm425_vm1, %v8734_v8 }
 0x551   : > { %6669 = vpow2.f32 %v3667_v35  ;;  %4132 = vmatpush.msra.mxu0 %v6512_v28  ;;  %2215 = vadd.xlane.f32.xlu1 %v2214_v63  ;;  %v6491_v35 = vunpack.i.l.bf16 %v8231_v57 }
 0x554   : > { %v3591_v25 = vpop.xlane.xlu0 %3590 }
 0x555   : > { %6519 = vrot.lane.b32.xlu2 %v6518_v54, %s6991_s15  ;;  %v3629_v1 = vsub.f32 %v8593_v39, %v3591_v25  ;;  %v8760_v63 = vpop.f32.mrf.mxu2  ;;  %s5934_s15 = sshll.u32 %s5931_s12, 4  ;;  %s5935_s15 = int_to_ptr.hbm [resolvable:$true] %s5934_s15 }
 0x556   : > { %10346 = vst [vmem:[#allocation54_spill] sm:$0xff] %v8760_v63  ;;  %s6925_s27 = sshra.s32 %s5935_s15, 4  ;;  %s6926_s27 = int_to_ptr.hbm [resolvable:$true] %s6925_s27 }
 0x557   : > { %v8744_v19 = vpop.eup %6669  ;;  %v3585_v51 = vpop.xlane.xlu2 %3584  ;;  %v3649_v53 = vmul.f32 1.442695, %v3629_v1  ;;  %v10348_v1 = vld [vmem:[#allocation17_spill] sm:$0xff]  ;;  %s6927_s30 = scalar_lea.hbm %s6926_s27, 128  ;;  %p6932_p11 = scmp.lt.s32.totalorder %s6926_s27, %s10148_s5 }
 0x558   : > { %v3627_v58 = vsub.f32 %v8587_v33, %v3585_v51  ;;  %6229 = vmatmul.msk.f32.vlgmr.msrb.gmra.mxu0 %vm425_vm1, %v8744_v19  ;;  %p6928_p1 = scmp.ne.s32.totalorder %s6926_s27, %s6927_s30  ;;  %p6933_p2 = scmp.lt.s32.totalorder %s6931_s26, %s6927_s30 }
 0x559   : > { %6252 = vmatpush.xpose.msk.msrb.mxu0 %vm425_vm1, %v8444_v36  ;;  %2218 = vadd.xlane.f32.xlu1 %v2217_v3 }
 0x55a   : > { %v3645_v38 = vmul.f32 1.442695, %v3627_v58  ;;  %v6496_v58 = vunpack.i.l.bf16 %v8275_v62  ;;  %v6501_v62 = vunpack.i.l.bf16 %v8309_v42  ;;  %p6929_p4 = pnand %p6928_p1, %p7102_p3  ;;  %p6934_p9 = por %p6933_p2, %p6932_p11 }
 0x55c   : > { %6671 = vpow2.f32 %v3645_v38  ;;  %v3597_v45 = vpop.xlane.xlu0 %3596  ;;  %p6930_p8 = pneg %p6929_p4 }
 0x55d   : > { %6673 = vpow2.f32 %v3649_v53  ;;  %v3631_v36 = vsub.f32 %v8603_v40, %v3597_v45  ;;  %v10349_v45 = vld [vmem:[#allocation16_spill] sm:$0xff] }
 0x55e   : > { %p6935_p10 = pnand %p6934_p9, %p6930_p8 }
 0x55f   : > { %v4843_v5 = vpop.permute.xlu2 %4842  ;;  %v3653_v54 = vmul.f32 1.442695, %v3631_v36 }
 0x560   : > { %6273 = vmatmul.msk.f32.vlgmr.msra.gmra.mxu2 %vm425_vm1, %v4843_v5  ;;  %v6533_v5 = vpack.i.bf16 %v10349_v45, %v10348_v1 }
 0x561   : > { %v2117_v33 = vpop.xlane.xlu1 %2116 }
 0x562   : > { %v8757_v28 = vpop.eup %6671  ;;  %v2155_v44 = vsub.f32 %v10329_v29, %v2117_v33  ;;  %v8771_v29 = vpop.f32.mrf.mxu2 }
 0x563   : > { %6218 = vmatmul.msk.f32.vlgmr.msrb.gmra.mxu3 %vm425_vm1, %v8757_v28  ;;  %v8766_v51 = vpop.eup %6673  ;;  %10347 = vst [vmem:[#allocation41_spill] sm:$0xff] %v8771_v29 }
 0x564   : > { %v2175_v39 = vmul.f32 1.442695, %v2155_v44  ;;  %3898 = vmatpush.msrb.mxu3 %v6491_v35  ;;  %v3603_v25 = vpop.xlane.xlu0 %3602 }
 0x565   : > { %v3633_v3 = vsub.f32 %v8611_v16, %v3603_v25 }
 0x566   : > { %6675 = vpow2.f32 %v2175_v39  ;;  %v6506_v39 = vunpack.i.l.bf16 %v8346_v50 }
 0x567   : > { %6677 = vpow2.f32 %v3653_v54  ;;  %v3657_v38 = vmul.f32 1.442695, %v3633_v3  ;;  %v10351_v54 = vld [vmem:[#allocation56_spill] sm:$0xff] }
 0x568   : > { %v2139_v25 = vsel %vm425_vm1, %v10351_v54, -inf }
 0x569   : > { %v3609_v40 = vpop.xlane.xlu1 %3608  ;;  %6679 = vpow2.f32 %v3657_v38  ;;  %v6511_v38 = vunpack.i.l.bf16 %v8343_v17 }
 0x56a   : > { %v3635_v16 = vsub.f32 %v8621_v2, %v3609_v40  ;;  %v8784_v33 = vpop.f32.mrf.mxu2 }
 0x56b   : > { %6220 = vmatmul.msk.f32.vlgmr.msra.gmra.mxu3 %vm425_vm1, %v8766_v51  ;;  %10350 = vst [vmem:[#allocation57_spill] sm:$0xff] %v8784_v33 }
 0x56c   : > { %v6676_v57 = vpop.eup %6675  ;;  %3950 = vmatpush.msra.mxu3 %v6496_v58  ;;  %v3661_v44 = vmul.f32 1.442695, %v3635_v16 }
 0x56d   : > { %6140 = vmatmul.msk.f32.vlgmr.msrb.gmra.mxu1 %vm425_vm1, %v6676_v57  ;;  %v8777_v53 = vpop.eup %6677  ;;  %v2211_v17 = vsel %vm425_vm1, %v6676_v57, 0.0 }
 0x56e   : > { %6681 = vpow2.f32 %v3661_v44 }
 0x56f   : > { %v8786_v36 = vpop.eup %6679 }
 0x571   : > { %v3615_v35 = vpop.xlane.xlu1 %3614 }
 0x572   : > { %6534 = vrot.lane.b32.xlu1 %v6533_v5, %s6997_s16  ;;  %v3637_v42 = vsub.f32 %v8629_v12, %v3615_v35  ;;  %v8794_v2 = vpop.f32.mrf.mxu2  ;;  %v10353_v12 = vld [vmem:[#allocation63_spill] sm:$0xff] }
 0x573   : > { %6222 = vmatmul.msk.f32.vlgmr.msrb.gmra.mxu3 %vm425_vm1, %v8777_v53  ;;  %10352 = vst [vmem:[#allocation43_spill] sm:$0xff] %v8794_v2  ;;  %v2208_v1 = vsel %vm425_vm1, %v10353_v12, 0.0 }
 0x574   : > { %4002 = vmatpush.msrb.mxu3 %v6501_v62  ;;  %v3665_v58 = vmul.f32 1.442695, %v3637_v42  ;;  %v8796_v40 = vpop.eup %6681 }
 0x576   : > { %6683 = vpow2.f32 %v3665_v58 }
 0x577   : > { %v4873_v35 = vpop.permute.xlu0 %4872 }
 0x579   : > { %v3621_v3 = vpop.xlane.xlu1 %3620 }
 0x57a   : > { %v3639_v50 = vsub.f32 %v8643_v55, %v3621_v3  ;;  %v8806_v62 = vpop.f32.mrf.mxu2 }
 0x57b   : > { %6224 = vmatmul.msk.f32.vlgmr.msra.gmra.mxu3 %vm425_vm1, %v8786_v36  ;;  %10354 = vst [vmem:[#allocation55_spill] sm:$0xff] %v8806_v62  ;;  %v2270_v62 = vpop.f32.mrf.mxu1 }
 0x57c   : > { %4054 = vmatpush.msra.mxu3 %v6506_v39  ;;  %v3669_v45 = vmul.f32 1.442695, %v3639_v50  ;;  %v8804_v5 = vpop.eup %6683 }
 0x57e   : > { %2140 = vmax.xlane.f32.xlu2 %v2139_v25  ;;  %6685 = vpow2.f32 %v3669_v45 }
 0x582   : > { %v8817_v16 = vpop.f32.mrf.mxu2 }
 0x583   : > { %6226 = vmatmul.msk.f32.vlgmr.msrb.gmra.mxu3 %vm425_vm1, %v8796_v40  ;;  %10355 = vst [vmem:[#allocation47_spill] sm:$0xff] %v8817_v16 }
 0x584   : > { %4106 = vmatpush.msrb.mxu3 %v6511_v38  ;;  %v8813_v55 = vpop.eup %6685 }
 0x586   : > { %2209 = vadd.xlane.f32.xlu2 %v2208_v1  ;;  %v10360_v1 = vld [vmem:[#allocation14_spill] sm:$0xff] }
 0x58a   : > { %v8828_v25 = vpop.f32.mrf.mxu2 }
 0x58b   : > { %6228 = vmatmul.msk.f32.vlgmr.msra.gmra.mxu3 %vm425_vm1, %v8804_v5 }
 0x58c   : > { %6250 = vmatpush.xpose.msk.msra.mxu3 %vm425_vm1, %v8583_v60  ;;  %v10356_v60 = vld [vmem:[#allocation64_spill] sm:$0xff] }
 0x58d   : > { %v2229_v57 = vsel %vm425_vm1, %v10356_v60, 0.0 }
 0x58e   : > { %2212 = vadd.xlane.f32.xlu2 %v2211_v17 }
 0x592   : > { %v8843_v38 = vpop.f32.mrf.mxu2 }
 0x593   : > { %6230 = vmatmul.msk.f32.vlgmr.msrb.gmra.mxu3 %vm425_vm1, %v8813_v55 }
 0x594   : > { %6256 = vmatpush.xpose.msk.msrb.mxu3 %vm425_vm1, %v8597_v6  ;;  %v4901_v6 = vpop.permute.xlu0 %4900 }
 0x598   : > { %v3624_v44 = vpop.xlane.xlu2 %3623 }
 0x599   : > { %v3640_v39 = vsub.f32 %v8690_v14, %v3624_v44  ;;  %v10358_v14 = vld [vmem:[#allocation15_spill] sm:$0xff] }
 0x59b   : > { %v3671_v42 = vmul.f32 1.442695, %v3640_v39  ;;  %6251 = vmatmul.msk.f32.vlgmr.msra.gmra.mxu3 %vm425_vm1, %v8589_v7  ;;  %v10357_v7 = vld [vmem:[#allocation12_spill] sm:$0xff] }
 0x59c   : > { %6262 = vmatpush.xpose.msk.msra.mxu3 %vm425_vm1, %v8625_v15  ;;  %2230 = vadd.xlane.f32.xlu1 %v2229_v57  ;;  %v6523_v15 = vpack.i.bf16 %v10358_v14, %v10357_v7  ;;  %v2241_v57 = vsel %vm425_vm1, %v8203_v56, 0.0  ;;  %v419_v14 = vld [vmem:[#allocation7 + $0x8] sm:$0xff] }
 0x59d   : > { %6687 = vpow2.f32 %v3671_v42 }
 0x5a0   : > { %v4871_v58 = vpop.permute.xlu2 %4870 }
 0x5a3   : > { %v8830_v3 = vpop.eup %6687  ;;  %6257 = vmatmul.msk.f32.vlgmr.msrb.gmra.mxu3 %vm425_vm1, %v8613_v48 }
 0x5a4   : > { %6268 = vmatpush.xpose.msk.msrb.mxu3 %vm425_vm1, %v8663_v21  ;;  %6231 = vmatmul.msk.f32.vlgmr.msra.gmra.mxu0 %vm425_vm1, %v8830_v3  ;;  %v4927_v21 = vpop.permute.xlu1 %4926 }
 0x5a5   : > { %6258 = vmatpush.xpose.msk.msra.mxu0 %vm425_vm1, %v8398_v4  ;;  %v10359_v4 = vld [vmem:[#allocation13_spill] sm:$0xff] }
 0x5a6   : > { %6524 = vrot.lane.b32.xlu2 %v6523_v15, %s6997_s16  ;;  %v6528_v45 = vpack.i.bf16 %v10360_v1, %v10359_v4 }
 0x5a8   : > { %v4929_v50 = vpop.permute.xlu2 %4928 }
 0x5a9   : > { %6278 = vmatpush.xpose.msk.msrb.mxu2 %vm425_vm1, %v4929_v50 }
 0x5aa   : > { %v2129_v48 = vpop.xlane.xlu0 %2128 }
 0x5ab   : > { %v2159_v12 = vsub.f32 %v10340_v11, %v2129_v48  ;;  %6263 = vmatmul.msk.f32.vlgmr.msra.gmra.mxu3 %vm425_vm1, %v8631_v24  ;;  %v8858_v24 = vpop.f32.mrf.mxu2 }
 0x5ac   : > { %6274 = vmatpush.xpose.msk.msra.mxu3 %vm425_vm1, %v4873_v35  ;;  %6253 = vmatmul.msk.f32.vlgmr.msrb.gmra.mxu0 %vm425_vm1, %v8605_v9 }
 0x5ad   : > { %v2183_v17 = vmul.f32 1.442695, %v2159_v12  ;;  %6264 = vmatpush.xpose.msk.msrb.mxu0 %vm425_vm1, %v8651_v43  ;;  %6279 = vmatmul.msk.f32.vlgmr.msrb.gmra.mxu2 %vm425_vm1, %v4927_v21  ;;  %v10361_v43 = vld [vmem:[#allocation60_spill] sm:$0xff] }
 0x5ae   : > { %6529 = vrot.lane.b32.xlu2 %v6528_v45, %s6997_s16 }
 0x5af   : > { %6689 = vpow2.f32 %v2183_v17 }
 0x5b0   : > { %v4899_v11 = vpop.permute.xlu2 %4898 }
 0x5b2   : > { %v8895_v15 = vpop.xlane.xlu0 %2203 }
 0x5b3   : > { %6269 = vmatmul.msk.f32.vlgmr.msrb.gmra.mxu3 %vm425_vm1, %v8673_v47  ;;  %v10362_v47 = vld [vmem:[#allocation23_spill] sm:$0xff]  ;;  %vm2682_vm15 = vweird.f32 %v8895_v15 }
 0x5b4   : > { %6259 = vmatmul.msk.f32.vlgmr.msra.gmra.mxu0 %vm425_vm1, %v8423_v0 }
 0x5b5   : > { %v6690_v9 = vpop.eup %6689  ;;  %6270 = vmatpush.xpose.msk.msra.mxu0 %vm425_vm1, %v8705_v10  ;;  %v8883_v10 = vpop.f32.mrf.mxu3 }
 0x5b6   : > { %6544 = vrot.lane.b32.xlu2 %v10361_v43, %s6997_s16  ;;  %v2223_v35 = vsel %vm425_vm1, %v6690_v9, 0.0  ;;  %v10363_v43 = vld [vmem:[#allocation65_spill] sm:$0xff] }
 0x5b7   : > { %2224 = vadd.xlane.f32.xlu0 %v2223_v35  ;;  %v2226_v35 = vsel %vm425_vm1, %v10363_v43, 0.0 }
 0x5b8   : > { %v6520_v44 = vpop.permute.xlu2 %6519 }
 0x5b9   : > { %v6522_v39 = vunpack.i.h.bf16 %v6520_v44  ;;  %v6521_v42 = vunpack.i.l.bf16 %v6520_v44 }
 0x5ba   : > { %v8869_v60 = vpop.f32.mrf.mxu2  ;;  %v8902_v21 = vpop.xlane.xlu0 %2206 }
 0x5bb   : > { %2476 = vmatpush.msra.mxu1 %v6521_v42  ;;  %6275 = vmatmul.msk.f32.vlgmr.msra.gmra.mxu3 %vm425_vm1, %v4871_v58  ;;  %v4981_v0 = vsel %vm425_vm1, %v8869_v60, -inf  ;;  %v8887_v58 = vpop.f32.mrf.mxu0  ;;  %vm2696_vm5 = vweird.f32 %v8902_v21 }
 0x5bc   : > { %6144 = vmatmul.msk.f32.vlgmr.msra.gmra.mxu1 %vm425_vm1, %v6690_v9  ;;  %6265 = vmatmul.msk.f32.vlgmr.msrb.gmra.mxu0 %vm425_vm1, %v8619_v31  ;;  %v2201_v31 = vpop.xlane.xlu1 %2200 }
 0x5bd   : > { %2580 = vmatpush.msrb.mxu1 %v6522_v39  ;;  %6276 = vmatpush.xpose.msk.msrb.mxu0 %vm425_vm1, %v4901_v6  ;;  %6691 = vrcp.f32 %v2201_v31  ;;  %vm2668_vm11 = vweird.f32 %v2201_v31 }
 0x5be   : > { %4982 = vmax.xlane.f32.xlu1 %v4981_v0  ;;  %6693 = vrcp.f32 %v8895_v15 }
 0x5bf   : > { %2966 = vmatpush.msra.mxu1 %v419_v14  ;;  %6695 = vrcp.f32 %v8902_v21  ;;  %v2672_v14 = vand.u32 2147483647, %v2201_v31 }
 0x5c1   : > { %vm2673_vm13 = vcmp.eq.f32.partialorder %v2672_v14, 8.507059e+37  ;;  %v4954_v14 = vsel %vm425_vm1, %v8828_v25, -inf }
 0x5c3   : > { %v8897_v50 = vpop.f32.mrf.mxu0  ;;  %v6692_v56 = vpop.eup %6691 }
 0x5c4   : > { %6271 = vmatmul.msk.f32.vlgmr.msra.gmra.mxu0 %vm425_vm1, %v8712_v13  ;;  %v2664_v48 = vmul.f32 %v6692_v56, %v2201_v31  ;;  %v6694_v45 = vpop.eup %6693  ;;  %vm2669_vm10 = vweird.f32 %v6692_v56 }
 0x5c5   : > { %v2678_v44 = vmul.f32 %v6694_v45, %v8895_v15  ;;  %vm2670_vm12 = vmor %vm2668_vm11, %vm2669_vm10  ;;  %vm2683_vm14 = vweird.f32 %v6694_v45 }
 0x5c6   : > { %v2665_v4 = vsub.f32 1.0, %v2664_v48  ;;  %vm2684_vm2 = vmor %vm2682_vm15, %vm2683_vm14 }
 0x5c7   : > { %v2679_v0 = vsub.f32 1.0, %v2678_v44 }
 0x5c8   : > { %v2666_v39 = vmul.f32 %v6692_v56, %v2665_v4  ;;  %v10364_v4 = vld [vmem:[#allocation66_spill] sm:$0xff] }
 0x5cb   : > { %6539 = vrot.lane.b32.xlu0 %v10362_v47, %s6997_s16  ;;  %v2667_v47 = vadd.f32 %v6692_v56, %v2666_v39  ;;  %v8930_v39 = vpop.xlane.xlu1 %2215 }
 0x5cc   : > { %6277 = vmatmul.msk.f32.vlgmr.msrb.gmra.mxu0 %vm425_vm1, %v4899_v11  ;;  %v8905_v11 = vpop.f32.mrf.mxu0 }
 0x5df   : > { %2242 = vadd.xlane.f32.xlu2 %v2241_v57 }
 0x5e3   : > { %v8889_v7 = vpop.f32.mrf.mxu2 }
 0x5e4   : > { %v4990_v13 = vsel %vm425_vm1, %v8889_v7, -inf }
 0x5e5   : > { %4991 = vmax.xlane.f32.xlu1 %v4990_v13  ;;  %v2674_v13 = vand.u32 2147483648, %v2201_v31 }
 0x5e6   : > { %v8893_v6 = vpop.f32.mrf.mxu3 }
 0x5e7   : > { %v2675_v31 = vor.u32 1.1754944e-38, %v2674_v13  ;;  %v2686_v13 = vand.u32 2147483647, %v8895_v15 }
 0x5e9   : > { %vm2687_vm3 = vcmp.eq.f32.partialorder %v2686_v13, 8.507059e+37  ;;  %v2700_v13 = vand.u32 2147483647, %v8902_v21 }
 0x5eb   : > { %vm2701_vm7 = vcmp.eq.f32.partialorder %v2700_v13, 8.507059e+37 }
 0x5ee   : > { %v8900_v12 = vpop.f32.mrf.mxu3 }
 0x5f1   : > { %v2141_v1 = vpop.xlane.xlu2 %2140 }
 0x5f2   : > { %v2163_v17 = vsub.f32 %v10351_v54, %v2141_v1  ;;  %v8915_v54 = vpop.eup %6695  ;;  %v2232_v1 = vsel %vm425_vm1, %v10364_v4, 0.0 }
 0x5f3   : > { %v2692_v43 = vmul.f32 %v8915_v54, %v8902_v21  ;;  %vm2697_vm4 = vweird.f32 %v8915_v54 }
 0x5f4   : > { %v2191_v9 = vmul.f32 1.442695, %v2163_v17  ;;  %v8922_v17 = vpop.f32.mrf.mxu0  ;;  %vm2698_vm6 = vmor %vm2696_vm5, %vm2697_vm4 }
 0x5f5   : > { %2227 = vadd.xlane.f32.xlu0 %v2226_v35  ;;  %v2671_v35 = vsel %vm2670_vm12, %v6692_v56, %v2667_v47  ;;  %v2693_v16 = vsub.f32 1.0, %v2692_v43  ;;  %v2688_v56 = vand.u32 2147483648, %v8895_v15  ;;  %v8950_v15 = vpop.xlane.xlu1 %2218 }
 0x5f6   : > { %6697 = vpow2.f32 %v2191_v9  ;;  %v8911_v42 = vpop.f32.mrf.mxu3  ;;  %v2680_v9 = vmul.f32 %v6694_v45, %v2679_v0  ;;  %v2676_v41 = vsel %vm2673_vm13, %v2675_v31, %v2671_v35 }
 0x5f7   : > { %v2887_v47 = vmul.f32 %v2676_v41, %v2270_v62  ;;  %v2689_v35 = vor.u32 1.1754944e-38, %v2688_v56 }
 0x5f8   : > { %v2681_v49 = vadd.f32 %v6694_v45, %v2680_v9 }
 0x5f9   : > { %v8913_v57 = vpop.xlane.xlu2 %2209 }
 0x5fa   : > { %6699 = vrcp.f32 %v8913_v57  ;;  %v2685_v43 = vsel %vm2684_vm2, %v6694_v45, %v2681_v49  ;;  %vm2710_vm9 = vweird.f32 %v8913_v57 }
 0x5fb   : > { %v2690_v62 = vsel %vm2687_vm3, %v2689_v35, %v2685_v43  ;;  %vm2738_vm3 = vweird.f32 %v8930_v39 }
 0x5fc   : > { %v8917_v48 = vpop.eup %6697  ;;  %v8948_v41 = vpop.f32.mrf.mxu0  ;;  %v2888_v56 = vmul.f32 %v2690_v62, %v8641_v23 }
 0x5fd   : > { %6148 = vmatmul.msk.f32.vlgmr.msrb.gmra.mxu1 %vm425_vm1, %v8917_v48  ;;  %2233 = vadd.xlane.f32.xlu0 %v2232_v1  ;;  %v2694_v1 = vmul.f32 %v8915_v54, %v2693_v16  ;;  %10366 = vst [vmem:[#allocation25_spill] sm:$0xff] %v8948_v41  ;;  %v8972_v62 = vpop.permute.xlu1 %6534 }
 0x5fe   : > { %v8928_v44 = vpop.f32.mrf.mxu3  ;;  %v6537_v13 = vunpack.i.h.bf16 %v8972_v62 }
 0x5ff   : > { %v2695_v16 = vadd.f32 %v8915_v54, %v2694_v1 }
 0x600   : > { %v8934_v0 = vpop.eup %6699 }
 0x601   : > { %v8932_v4 = vpop.xlane.xlu2 %2212  ;;  %v2706_v9 = vmul.f32 %v8934_v0, %v8913_v57  ;;  %vm2711_vm8 = vweird.f32 %v8934_v0 }
 0x602   : > { %6701 = vrcp.f32 %v8932_v4  ;;  %vm2712_vm10 = vmor %vm2710_vm9, %vm2711_vm8  ;;  %vm2724_vm13 = vweird.f32 %v8932_v4 }
 0x603   : > { %v2707_v18 = vsub.f32 1.0, %v2706_v9  ;;  %6703 = vrcp.f32 %v8930_v39 }
 0x604   : > { %v8970_v43 = vpop.f32.mrf.mxu0  ;;  %6705 = vrcp.f32 %v8950_v15 }
 0x605   : > { %4955 = vmax.xlane.f32.xlu0 %v4954_v14  ;;  %6152 = vmatmul.msk.f32.vlgmr.msra.gmra.mxu1 %vm425_vm1, %v2887_v47  ;;  %v2702_v47 = vand.u32 2147483648, %v8902_v21  ;;  %v4963_v14 = vsel %vm425_vm1, %v8843_v38, -inf  ;;  %v2708_v1 = vmul.f32 %v8934_v0, %v2707_v18  ;;  %10368 = vst [vmem:[#allocation26_spill] sm:$0xff] %v8970_v43 }
 0x606   : > { %v8946_v31 = vpop.f32.mrf.mxu3 }
 0x607   : > { %10365 = vst [vmem:[#allocation37_spill] sm:$0xff] %v8946_v31  ;;  %v2703_v23 = vor.u32 1.1754944e-38, %v2702_v47  ;;  %v2709_v33 = vadd.f32 %v8934_v0, %v2708_v1  ;;  %v4972_v1 = vsel %vm425_vm1, %v8858_v24, -inf }
 0x608   : > { %v8954_v61 = vpop.eup %6701 }
 0x609   : > { %v6525_v2 = vpop.permute.xlu2 %6524  ;;  %v2720_v9 = vmul.f32 %v8954_v61, %v8932_v4  ;;  %vm2725_vm12 = vweird.f32 %v8954_v61 }
 0x60a   : > { %v6527_v49 = vunpack.i.h.bf16 %v6525_v2  ;;  %v6526_v45 = vunpack.i.l.bf16 %v6525_v2  ;;  %v2699_v2 = vsel %vm2698_vm6, %v8915_v54, %v2695_v16  ;;  %v2716_v54 = vand.u32 2147483648, %v8913_v57  ;;  %vm2726_vm14 = vmor %vm2724_vm13, %vm2725_vm12 }
 0x60b   : > { %v2704_v35 = vsel %vm2701_vm7, %v2703_v23, %v2699_v2  ;;  %vm2752_vm7 = vweird.f32 %v8950_v15 }
 0x60c   : > { %5119 = vmatpush.msrb.mxu3 %v6526_v45  ;;  %v2721_v45 = vsub.f32 1.0, %v2720_v9 }
 0x60d   : > { %4964 = vmax.xlane.f32.xlu0 %v4963_v14  ;;  %6153 = vmatmul.msk.f32.gmra.mxu1 %vm425_vm1, %v2888_v56  ;;  %v8976_v14 = vpop.eup %6703  ;;  %v2714_v56 = vand.u32 2147483647, %v8913_v57  ;;  %v2717_v57 = vor.u32 1.1754944e-38, %v2716_v54 }
 0x60e   : > { %5197 = vmatpush.msra.mxu3 %v6527_v49  ;;  %v8968_v21 = vpop.f32.mrf.mxu3  ;;  %v2889_v49 = vmul.f32 %v2704_v35, %v8526_v52  ;;  %v2734_v9 = vmul.f32 %v8976_v14, %v8930_v39  ;;  %v2722_v2 = vmul.f32 %v8954_v61, %v2721_v45  ;;  %v2713_v52 = vsel %vm2712_vm10, %v8934_v0, %v2709_v33  ;;  %v6706_v45 = vpop.eup %6705 }
 0x60f   : > { %10367 = vst [vmem:[#allocation29_spill] sm:$0xff] %v8968_v21  ;;  %vm2715_vm11 = vcmp.eq.f32.partialorder %v2714_v56, 8.507059e+37  ;;  %v2728_v33 = vand.u32 2147483647, %v8932_v4  ;;  %v2748_v56 = vmul.f32 %v6706_v45, %v8950_v15  ;;  %vm2739_vm2 = vweird.f32 %v8976_v14 }
 0x610   : > { %v2718_v35 = vsel %vm2715_vm11, %v2717_v57, %v2713_v52  ;;  %v2723_v29 = vadd.f32 %v8954_v61, %v2722_v2  ;;  %vm2740_vm4 = vmor %vm2738_vm3, %vm2739_vm2  ;;  %vm2753_vm6 = vweird.f32 %v6706_v45 }
 0x611   : > { %v6530_v18 = vpop.permute.xlu2 %6529  ;;  %v2890_v0 = vmul.f32 %v2718_v35, %v8530_v32  ;;  %vm2729_vm15 = vcmp.eq.f32.partialorder %v2728_v33, 8.507059e+37  ;;  %v2749_v32 = vsub.f32 1.0, %v2748_v56  ;;  %v2744_v35 = vand.u32 2147483648, %v8930_v39  ;;  %vm2754_vm8 = vmor %vm2752_vm7, %vm2753_vm6 }
 0x612   : > { %v6532_v16 = vunpack.i.h.bf16 %v6530_v18  ;;  %v6531_v47 = vunpack.i.l.bf16 %v6530_v18  ;;  %v8993_v18 = vpop.xlane.xlu0 %2221 }
 0x613   : > { %6707 = vrcp.f32 %v8993_v18  ;;  %v2750_v33 = vmul.f32 %v6706_v45, %v2749_v32  ;;  %vm2766_vm11 = vweird.f32 %v8993_v18 }
 0x614   : > { %5145 = vmatpush.msra.mxu0 %v6531_v47  ;;  %5171 = vmatpush.msra.mxu2 %v6532_v16  ;;  %v2735_v16 = vsub.f32 1.0, %v2734_v9  ;;  %v8995_v47 = vpop.f32.mrf.mxu0 }
 0x615   : > { %4973 = vmax.xlane.f32.xlu0 %v4972_v1  ;;  %6154 = vmatmul.msk.f32.gmra.mxu1 %vm425_vm1, %v2889_v49  ;;  %10370 = vst [vmem:[#allocation51_spill] sm:$0xff] %v8995_v47  ;;  %v2730_v49 = vand.u32 2147483648, %v8932_v4  ;;  %v2751_v63 = vadd.f32 %v6706_v45, %v2750_v33 }
 0x616   : > { %5223 = vmatpush.msrb.mxu0 %v6537_v13  ;;  %v8991_v23 = vpop.f32.mrf.mxu3  ;;  %v2736_v54 = vmul.f32 %v8976_v14, %v2735_v16  ;;  %v2727_v13 = vsel %vm2726_vm14, %v8954_v61, %v2723_v29  ;;  %v2374_v16 = vpop.f32.mrf.mxu1  ;;  %v2742_v61 = vand.u32 2147483647, %v8930_v39  ;;  %v2758_v39 = vand.u32 2147483648, %v8950_v15 }
 0x617   : > { %10369 = vst [vmem:[#allocation27_spill] sm:$0xff] %v8991_v23  ;;  %v2731_v1 = vor.u32 1.1754944e-38, %v2730_v49 }
 0x618   : > { %v2737_v4 = vadd.f32 %v8976_v14, %v2736_v54  ;;  %v2745_v54 = vor.u32 1.1754944e-38, %v2744_v35  ;;  %vm2743_vm5 = vcmp.eq.f32.partialorder %v2742_v61, 8.507059e+37  ;;  %v2759_v61 = vor.u32 1.1754944e-38, %v2758_v39 }
 0x619   : > { %v2732_v2 = vsel %vm2729_vm15, %v2731_v1, %v2727_v13  ;;  %v6708_v57 = vpop.eup %6707 }
 0x61a   : > { %v2891_v29 = vmul.f32 %v2732_v2, %v2374_v16  ;;  %v2762_v49 = vmul.f32 %v6708_v57, %v8993_v18  ;;  %v2755_v16 = vsel %vm2754_vm8, %v6706_v45, %v2751_v63  ;;  %vm2767_vm10 = vweird.f32 %v6708_v57 }
 0x61b   : > { %v2770_v45 = vand.u32 2147483647, %v8993_v18  ;;  %vm2768_vm12 = vmor %vm2766_vm11, %vm2767_vm10 }
 0x61c   : > { %v2763_v1 = vsub.f32 1.0, %v2762_v49 }
 0x61d   : > { %6155 = vmatmul.msk.f32.gmra.mxu1 %vm425_vm1, %v2890_v0  ;;  %v2741_v0 = vsel %vm2740_vm4, %v8976_v14, %v2737_v4  ;;  %v2756_v14 = vand.u32 2147483647, %v8950_v15  ;;  %vm2771_vm13 = vcmp.eq.f32.partialorder %v2770_v45, 8.507059e+37 }
 0x61e   : > { %v9008_v9 = vpop.f32.mrf.mxu3  ;;  %v2746_v13 = vsel %vm2743_vm5, %v2745_v54, %v2741_v0  ;;  %v2764_v35 = vmul.f32 %v6708_v57, %v2763_v1 }
 0x61f   : > { %v2892_v4 = vmul.f32 %v2746_v13, %v8657_v30  ;;  %vm2757_vm9 = vcmp.eq.f32.partialorder %v2756_v14, 8.507059e+37  ;;  %v2772_v30 = vand.u32 2147483648, %v8993_v18 }
 0x620   : > { %v2760_v49 = vsel %vm2757_vm9, %v2759_v61, %v2755_v16  ;;  %v2765_v0 = vadd.f32 %v6708_v57, %v2764_v35 }
 0x621   : > { %v9012_v52 = vpop.f32.mrf.mxu0  ;;  %v2893_v39 = vmul.f32 %v2760_v49, %v8532_v34 }
 0x622   : > { %10371 = vst [vmem:[#allocation52_spill] sm:$0xff] %v9012_v52  ;;  %v2769_v14 = vsel %vm2768_vm12, %v6708_v57, %v2765_v0 }
 0x625   : > { %6156 = vmatmul.msk.f32.gmra.mxu1 %vm425_vm1, %v2891_v29 }
 0x626   : > { %v9020_v56 = vpop.f32.mrf.mxu3 }
 0x629   : > { %v9022_v52 = vpop.f32.mrf.mxu0 }
 0x62a   : > { %v2225_v2 = vpop.xlane.xlu0 %2224  ;;  %v4960_v32 = vsel %vm425_vm1, %v9022_v52, -inf }
 0x62b   : > { %6709 = vrcp.f32 %v2225_v2  ;;  %4961 = vmax.xlane.f32.xlu1 %v4960_v32  ;;  %v2786_v18 = vand.u32 2147483648, %v2225_v2  ;;  %vm2780_vm15 = vweird.f32 %v2225_v2  ;;  %v2784_v49 = vand.u32 2147483647, %v2225_v2 }
 0x62d   : > { %6157 = vmatmul.msk.f32.gmra.mxu1 %vm425_vm1, %v2892_v4  ;;  %v2773_v4 = vor.u32 1.1754944e-38, %v2772_v30  ;;  %vm2785_vm3 = vcmp.eq.f32.partialorder %v2784_v49, 8.507059e+37  ;;  %v10373_v49 = vld [vmem:[#allocation61_spill] sm:$0xff] }
 0x62e   : > { %v9038_v1 = vpop.f32.mrf.mxu3 }
 0x62f   : > { %v2774_v16 = vsel %vm2771_vm13, %v2773_v4, %v2769_v14  ;;  %v4975_v23 = vsel %vm425_vm1, %v9038_v1, -inf }
 0x630   : > { %v9031_v29 = vpop.f32.mrf.mxu2  ;;  %v2894_v57 = vmul.f32 %v2774_v16, %v8534_v37  ;;  %v2235_v16 = vsel %vm425_vm1, %v8917_v48, 0.0 }
 0x631   : > { %v6710_v33 = vpop.eup %6709  ;;  %v9033_v54 = vpop.f32.mrf.mxu0  ;;  %v4999_v15 = vsel %vm425_vm1, %v9031_v29, -inf }
 0x632   : > { %v2776_v13 = vmul.f32 %v6710_v33, %v2225_v2  ;;  %5000 = vmax.xlane.f32.xlu2 %v4999_v15  ;;  %v4969_v63 = vsel %vm425_vm1, %v9033_v54, -inf  ;;  %vm2781_vm14 = vweird.f32 %v6710_v33 }
 0x633   : > { %4970 = vmax.xlane.f32.xlu1 %v4969_v63  ;;  %vm2782_vm2 = vmor %vm2780_vm15, %vm2781_vm14  ;;  %v2787_v63 = vor.u32 1.1754944e-38, %v2786_v18  ;;  %v10372_v18 = vld [vmem:[#allocation67_spill] sm:$0xff] }
 0x634   : > { %v2777_v32 = vsub.f32 1.0, %v2776_v13 }
 0x635   : > { %6158 = vmatmul.msk.f32.gmra.mxu1 %vm425_vm1, %v2893_v39 }
 0x636   : > { %v2778_v35 = vmul.f32 %v6710_v33, %v2777_v32  ;;  %v9053_v0 = vpop.f32.mrf.mxu3  ;;  %v4957_v32 = vsel %vm425_vm1, %v9008_v9, -inf }
 0x637   : > { %v4984_v2 = vsel %vm425_vm1, %v9053_v0, -inf }
 0x638   : > { %v2779_v61 = vadd.f32 %v6710_v33, %v2778_v35 }
 0x639   : > { %v9046_v15 = vpop.f32.mrf.mxu0  ;;  %v2478_v37 = vpop.f32.mrf.mxu1 }
 0x63a   : > { %4976 = vmax.xlane.f32.xlu2 %v4975_v23  ;;  %v4978_v34 = vsel %vm425_vm1, %v9046_v15, -inf  ;;  %v2783_v30 = vsel %vm2782_vm2, %v6710_v33, %v2779_v61  ;;  %v4966_v61 = vsel %vm425_vm1, %v9020_v56, -inf }
 0x63b   : > { %4979 = vmax.xlane.f32.xlu0 %v4978_v34  ;;  %v2788_v23 = vsel %vm2785_vm3, %v2787_v63, %v2783_v30  ;;  %v2238_v34 = vsel %vm425_vm1, %v10372_v18, 0.0  ;;  %v10374_v30 = vld [vmem:[#allocation58_spill] sm:$0xff] }
 0x63c   : > { %v2895_v14 = vmul.f32 %v2788_v23, %v2478_v37  ;;  %v10375_v23 = vld [vmem:[#allocation62_spill] sm:$0xff] }
 0x63d   : > { %v9055_v13 = vpop.permute.xlu0 %6539  ;;  %6159 = vmatmul.msk.f32.gmra.mxu1 %vm425_vm1, %v2894_v57  ;;  %v2231_v57 = vpop.xlane.xlu1 %2230 }
 0x63e   : > { %v6541_v45 = vunpack.i.l.bf16 %v9055_v13  ;;  %v9068_v4 = vpop.f32.mrf.mxu3  ;;  %6711 = vrcp.f32 %v2231_v57  ;;  %v2814_v43 = vand.u32 2147483648, %v2231_v57  ;;  %vm2808_vm9 = vweird.f32 %v2231_v57 }
 0x63f   : > { %v4993_v35 = vsel %vm425_vm1, %v9068_v4, -inf }
 0x640   : > { %5249 = vmatpush.msrb.mxu2 %v6541_v45 }
 0x641   : > { %v9059_v39 = vpop.f32.mrf.mxu0 }
 0x642   : > { %4985 = vmax.xlane.f32.xlu2 %v4984_v2  ;;  %v4987_v33 = vsel %vm425_vm1, %v9059_v39, -inf }
 0x643   : > { %4988 = vmax.xlane.f32.xlu1 %v4987_v33  ;;  %4958 = vmax.xlane.f32.xlu0 %v4957_v32 }
 0x644   : > { %v6712_v45 = vpop.eup %6711 }
 0x645   : > { %6160 = vmatmul.msk.f32.gmra.mxu1 %vm425_vm1, %v2895_v14  ;;  %v2804_v48 = vmul.f32 %v6712_v45, %v2231_v57  ;;  %vm2809_vm6 = vweird.f32 %v6712_v45 }
 0x646   : > { %vm2810_vm10 = vmor %vm2808_vm9, %vm2809_vm6 }
 0x647   : > { %v2805_v37 = vsub.f32 1.0, %v2804_v48 }
 0x64a   : > { %4994 = vmax.xlane.f32.xlu2 %v4993_v35 }
 0x64b   : > { %2236 = vadd.xlane.f32.xlu1 %v2235_v16  ;;  %4967 = vmax.xlane.f32.xlu0 %v4966_v61  ;;  %v2806_v16 = vmul.f32 %v6712_v45, %v2805_v37  ;;  %v2812_v37 = vand.u32 2147483647, %v2231_v57 }
 0x64d   : > { %v2807_v47 = vadd.f32 %v6712_v45, %v2806_v16  ;;  %v2815_v16 = vor.u32 1.1754944e-38, %v2814_v43  ;;  %vm2813_vm11 = vcmp.eq.f32.partialorder %v2812_v37, 8.507059e+37 }
 0x653   : > { %2239 = vadd.xlane.f32.xlu1 %v2238_v34 }
 0x65f   : > { %6549 = vrot.lane.b32.xlu0 %v10373_v49, %s6997_s16 }
 0x662   : > { %6559 = vrot.lane.b32.xlu2 %v10374_v30, %s6997_s16 }
 0x668   : > { %v2228_v63 = vpop.xlane.xlu0 %2227 }
 0x669   : > { %6713 = vrcp.f32 %v2228_v63  ;;  %v2800_v35 = vand.u32 2147483648, %v2228_v63  ;;  %v2798_v18 = vand.u32 2147483647, %v2228_v63  ;;  %vm2794_vm5 = vweird.f32 %v2228_v63 }
 0x66b   : > { %v2801_v30 = vor.u32 1.1754944e-38, %v2800_v35  ;;  %vm2799_vm8 = vcmp.eq.f32.partialorder %v2798_v18, 8.507059e+37  ;;  %v2811_v35 = vsel %vm2810_vm10, %v6712_v45, %v2807_v47  ;;  %v9096_v47 = vpop.f32.mrf.mxu0 }
 0x66c   : > { %6554 = vrot.lane.b32.xlu1 %v10375_v23, %s6997_s16 }
 0x66f   : > { %v6714_v2 = vpop.eup %6713 }
 0x670   : > { %v2790_v33 = vmul.f32 %v6714_v2, %v2228_v63  ;;  %v2234_v32 = vpop.xlane.xlu0 %2233  ;;  %vm2795_vm4 = vweird.f32 %v6714_v2 }
 0x671   : > { %6715 = vrcp.f32 %v2234_v32  ;;  %vm2796_vm7 = vmor %vm2794_vm5, %vm2795_vm4  ;;  %vm2822_vm13 = vweird.f32 %v2234_v32 }
 0x672   : > { %v2791_v14 = vsub.f32 1.0, %v2790_v33 }
 0x674   : > { %v2792_v61 = vmul.f32 %v6714_v2, %v2791_v14 }
 0x676   : > { %v2793_v34 = vadd.f32 %v6714_v2, %v2792_v61 }
 0x677   : > { %v6716_v49 = vpop.eup %6715 }
 0x678   : > { %v2818_v23 = vmul.f32 %v6716_v49, %v2234_v32  ;;  %v4956_v21 = vpop.xlane.xlu0 %4955  ;;  %v2797_v48 = vsel %vm2796_vm7, %v6714_v2, %v2793_v34  ;;  %v2816_v2 = vsel %vm2813_vm11, %v2815_v16, %v2811_v35  ;;  %vm2823_vm12 = vweird.f32 %v6716_v49 }
 0x679   : > { %v5002_v31 = vsub.f32 %v8828_v25, %v4956_v21  ;;  %v2802_v33 = vsel %vm2799_vm8, %v2801_v30, %v2797_v48  ;;  %v2828_v21 = vand.u32 2147483648, %v2234_v32  ;;  %v2826_v34 = vand.u32 2147483647, %v2234_v32  ;;  %vm2824_vm14 = vmor %vm2822_vm13, %vm2823_vm12  ;;  %v4983_v48 = vpop.xlane.xlu1 %4982 }
 0x67a   : > { %v2819_v14 = vsub.f32 1.0, %v2818_v23  ;;  %v2896_v41 = vmul.f32 %v2802_v33, %v8671_v26  ;;  %v2897_v26 = vmul.f32 %v2816_v2, %v8536_v20  ;;  %v6545_v20 = vpop.permute.xlu2 %6544  ;;  %v3676_v33 = vsel %vm425_vm1, %v8638_v22, 0.0 }
 0x67b   : > { %v5018_v63 = vmul.f32 1.442695, %v5002_v31  ;;  %v6536_v31 = vunpack.i.l.bf16 %v8972_v62  ;;  %v2829_v45 = vor.u32 1.1754944e-38, %v2828_v21  ;;  %vm2827_vm15 = vcmp.eq.f32.partialorder %v2826_v34, 8.507059e+37 }
 0x67c   : > { %v2820_v61 = vmul.f32 %v6716_v49, %v2819_v14  ;;  %6161 = vmatmul.msk.f32.gmra.mxu1 %vm425_vm1, %v2896_v41  ;;  %v4996_v62 = vsel %vm425_vm1, %v9096_v47, -inf  ;;  %v6547_v14 = vunpack.i.h.bf16 %v6545_v20  ;;  %v3673_v22 = vsel %vm425_vm1, %v8698_v46, 0.0 }
 0x67d   : > { %6717 = vpow2.f32 %v5018_v63  ;;  %v3697_v35 = vsel %vm425_vm1, %v8786_v36, 0.0  ;;  %v2244_v2 = vsel %vm425_vm1, %v8290_v27, 0.0  ;;  %v3685_v36 = vsel %vm425_vm1, %v8766_v51, 0.0  ;;  %v10376_v27 = vld [vmem:[#allocation45_spill] sm:$0xff] }
 0x67e   : > { %v2821_v18 = vadd.f32 %v6716_v49, %v2820_v61  ;;  %v420_v61 = vld [vmem:[#allocation7 + $0x10] sm:$0xff]  ;;  %v3682_v34 = vsel %vm425_vm1, %v10376_v27, 0.0 }
 0x67f   : > { %4440 = vmatpush.msrb.mxu1 %v420_v61 }
 0x680   : > { %v4965_v25 = vpop.xlane.xlu0 %4964  ;;  %v2825_v43 = vsel %vm2824_vm14, %v6716_v49, %v2821_v18  ;;  %v3679_v18 = vsel %vm425_vm1, %v8757_v28, 0.0 }
 0x681   : > { %v5005_v57 = vsub.f32 %v8843_v38, %v4965_v25  ;;  %v2830_v38 = vsel %vm2827_vm15, %v2829_v45, %v2825_v43  ;;  %v10377_v45 = vld [vmem:[#allocation50_spill] sm:$0xff] }
 0x682   : > { %v2898_v49 = vmul.f32 %v2830_v38, %v8538_v59  ;;  %v9122_v25 = vpop.xlane.xlu2 %2242  ;;  %v3688_v51 = vsel %vm425_vm1, %v10377_v45, 0.0 }
 0x683   : > { %v9090_v30 = vpop.eup %6717  ;;  %v5024_v41 = vmul.f32 1.442695, %v5005_v57  ;;  %vm2864_vm11 = vweird.f32 %v9122_v25 }
 0x684   : > { %6162 = vmatmul.msk.f32.gmra.mxu1 %vm425_vm1, %v2897_v26  ;;  %6280 = vmatmul.msk.f32.vlgmr.msrb.gmra.mxu3 %vm425_vm1, %v9090_v30 }
 0x685   : > { %6719 = vpow2.f32 %v5024_v41  ;;  %5275 = vmatpush.msrb.mxu3 %v6536_v31 }
 0x688   : > { %v4974_v32 = vpop.xlane.xlu0 %4973 }
 0x689   : > { %v5008_v23 = vsub.f32 %v8858_v24, %v4974_v32  ;;  %4997 = vmax.xlane.f32.xlu0 %v4996_v62  ;;  %v5011_v24 = vsub.f32 %v8869_v60, %v4983_v48  ;;  %v9117_v60 = vpop.xlane.xlu1 %4991 }
 0x68a   : > { %v5014_v27 = vsub.f32 %v8889_v7, %v9117_v60 }
 0x68b   : > { %v9104_v37 = vpop.eup %6719  ;;  %v5030_v63 = vmul.f32 1.442695, %v5008_v23  ;;  %3677 = vadd.xlane.f32.xlu2 %v3676_v33  ;;  %v5036_v59 = vmul.f32 1.442695, %v5011_v24 }
 0x68c   : > { %6163 = vmatmul.msk.f32.gmra.mxu1 %vm425_vm1, %v2898_v49  ;;  %6283 = vmatmul.msk.f32.vlgmr.msra.gmra.mxu3 %vm425_vm1, %v9104_v37  ;;  %v3691_v49 = vsel %vm425_vm1, %v8777_v53, 0.0  ;;  %v5042_v7 = vmul.f32 1.442695, %v5014_v27 }
 0x68d   : > { %6721 = vpow2.f32 %v5030_v63  ;;  %5353 = vmatpush.msra.mxu3 %v6547_v14 }
 0x68e   : > { %6723 = vpow2.f32 %v5036_v59 }
 0x691   : > { %3674 = vadd.xlane.f32.xlu0 %v3673_v22 }
 0x693   : > { %v6722_v16 = vpop.eup %6721  ;;  %3698 = vadd.xlane.f32.xlu2 %v3697_v35  ;;  %v10378_v35 = vld [vmem:[#allocation32_spill] sm:$0xff] }
 0x694   : > { %6286 = vmatmul.msk.f32.vlgmr.msrb.gmra.mxu3 %vm425_vm1, %v6722_v16  ;;  %v6724_v46 = vpop.eup %6723  ;;  %v5068_v31 = vsel %vm425_vm1, %v6722_v16, 0.0  ;;  %v3694_v16 = vsel %vm425_vm1, %v10378_v35, 0.0 }
 0x696   : > { %2245 = vadd.xlane.f32.xlu1 %v2244_v2 }
 0x699   : > { %3680 = vadd.xlane.f32.xlu0 %v3679_v18 }
 0x69c   : > { %6289 = vmatmul.msk.f32.vlgmr.msra.gmra.mxu3 %vm425_vm1, %v6724_v46 }
 0x69e   : > { %3686 = vadd.xlane.f32.xlu1 %v3685_v36  ;;  %v4962_v21 = vpop.xlane.xlu1 %4961 }
 0x69f   : > { %v5004_v57 = vsub.f32 %v9022_v52, %v4962_v21  ;;  %v6546_v52 = vunpack.i.l.bf16 %v6545_v20 }
 0x6a1   : > { %v5022_v26 = vmul.f32 1.442695, %v5004_v57  ;;  %3683 = vadd.xlane.f32.xlu0 %v3682_v34  ;;  %v5077_v34 = vsel %vm425_vm1, %v6724_v46, 0.0 }
 0x6a3   : > { %6725 = vpow2.f32 %v5022_v26 }
 0x6a5   : > { %v9129_v28 = vpop.xlane.xlu2 %5000 }
 0x6a6   : > { %5069 = vadd.xlane.f32.xlu1 %v5068_v31  ;;  %v4971_v41 = vpop.xlane.xlu1 %4970 }
 0x6a7   : > { %v5007_v43 = vsub.f32 %v9033_v54, %v4971_v41 }
 0x6a9   : > { %v9135_v38 = vpop.eup %6725  ;;  %v5028_v32 = vmul.f32 1.442695, %v5007_v43  ;;  %3689 = vadd.xlane.f32.xlu0 %v3688_v51 }
 0x6aa   : > { %6282 = vmatmul.msk.f32.vlgmr.msra.gmra.mxu2 %vm425_vm1, %v9135_v38 }
 0x6ab   : > { %6727 = vpow2.f32 %v5028_v32  ;;  %5327 = vmatpush.msra.mxu2 %v6546_v52 }
 0x6ad   : > { %v4977_v62 = vpop.xlane.xlu2 %4976 }
 0x6ae   : > { %v5009_v23 = vsub.f32 %v9038_v1, %v4977_v62  ;;  %v4980_v48 = vpop.xlane.xlu0 %4979 }
 0x6af   : > { %v5010_v33 = vsub.f32 %v9046_v15, %v4980_v48 }
 0x6b0   : > { %v5032_v54 = vmul.f32 1.442695, %v5009_v23  ;;  %v3703_v23 = vsel %vm425_vm1, %v8796_v40, 0.0 }
 0x6b1   : > { %v9143_v14 = vpop.eup %6727  ;;  %v5034_v20 = vmul.f32 1.442695, %v5010_v33  ;;  %3692 = vadd.xlane.f32.xlu0 %v3691_v49 }
 0x6b2   : > { %6729 = vpow2.f32 %v5032_v54  ;;  %6285 = vmatmul.msk.f32.vlgmr.msrb.gmra.mxu2 %vm425_vm1, %v9143_v14  ;;  %v10379_v54 = vld [vmem:[#allocation35_spill] sm:$0xff] }
 0x6b3   : > { %6731 = vpow2.f32 %v5034_v20  ;;  %v3700_v49 = vsel %vm425_vm1, %v10379_v54, 0.0 }
 0x6b5   : > { %v4986_v63 = vpop.xlane.xlu2 %4985 }
 0x6b6   : > { %v5012_v61 = vsub.f32 %v9053_v0, %v4986_v63  ;;  %v4959_v1 = vpop.xlane.xlu0 %4958  ;;  %v4989_v24 = vpop.xlane.xlu1 %4988 }
 0x6b7   : > { %v5003_v15 = vsub.f32 %v9008_v9, %v4959_v1  ;;  %v5013_v53 = vsub.f32 %v9059_v39, %v4989_v24 }
 0x6b8   : > { %v9149_v22 = vpop.eup %6729  ;;  %v5038_v59 = vmul.f32 1.442695, %v5012_v61 }
 0x6b9   : > { %v6732_v2 = vpop.eup %6731  ;;  %v5020_v18 = vmul.f32 1.442695, %v5003_v15  ;;  %3695 = vadd.xlane.f32.xlu0 %v3694_v16  ;;  %v5071_v36 = vsel %vm425_vm1, %v9149_v22, 0.0  ;;  %v5040_v9 = vmul.f32 1.442695, %v5013_v53 }
 0x6ba   : > { %6733 = vpow2.f32 %v5038_v59  ;;  %5072 = vadd.xlane.f32.xlu1 %v5071_v36  ;;  %6288 = vmatmul.msk.f32.vlgmr.msra.gmra.mxu2 %vm425_vm1, %v6732_v2  ;;  %v5074_v41 = vsel %vm425_vm1, %v6732_v2, 0.0  ;;  %v2582_v2 = vpop.f32.mrf.mxu1 }
 0x6bb   : > { %6735 = vpow2.f32 %v5020_v18 }
 0x6bd   : > { %v4995_v46 = vpop.xlane.xlu2 %4994 }
 0x6be   : > { %v4968_v0 = vpop.xlane.xlu0 %4967  ;;  %v2237_v21 = vpop.xlane.xlu1 %2236 }
 0x6bf   : > { %v5006_v57 = vsub.f32 %v9020_v56, %v4968_v0  ;;  %6737 = vrcp.f32 %v2237_v21  ;;  %v6542_v56 = vunpack.i.h.bf16 %v9055_v13  ;;  %v5015_v13 = vsub.f32 %v9068_v4, %v4995_v46 }
 0x6c0   : > { %v9158_v39 = vpop.eup %6733  ;;  %6739 = vpow2.f32 %v5040_v9  ;;  %v2842_v33 = vand.u32 2147483648, %v2237_v21  ;;  %v2840_v61 = vand.u32 2147483647, %v2237_v21  ;;  %vm2836_vm3 = vweird.f32 %v2237_v21 }
 0x6c1   : > { %v9163_v26 = vpop.eup %6735  ;;  %v5026_v31 = vmul.f32 1.442695, %v5006_v57  ;;  %v5080_v43 = vsel %vm425_vm1, %v9158_v39, 0.0  ;;  %5078 = vadd.xlane.f32.xlu0 %v5077_v34  ;;  %6741 = vrcp.f32 %v9122_v25  ;;  %v5044_v40 = vmul.f32 1.442695, %v5015_v13 }
 0x6c2   : > { %5075 = vadd.xlane.f32.xlu1 %v5074_v41  ;;  %5081 = vadd.xlane.f32.xlu2 %v5080_v43  ;;  %v2843_v15 = vor.u32 1.1754944e-38, %v2842_v33  ;;  %vm2841_vm5 = vcmp.eq.f32.partialorder %v2840_v61, 8.507059e+37  ;;  %v3706_v9 = vsel %vm425_vm1, %v8734_v8, 0.0  ;;  %v10380_v33 = vld [vmem:[#allocation34_spill] sm:$0xff] }
 0x6c3   : > { %6743 = vpow2.f32 %v5026_v31  ;;  %6281 = vmatmul.msk.f32.vlgmr.msra.gmra.mxu0 %vm425_vm1, %v9163_v26  ;;  %v5050_v31 = vsel %vm425_vm1, %v9090_v30, 0.0 }
 0x6c4   : > { %5301 = vmatpush.msra.mxu0 %v6542_v56 }
 0x6c5   : > { %v6738_v60 = vpop.eup %6737  ;;  %v9190_v57 = vpop.permute.xlu2 %6559 }
 0x6c6   : > { %v6740_v45 = vpop.eup %6739  ;;  %v2832_v51 = vmul.f32 %v6738_v60, %v2237_v21  ;;  %v2240_v52 = vpop.xlane.xlu1 %2239  ;;  %vm2837_vm2 = vweird.f32 %v6738_v60 }
 0x6c7   : > { %6745 = vrcp.f32 %v2240_v52  ;;  %v9172_v32 = vpop.eup %6741  ;;  %v5083_v20 = vsel %vm425_vm1, %v6740_v45, 0.0  ;;  %vm2838_vm4 = vmor %vm2836_vm3, %vm2837_vm2  ;;  %v2854_v21 = vand.u32 2147483647, %v2240_v52  ;;  %v2856_v27 = vand.u32 2147483648, %v2240_v52 }
 0x6c8   : > { %6747 = vpow2.f32 %v5042_v7  ;;  %v2833_v62 = vsub.f32 1.0, %v2832_v51  ;;  %v2860_v4 = vmul.f32 %v9172_v32, %v9122_v25  ;;  %vm2850_vm7 = vweird.f32 %v2240_v52 }
 0x6c9   : > { %v9177_v48 = vpop.eup %6743  ;;  %3704 = vadd.xlane.f32.xlu0 %v3703_v23  ;;  %6749 = vpow2.f32 %v5044_v40  ;;  %v2857_v46 = vor.u32 1.1754944e-38, %v2856_v27  ;;  %vm2855_vm9 = vcmp.eq.f32.partialorder %v2854_v21, 8.507059e+37  ;;  %vm2865_vm10 = vweird.f32 %v9172_v32 }
 0x6ca   : > { %v2834_v63 = vmul.f32 %v6738_v60, %v2833_v62  ;;  %3701 = vadd.xlane.f32.xlu1 %v3700_v49  ;;  %5084 = vadd.xlane.f32.xlu2 %v5083_v20  ;;  %v2861_v16 = vsub.f32 1.0, %v2860_v4  ;;  %v5053_v49 = vsel %vm425_vm1, %v9163_v26, 0.0  ;;  %vm2866_vm12 = vmor %vm2864_vm11, %vm2865_vm10 }
 0x6cb   : > { %6284 = vmatmul.msk.f32.vlgmr.msrb.gmra.mxu0 %vm425_vm1, %v9177_v48 }
 0x6cc   : > { %v2835_v1 = vadd.f32 %v6738_v60, %v2834_v63  ;;  %v2862_v8 = vmul.f32 %v9172_v32, %v2861_v16 }
 0x6cd   : > { %v6746_v24 = vpop.eup %6745 }
 0x6ce   : > { %v9186_v59 = vpop.eup %6747  ;;  %v2846_v53 = vmul.f32 %v6746_v24, %v2240_v52  ;;  %v2839_v35 = vsel %vm2838_vm4, %v6738_v60, %v2835_v1  ;;  %vm2851_vm6 = vweird.f32 %v6746_v24  ;;  %v6561_v60 = vunpack.i.l.bf16 %v9190_v57 }
 0x6cf   : > { %v2844_v18 = vsel %vm2841_vm5, %v2843_v15, %v2839_v35  ;;  %v5086_v41 = vsel %vm425_vm1, %v9186_v59, 0.0  ;;  %vm2852_vm8 = vmor %vm2850_vm7, %vm2851_vm6  ;;  %v6750_v51 = vpop.eup %6749  ;;  %v2863_v62 = vadd.f32 %v9172_v32, %v2862_v8  ;;  %v3709_v52 = vsel %vm425_vm1, %v8804_v5, 0.0 }
 0x6d0   : > { %v2847_v36 = vsub.f32 1.0, %v2846_v53  ;;  %v2899_v0 = vmul.f32 %v2844_v18, %v2582_v2  ;;  %v5089_v20 = vsel %vm425_vm1, %v6750_v51, 0.0  ;;  %v5056_v15 = vsel %vm425_vm1, %v9135_v38, 0.0 }
 0x6d1   : > { %v6550_v34 = vpop.permute.xlu0 %6549  ;;  %3707 = vadd.xlane.f32.xlu0 %v3706_v9  ;;  %v2867_v5 = vsel %vm2866_vm12, %v9172_v32, %v2863_v62  ;;  %v6562_v53 = vunpack.i.h.bf16 %v9190_v57  ;;  %v3718_v38 = vsel %vm425_vm1, %v8830_v3, 0.0  ;;  %v5065_v35 = vsel %vm425_vm1, %v9143_v14, 0.0  ;;  %v9248_v9 = vpop.f32.mrf.mxu1 }
 0x6d2   : > { %v2848_v43 = vmul.f32 %v6746_v24, %v2847_v36  ;;  %v6552_v56 = vunpack.i.h.bf16 %v6550_v34  ;;  %v6551_v7 = vunpack.i.l.bf16 %v6550_v34  ;;  %5051 = vadd.xlane.f32.xlu1 %v5050_v31  ;;  %5087 = vadd.xlane.f32.xlu2 %v5086_v41 }
 0x6d3   : > { %6164 = vmatmul.msk.f32.gmra.mxu1 %vm425_vm1, %v2899_v0  ;;  %6287 = vmatmul.msk.f32.vlgmr.msra.gmra.mxu0 %vm425_vm1, %v9149_v22  ;;  %v2870_v22 = vand.u32 2147483648, %v9122_v25 }
 0x6d4   : > { %v2849_v30 = vadd.f32 %v6746_v24, %v2848_v43  ;;  %5379 = vmatpush.msrb.mxu0 %v6551_v7  ;;  %5405 = vmatpush.msrb.mxu2 %v6552_v56 }
 0x6d5   : > { %6291 = vmatmul.msk.f32.vlgmr.msrb.gmra.mxu2 %vm425_vm1, %v6740_v45  ;;  %v2868_v45 = vand.u32 2147483647, %v9122_v25  ;;  %v2871_v63 = vor.u32 1.1754944e-38, %v2870_v22  ;;  %v5017_v25 = vsub.f32 %v9031_v29, %v9129_v28  ;;  %v5059_v29 = vsel %vm425_vm1, %v9104_v37, 0.0 }
 0x6d6   : > { %5483 = vmatpush.msra.mxu2 %v6561_v60  ;;  %v2853_v13 = vsel %vm2852_vm8, %v6746_v24, %v2849_v30  ;;  %v3712_v24 = vsel %vm425_vm1, %v8744_v19, 0.0  ;;  %v3715_v19 = vsel %vm425_vm1, %v8813_v55, 0.0 }
 0x6d7   : > { %v2858_v23 = vsel %vm2855_vm9, %v2857_v46, %v2853_v13  ;;  %vm2869_vm13 = vcmp.eq.f32.partialorder %v2868_v45, 8.507059e+37  ;;  %v5048_v1 = vmul.f32 1.442695, %v5017_v25  ;;  %v10382_v25 = vld [vmem:[#allocation44_spill] sm:$0xff] }
 0x6d8   : > { %v2900_v54 = vmul.f32 %v2858_v23, %v10380_v33  ;;  %v2872_v26 = vsel %vm2869_vm13, %v2871_v63, %v2867_v5 }
 0x6d9   : > { %3710 = vadd.xlane.f32.xlu0 %v3709_v52  ;;  %6751 = vpow2.f32 %v5048_v1  ;;  %v9261_v46 = vpop.f32.mrf.mxu1 }
 0x6da   : > { %5054 = vadd.xlane.f32.xlu1 %v5053_v49  ;;  %5090 = vadd.xlane.f32.xlu2 %v5089_v20 }
 0x6db   : > { %6165 = vmatmul.msk.f32.gmra.mxu1 %vm425_vm1, %v2900_v54  ;;  %6290 = vmatmul.msk.f32.vlgmr.msrb.gmra.mxu0 %vm425_vm1, %v9158_v39  ;;  %v10381_v39 = vld [vmem:[#allocation30_spill] sm:$0xff] }
 0x6dc   : > { %v2901_v32 = vmul.f32 %v2872_v26, %v10381_v39 }
 0x6de   : > { %v6555_v61 = vpop.permute.xlu1 %6554 }
 0x6df   : > { %v6557_v4 = vunpack.i.h.bf16 %v6555_v61  ;;  %v6556_v40 = vunpack.i.l.bf16 %v6555_v61  ;;  %v6752_v28 = vpop.eup %6751 }
 0x6e0   : > { %v5095_v0 = vsel %vm425_vm1, %v6752_v28, 0.0 }
 0x6e1   : > { %3713 = vadd.xlane.f32.xlu0 %v3712_v24  ;;  %5431 = vmatpush.msrb.mxu3 %v6556_v40  ;;  %v9281_v39 = vpop.f32.mrf.mxu1 }
 0x6e2   : > { %5057 = vadd.xlane.f32.xlu1 %v5056_v15  ;;  %5457 = vmatpush.msra.mxu0 %v6557_v4 }
 0x6e3   : > { %6166 = vmatmul.msk.f32.gmra.mxu1 %vm425_vm1, %v2901_v32  ;;  %6292 = vmatmul.msk.f32.vlgmr.msrb.gmra.mxu3 %vm425_vm1, %v9186_v59  ;;  %v5062_v59 = vsel %vm425_vm1, %v9177_v48, 0.0 }
 0x6e4   : > { %6293 = vmatmul.msk.f32.vlgmr.msra.gmra.mxu0 %vm425_vm1, %v6750_v51  ;;  %5509 = vmatpush.msra.mxu3 %v6562_v53 }
 0x6e9   : > { %3716 = vadd.xlane.f32.xlu0 %v3715_v19 }
 0x6ea   : > { %5060 = vadd.xlane.f32.xlu1 %v5059_v29 }
 0x6eb   : > { %6295 = vmatmul.msk.f32.vlgmr.msra.gmra.mxu3 %vm425_vm1, %v6752_v28 }
 0x6f1   : > { %3719 = vadd.xlane.f32.xlu0 %v3718_v38 }
 0x6f2   : > { %5063 = vadd.xlane.f32.xlu1 %v5062_v59 }
 0x6fa   : > { %5066 = vadd.xlane.f32.xlu1 %v5065_v35 }
 0x6fc   : > { %v4998_v55 = vpop.xlane.xlu0 %4997 }
 0x6fd   : > { %v5016_v16 = vsub.f32 %v9096_v47, %v4998_v55  ;;  %v421_v47 = vld [vmem:[#allocation7 + $0x18] sm:$0xff] }
 0x6fe   : > { %v9246_v36 = vpop.xlane.xlu2 %3677  ;;  %6320 = vmatpush.msrb.mxu2 %v421_v47  ;;  %5817 = vmatpush.msrb.mxu0 %v421_v47 }
 0x6ff   : > { %v5046_v37 = vmul.f32 1.442695, %v5016_v16  ;;  %vm4156_vm10 = vweird.f32 %v9246_v36 }
 0x701   : > { %6753 = vpow2.f32 %v5046_v37 }
 0x704   : > { %v9241_v2 = vpop.xlane.xlu0 %3674 }
 0x705   : > { %6755 = vrcp.f32 %v9241_v2  ;;  %v4148_v5 = vand.u32 2147483648, %v9241_v2  ;;  %vm4142_vm5 = vweird.f32 %v9241_v2  ;;  %v4146_v63 = vand.u32 2147483647, %v9241_v2 }
 0x706   : > { %v9285_v28 = vpop.xlane.xlu2 %3698 }
 0x707   : > { %v6754_v18 = vpop.eup %6753  ;;  %v9259_v7 = vpop.f32.mrf.mxu3  ;;  %v4149_v32 = vor.u32 1.1754944e-38, %v4148_v5  ;;  %vm4147_vm7 = vcmp.eq.f32.partialorder %v4146_v63, 8.507059e+37 }
 0x708   : > { %6294 = vmatmul.msk.f32.vlgmr.msra.gmra.mxu2 %vm425_vm1, %v6754_v18  ;;  %v5092_v3 = vsel %vm425_vm1, %v6754_v18, 0.0  ;;  %v4162_v18 = vand.u32 2147483648, %v9246_v36 }
 0x709   : > { %5093 = vadd.xlane.f32.xlu2 %v5092_v3  ;;  %v2246_v48 = vpop.xlane.xlu1 %2245 }
 0x70a   : > { %6757 = vrcp.f32 %v2246_v48  ;;  %v2884_v60 = vand.u32 2147483648, %v2246_v48  ;;  %v2882_v30 = vand.u32 2147483647, %v2246_v48  ;;  %vm2878_vm15 = vweird.f32 %v2246_v48 }
 0x70b   : > { %v6756_v14 = vpop.eup %6755  ;;  %6759 = vrcp.f32 %v9246_v36 }
 0x70c   : > { %v4138_v21 = vmul.f32 %v6756_v14, %v9241_v2  ;;  %v9253_v27 = vpop.xlane.xlu0 %3680  ;;  %v2885_v22 = vor.u32 1.1754944e-38, %v2884_v60  ;;  %vm2883_vm3 = vcmp.eq.f32.partialorder %v2882_v30, 8.507059e+37  ;;  %vm4143_vm4 = vweird.f32 %v6756_v14 }
 0x70d   : > { %6761 = vrcp.f32 %v9253_v27  ;;  %vm4144_vm6 = vmor %vm4142_vm5, %vm4143_vm4  ;;  %v4160_v2 = vand.u32 2147483647, %v9246_v36 }
 0x70e   : > { %v4139_v56 = vsub.f32 1.0, %v4138_v21 }
 0x70f   : > { %v9275_v40 = vpop.f32.mrf.mxu3 }
 0x710   : > { %v6758_v57 = vpop.eup %6757  ;;  %v4140_v62 = vmul.f32 %v6756_v14, %v4139_v56 }
 0x711   : > { %5096 = vadd.xlane.f32.xlu2 %v5095_v0  ;;  %v9255_v34 = vpop.xlane.xlu1 %3686  ;;  %v2874_v31 = vmul.f32 %v6758_v57, %v2246_v48  ;;  %v9257_v43 = vpop.eup %6759  ;;  %vm2879_vm14 = vweird.f32 %v6758_v57 }
 0x712   : > { %v4152_v51 = vmul.f32 %v9257_v43, %v9246_v36  ;;  %vm2880_vm2 = vmor %vm2878_vm15, %vm2879_vm14  ;;  %v4141_v49 = vadd.f32 %v6756_v14, %v4140_v62  ;;  %vm4157_vm8 = vweird.f32 %v9257_v43  ;;  %vm4161_vm15 = vcmp.eq.f32.partialorder %v4160_v2, 8.507059e+37 }
 0x713   : > { %v2875_v41 = vsub.f32 1.0, %v2874_v31  ;;  %v9268_v20 = vpop.eup %6761  ;;  %vm9294_vm11 = vmor %vm4156_vm10, %vm4157_vm8 }
 0x714   : > { %v9266_v52 = vpop.xlane.xlu0 %3683  ;;  %v4153_v54 = vsub.f32 1.0, %v4152_v51  ;;  %v4145_v1 = vsel %vm4144_vm6, %v6756_v14, %v4141_v49  ;;  %v4166_v24 = vmul.f32 %v9268_v20, %v9253_v27 }
 0x715   : > { %v2876_v8 = vmul.f32 %v6758_v57, %v2875_v41  ;;  %v4150_v29 = vsel %vm4147_vm7, %v4149_v32, %v4145_v1  ;;  %vm4184_vm7 = vweird.f32 %v9266_v52 }
 0x716   : > { %v4154_v4 = vmul.f32 %v9257_v43, %v4153_v54  ;;  %v4167_v59 = vsub.f32 1.0, %v4166_v24  ;;  %v4361_v48 = vmul.f32 %v4150_v29, %v8883_v10  ;;  %v4163_v10 = vor.u32 1.1754944e-38, %v4162_v18 }
 0x717   : > { %v2877_v13 = vadd.f32 %v6758_v57, %v2876_v8  ;;  %v5277_v31 = vpop.f32.mrf.mxu3  ;;  %v9308_v8 = vpop.f32.mrf.mxu1  ;;  %v4190_v24 = vand.u32 2147483648, %v9266_v52 }
 0x718   : > { %v4155_v19 = vadd.f32 %v9257_v43, %v4154_v4  ;;  %v4168_v36 = vmul.f32 %v9268_v20, %v4167_v59 }
 0x719   : > { %v5070_v23 = vpop.xlane.xlu1 %5069  ;;  %v2881_v33 = vsel %vm2880_vm2, %v6758_v57, %v2877_v13  ;;  %vm4171_vm2 = vweird.f32 %v9268_v20 }
 0x71a   : > { %6763 = vrcp.f32 %v5070_v23  ;;  %v2886_v45 = vsel %vm2883_vm3, %v2885_v22, %v2881_v33  ;;  %v5609_v38 = vand.u32 2147483648, %v5070_v23  ;;  %v5607_v55 = vand.u32 2147483647, %v5070_v23 }
 0x71b   : > { %v2902_v61 = vmul.f32 %v2886_v45, %v10382_v25  ;;  %6765 = vrcp.f32 %v9266_v52  ;;  %vm5603_vm12 = vweird.f32 %v5070_v23  ;;  %v4159_v0 = vsel %vm9294_vm11, %v9257_v43, %v4155_v19 }
 0x71c   : > { %v9287_v16 = vpop.xlane.xlu0 %3689  ;;  %6767 = vrcp.f32 %v9285_v28  ;;  %v5610_v47 = vor.u32 1.1754944e-38, %v5609_v38  ;;  %vm5608_vm14 = vcmp.eq.f32.partialorder %v5607_v55, 8.507059e+37  ;;  %v4164_v60 = vsel %vm4161_vm15, %v4163_v10, %v4159_v0 }
 0x71d   : > { %6167 = vmatmul.msk.f32.gmra.mxu1 %vm425_vm1, %v2902_v61  ;;  %6769 = vrcp.f32 %v9255_v34  ;;  %v4169_v43 = vadd.f32 %v9268_v20, %v4168_v36  ;;  %vm4170_vm3 = vweird.f32 %v9253_v27  ;;  %v4174_v22 = vand.u32 2147483647, %v9253_v27 }
 0x71e   : > { %6771 = vrcp.f32 %v9287_v16  ;;  %v4362_v54 = vmul.f32 %v4164_v60, %v8887_v58  ;;  %vm4172_vm4 = vmor %vm4170_vm3, %vm4171_vm2  ;;  %v4191_v55 = vor.u32 1.1754944e-38, %v4190_v24 }
 0x71f   : > { %v4173_v5 = vsel %vm4172_vm4, %v9268_v20, %v4169_v43  ;;  %vm4175_vm5 = vcmp.eq.f32.partialorder %v4174_v22, 8.507059e+37  ;;  %v9341_v20 = vpop.f32.mrf.mxu1 }
 0x720   : > { %v6764_v26 = vpop.eup %6763 }
 0x721   : > { %v5599_v15 = vmul.f32 %v6764_v26, %v5070_v23  ;;  %vm5604_vm9 = vweird.f32 %v6764_v26  ;;  %v9289_v37 = vpop.eup %6765  ;;  %v4176_v23 = vand.u32 2147483648, %v9253_v27 }
 0x722   : > { %vm5605_vm13 = vmor %vm5603_vm12, %vm5604_vm9  ;;  %v4180_v57 = vmul.f32 %v9289_v37, %v9266_v52  ;;  %v9310_v30 = vpop.eup %6767  ;;  %vm4185_vm6 = vweird.f32 %v9289_v37  ;;  %vm4198_vm12 = vweird.f32 %v9255_v34 }
 0x723   : > { %v5600_v53 = vsub.f32 1.0, %v5599_v15  ;;  %v9317_v62 = vpop.eup %6769  ;;  %v4250_v63 = vmul.f32 %v9310_v30, %v9285_v28  ;;  %v4177_v25 = vor.u32 1.1754944e-38, %v4176_v23  ;;  %v4188_v15 = vand.u32 2147483647, %v9266_v52  ;;  %vm4186_vm8 = vmor %vm4184_vm7, %vm4185_vm6 }
 0x724   : > { %v4181_v51 = vsub.f32 1.0, %v4180_v57  ;;  %v9323_v33 = vpop.xlane.xlu0 %3692  ;;  %v4194_v45 = vmul.f32 %v9317_v62, %v9255_v34  ;;  %v9333_v27 = vpop.eup %6771  ;;  %vm4255_vm10 = vweird.f32 %v9310_v30  ;;  %vm4199_vm11 = vweird.f32 %v9317_v62 }
 0x725   : > { %v5601_v35 = vmul.f32 %v6764_v26, %v5600_v53  ;;  %6232 = vmatmul.msk.f32.vlgmr.msrb.gmra.mxu1 %vm425_vm1, %v4361_v48  ;;  %v4178_v58 = vsel %vm4175_vm5, %v4177_v25, %v4173_v5  ;;  %v4251_v1 = vsub.f32 1.0, %v4250_v63  ;;  %v4208_v32 = vmul.f32 %v9333_v27, %v9287_v16 }
 0x726   : > { %v4182_v49 = vmul.f32 %v9289_v37, %v4181_v51  ;;  %v4195_v61 = vsub.f32 1.0, %v4194_v45  ;;  %v4363_v53 = vmul.f32 %v4178_v58, %v8893_v6  ;;  %vm4189_vm9 = vcmp.eq.f32.partialorder %v4188_v15, 8.507059e+37 }
 0x727   : > { %v5602_v14 = vadd.f32 %v6764_v26, %v5601_v35  ;;  %v4252_v35 = vmul.f32 %v9310_v30, %v4251_v1  ;;  %v4209_v6 = vsub.f32 1.0, %v4208_v32  ;;  %v9377_v10 = vpop.f32.mrf.mxu1  ;;  %vm4213_vm3 = vweird.f32 %v9333_v27 }
 0x728   : > { %v4196_v19 = vmul.f32 %v9317_v62, %v4195_v61  ;;  %vm4212_vm5 = vweird.f32 %v9287_v16 }
 0x729   : > { %v5606_v21 = vsel %vm5605_vm13, %v6764_v26, %v5602_v14  ;;  %v4183_v26 = vadd.f32 %v9289_v37, %v4182_v49  ;;  %v4253_v48 = vadd.f32 %v9310_v30, %v4252_v35  ;;  %v4202_v14 = vand.u32 2147483647, %v9255_v34  ;;  %vm9418_vm6 = vmor %vm4212_vm5, %vm4213_vm3 }
 0x72a   : > { %v5611_v41 = vsel %vm5608_vm14, %v5610_v47, %v5606_v21  ;;  %v4197_v18 = vadd.f32 %v9317_v62, %v4196_v19  ;;  %v4204_v47 = vand.u32 2147483648, %v9255_v34  ;;  %v4210_v36 = vmul.f32 %v9333_v27, %v4209_v6  ;;  %vm9381_vm14 = vmor %vm4198_vm12, %vm4199_vm11 }
 0x72b   : > { %v5744_v56 = vmul.f32 %v5611_v41, %v5277_v31  ;;  %v4187_v38 = vsel %vm4186_vm8, %v9289_v37, %v4183_v26  ;;  %vm4254_vm13 = vweird.f32 %v9285_v28  ;;  %v4260_v31 = vand.u32 2147483648, %v9285_v28 }
 0x72c   : > { %v9350_v29 = vpop.xlane.xlu0 %3695  ;;  %v4192_v2 = vsel %vm4189_vm9, %v4191_v55, %v4187_v38  ;;  %vm9390_vm15 = vmor %vm4254_vm13, %vm4255_vm10  ;;  %v4258_v34 = vand.u32 2147483647, %v9285_v28  ;;  %v4201_v43 = vsel %vm9381_vm14, %v9317_v62, %v4197_v18  ;;  %vm4203_vm2 = vcmp.eq.f32.partialorder %v4202_v14, 8.507059e+37 }
 0x72d   : > { %v9314_v13 = vpop.xlane.xlu1 %5072  ;;  %6302 = vmatmul.msk.f32.vlgmr.msrb.gmra.mxu2 %vm425_vm1, %v5744_v56  ;;  %6233 = vmatmul.msk.f32.gmra.mxu1 %vm425_vm1, %v4362_v54  ;;  %v4364_v57 = vmul.f32 %v4192_v2, %v8897_v50  ;;  %v4205_v51 = vor.u32 1.1754944e-38, %v4204_v47  ;;  %v4257_v22 = vsel %vm9390_vm15, %v9310_v30, %v4253_v48  ;;  %v4211_v54 = vadd.f32 %v9333_v27, %v4210_v36  ;;  %v9410_v63 = vpop.f32.mrf.mxu2 }
 0x72e   : > { %6773 = vrcp.f32 %v9314_v13  ;;  %v4216_v28 = vand.u32 2147483647, %v9287_v16  ;;  %v4261_v5 = vor.u32 1.1754944e-38, %v4260_v31  ;;  %v4218_v62 = vand.u32 2147483648, %v9287_v16 }
 0x72f   : > { %6775 = vrcp.f32 %v9323_v33  ;;  %v4206_v25 = vsel %vm4203_vm2, %v4205_v51, %v4201_v43  ;;  %vm4259_vm4 = vcmp.eq.f32.partialorder %v4258_v34, 8.507059e+37  ;;  %v4215_v19 = vsel %vm9418_vm6, %v9333_v27, %v4211_v54  ;;  %v9444_v27 = vpop.f32.mrf.mxu1 }
 0x730   : > { %v4262_v15 = vsel %vm4259_vm4, %v4261_v5, %v4257_v22  ;;  %vm9425_vm7 = vcmp.eq.f32.partialorder %v4216_v28, 8.507059e+37  ;;  %v4219_v38 = vor.u32 1.1754944e-38, %v4218_v62  ;;  %v4230_v35 = vand.u32 2147483647, %v9323_v33 }
 0x731   : > { %v4232_v55 = vand.u32 2147483648, %v9323_v33  ;;  %v5621_v48 = vand.u32 2147483647, %v9314_v13  ;;  %v5623_v14 = vand.u32 2147483648, %v9314_v13  ;;  %vm5617_vm10 = vweird.f32 %v9314_v13 }
 0x732   : > { %vm4226_vm11 = vweird.f32 %v9323_v33  ;;  %vm9454_vm12 = vcmp.eq.f32.partialorder %v4230_v35, 8.507059e+37  ;;  %v4246_v54 = vand.u32 2147483648, %v9350_v29 }
 0x733   : > { %vm5622_vm15 = vcmp.eq.f32.partialorder %v5621_v48, 8.507059e+37  ;;  %v5624_v43 = vor.u32 1.1754944e-38, %v5623_v14 }
 0x734   : > { %v9354_v59 = vpop.eup %6773  ;;  %v9405_v45 = vpop.xlane.xlu0 %5078 }
 0x735   : > { %v9339_v4 = vpop.xlane.xlu1 %5075  ;;  %6234 = vmatmul.msk.f32.gmra.mxu1 %vm425_vm1, %v4363_v53  ;;  %v9358_v52 = vpop.eup %6775  ;;  %v5613_v37 = vmul.f32 %v9354_v59, %v9314_v13  ;;  %v4365_v53 = vmul.f32 %v4206_v25, %v8900_v12  ;;  %vm5618_vm9 = vweird.f32 %v9354_v59  ;;  %v4233_v13 = vor.u32 1.1754944e-38, %v4232_v55 }
 0x736   : > { %6777 = vrcp.f32 %v9339_v4  ;;  %v4222_v0 = vmul.f32 %v9358_v52, %v9323_v33  ;;  %v9423_v24 = vpop.xlane.xlu2 %5081  ;;  %vm4227_vm8 = vweird.f32 %v9358_v52  ;;  %vm9459_vm13 = vmor %vm5617_vm10, %vm5618_vm9  ;;  %vm5631_vm3 = vweird.f32 %v9339_v4 }
 0x737   : > { %6779 = vrcp.f32 %v9350_v29  ;;  %v5614_v60 = vsub.f32 1.0, %v5613_v37  ;;  %v4220_v37 = vsel %vm9425_vm7, %v4219_v38, %v4215_v19  ;;  %vm9468_vm14 = vmor %vm4226_vm11, %vm4227_vm8  ;;  %v5635_v25 = vand.u32 2147483647, %v9339_v4  ;;  %v9519_v35 = vpop.f32.mrf.mxu1 }
 0x738   : > { %v4223_v23 = vsub.f32 1.0, %v4222_v0  ;;  %v4366_v34 = vmul.f32 %v4220_v37, %v8905_v11  ;;  %v5637_v11 = vand.u32 2147483648, %v9339_v4  ;;  %vm4240_vm10 = vweird.f32 %v9350_v29 }
 0x739   : > { %v5615_v58 = vmul.f32 %v9354_v59, %v5614_v60  ;;  %vm5636_vm7 = vcmp.eq.f32.partialorder %v5635_v25, 8.507059e+37 }
 0x73a   : > { %v4224_v1 = vmul.f32 %v9358_v52, %v4223_v23 }
 0x73b   : > { %v5616_v12 = vadd.f32 %v9354_v59, %v5615_v58 }
 0x73c   : > { %v9375_v21 = vpop.eup %6777  ;;  %v4225_v18 = vadd.f32 %v9358_v52, %v4224_v1  ;;  %v9472_v41 = vpop.xlane.xlu0 %3704  ;;  %v5651_v1 = vand.u32 2147483648, %v9405_v45 }
 0x73d   : > { %v9365_v3 = vpop.xlane.xlu1 %3701  ;;  %6235 = vmatmul.msk.f32.gmra.mxu1 %vm425_vm1, %v4364_v57  ;;  %v5627_v49 = vmul.f32 %v9375_v21, %v9339_v4  ;;  %v9416_v61 = vpop.eup %6779  ;;  %v9464_v57 = vmul.f32 %v4262_v15, %v8928_v44  ;;  %v5620_v60 = vsel %vm9459_vm13, %v9354_v59, %v5616_v12  ;;  %vm5632_vm2 = vweird.f32 %v9375_v21 }
 0x73e   : > { %v4236_v2 = vmul.f32 %v9416_v61, %v9350_v29  ;;  %v9481_v44 = vpop.f32.mrf.mxu2  ;;  %v4229_v51 = vsel %vm9468_vm14, %v9358_v52, %v4225_v18  ;;  %v4244_v59 = vand.u32 2147483647, %v9350_v29  ;;  %v9492_v28 = vpop.xlane.xlu2 %5084  ;;  %v5625_v62 = vsel %vm5622_vm15, %v5624_v43, %v5620_v60  ;;  %vm9505_vm5 = vmor %vm5631_vm3, %vm5632_vm2 }
 0x73f   : > { %v5628_v16 = vsub.f32 1.0, %v5627_v49  ;;  %vm4241_vm4 = vweird.f32 %v9416_v61  ;;  %v4247_v29 = vor.u32 1.1754944e-38, %v4246_v54  ;;  %vm5645_vm14 = vweird.f32 %v9405_v45 }
 0x740   : > { %v9386_v56 = vpop.f32.mrf.mxu0  ;;  %v4237_v33 = vsub.f32 1.0, %v4236_v2  ;;  %vm9552_vm13 = vmor %vm4240_vm10, %vm4241_vm4  ;;  %v5665_v15 = vand.u32 2147483648, %v9423_v24  ;;  %vm5659_vm2 = vweird.f32 %v9423_v24 }
 0x741   : > { %v5629_v47 = vmul.f32 %v9375_v21, %v5628_v16  ;;  %v4234_v16 = vsel %vm9454_vm12, %v4233_v13, %v4229_v51  ;;  %vm9543_vm12 = vcmp.eq.f32.partialorder %v4244_v59, 8.507059e+37  ;;  %v9557_v59 = vor.u32 1.1754944e-38, %v5651_v1 }
 0x742   : > { %v4238_v52 = vmul.f32 %v9416_v61, %v4237_v33  ;;  %v4367_v13 = vmul.f32 %v4234_v16, %v8911_v42  ;;  %v4288_v1 = vand.u32 2147483648, %v9472_v41 }
 0x743   : > { %v5630_v22 = vadd.f32 %v9375_v21, %v5629_v47 }
 0x744   : > { %v4239_v18 = vadd.f32 %v9416_v61, %v4238_v52  ;;  %v9536_v36 = vpop.xlane.xlu0 %3707 }
 0x745   : > { %v9413_v30 = vpop.xlane.xlu1 %5051  ;;  %6236 = vmatmul.msk.f32.gmra.mxu1 %vm425_vm1, %v4365_v53  ;;  %v5634_v4 = vsel %vm9505_vm5, %v9375_v21, %v5630_v22  ;;  %v5638_v53 = vor.u32 1.1754944e-38, %v5637_v11 }
 0x746   : > { %6781 = vrcp.f32 %v9413_v30  ;;  %v5525_v19 = vand.u32 2147483648, %v9413_v30  ;;  %v5523_v2 = vand.u32 2147483647, %v9413_v30  ;;  %vm5519_vm8 = vweird.f32 %v9413_v30  ;;  %v5329_v33 = vpop.f32.mrf.mxu2 }
 0x747   : > { %6783 = vrcp.f32 %v9405_v45  ;;  %v5639_v48 = vsel %vm5636_vm7, %v5638_v53, %v5634_v4  ;;  %v4243_v54 = vsel %vm9552_vm13, %v9416_v61, %v4239_v18  ;;  %v4286_v61 = vand.u32 2147483647, %v9472_v41 }
 0x748   : > { %v9436_v6 = vpop.f32.mrf.mxu0  ;;  %6785 = vrcp.f32 %v9423_v24  ;;  %v5526_v31 = vor.u32 1.1754944e-38, %v5525_v19  ;;  %vm5524_vm11 = vcmp.eq.f32.partialorder %v5523_v2, 8.507059e+37  ;;  %v5746_v22 = vmul.f32 %v5639_v48, %v5329_v33 }
 0x749   : > { %v4274_v53 = vand.u32 2147483648, %v9365_v3  ;;  %vm5673_vm13 = vweird.f32 %v9492_v28 }
 0x74c   : > { %v6782_v23 = vpop.eup %6781 }
 0x74d   : > { %v9474_v50 = vpop.xlane.xlu1 %5054  ;;  %v5515_v49 = vmul.f32 %v6782_v23, %v9413_v30  ;;  %6237 = vmatmul.msk.f32.gmra.mxu1 %vm425_vm1, %v4366_v34  ;;  %v9499_v26 = vpop.eup %6783  ;;  %vm5520_vm6 = vweird.f32 %v6782_v23 }
 0x74e   : > { %6787 = vrcp.f32 %v9474_v50  ;;  %v9517_v38 = vpop.eup %6785  ;;  %v5641_v21 = vmul.f32 %v9499_v26, %v9405_v45  ;;  %vm5521_vm9 = vmor %vm5519_vm8, %vm5520_vm6  ;;  %vm5646_vm15 = vweird.f32 %v9499_v26  ;;  %v5537_v33 = vand.u32 2147483647, %v9474_v50 }
 0x74f   : > { %v5516_v32 = vsub.f32 1.0, %v5515_v49  ;;  %6789 = vrcp.f32 %v9472_v41  ;;  %v5655_v0 = vmul.f32 %v9517_v38, %v9423_v24  ;;  %vm5533_vm5 = vweird.f32 %v9474_v50  ;;  %vm9646_vm10 = vmor %vm5645_vm14, %vm5646_vm15 }
 0x750   : > { %v5303_v5 = vpop.f32.mrf.mxu0  ;;  %6791 = vrcp.f32 %v9492_v28  ;;  %v5642_v51 = vsub.f32 1.0, %v5641_v21  ;;  %v4248_v21 = vsel %vm9543_vm12, %v4247_v29, %v4243_v54  ;;  %v9616_v29 = vor.u32 1.1754944e-38, %v4274_v53 }
 0x751   : > { %v5745_v58 = vmul.f32 %v5625_v62, %v5303_v5  ;;  %v5517_v55 = vmul.f32 %v6782_v23, %v5516_v32  ;;  %6793 = vrcp.f32 %v9365_v3  ;;  %v9559_v5 = vpop.xlane.xlu2 %5087  ;;  %v5656_v25 = vsub.f32 1.0, %v5655_v0 }
 0x752   : > { %v5643_v16 = vmul.f32 %v9499_v26, %v5642_v51  ;;  %v4272_v51 = vand.u32 2147483647, %v9365_v3  ;;  %vm5660_vm8 = vweird.f32 %v9517_v38  ;;  %vm4268_vm14 = vweird.f32 %v9365_v3 }
 0x753   : > { %6303 = vmatmul.msk.f32.gmra.mxu2 %vm425_vm1, %v5745_v58  ;;  %v5518_v14 = vadd.f32 %v6782_v23, %v5517_v55  ;;  %v5663_v58 = vand.u32 2147483647, %v9423_v24  ;;  %v9586_v55 = vpop.f32.mrf.mxu1  ;;  %v5657_v0 = vmul.f32 %v9517_v38, %v5656_v25  ;;  %vm9663_vm12 = vmor %vm5659_vm2, %vm5660_vm8 }
 0x754   : > { %v9523_v12 = vpop.eup %6787  ;;  %vm9697_vm2 = vcmp.eq.f32.partialorder %v4272_v51, 8.507059e+37 }
 0x755   : > { %v9529_v37 = vpop.xlane.xlu1 %5057  ;;  %v5529_v47 = vmul.f32 %v9523_v12, %v9474_v50  ;;  %v5522_v34 = vsel %vm5521_vm9, %v6782_v23, %v5518_v14  ;;  %v9541_v60 = vpop.eup %6789  ;;  %6238 = vmatmul.msk.f32.gmra.mxu1 %vm425_vm1, %v4367_v13  ;;  %v5649_v23 = vand.u32 2147483647, %v9405_v45  ;;  %vm5534_vm4 = vweird.f32 %v9523_v12 }
 0x756   : > { %6795 = vrcp.f32 %v9529_v37  ;;  %v5527_v11 = vsel %vm5524_vm11, %v5526_v31, %v5522_v34  ;;  %v9548_v49 = vpop.eup %6791  ;;  %v4278_v4 = vmul.f32 %v9541_v60, %v9472_v41  ;;  %v9604_v31 = vor.u32 1.1754944e-38, %v4288_v1  ;;  %vm9623_vm7 = vmor %vm5533_vm5, %vm5534_vm4 }
 0x757   : > { %v5530_v30 = vsub.f32 1.0, %v5529_v47  ;;  %v5738_v62 = vmul.f32 %v5527_v11, %v9259_v7  ;;  %v9562_v52 = vpop.eup %6793  ;;  %6797 = vrcp.f32 %v9536_v36  ;;  %vm9595_vm3 = vcmp.eq.f32.partialorder %v5649_v23, 8.507059e+37 }
 0x758   : > { %v4264_v2 = vmul.f32 %v9562_v52, %v9365_v3  ;;  %6799 = vrcp.f32 %v9559_v5  ;;  %v5669_v14 = vmul.f32 %v9548_v49, %v9492_v28  ;;  %v5539_v47 = vand.u32 2147483648, %v9474_v50 }
 0x759   : > { %v5531_v7 = vmul.f32 %v9523_v12, %v5530_v30  ;;  %6296 = vmatmul.msk.f32.vlgmr.msrb.gmra.mxu0 %vm425_vm1, %v5738_v62  ;;  %v5644_v30 = vadd.f32 %v9499_v26, %v5643_v16  ;;  %v4279_v43 = vsub.f32 1.0, %v4278_v4  ;;  %v4368_v11 = vmul.f32 %v4248_v21, %v8922_v17 }
 0x75a   : > { %v4265_v42 = vsub.f32 1.0, %v4264_v2  ;;  %vm9619_vm6 = vcmp.eq.f32.partialorder %v5663_v58, 8.507059e+37  ;;  %v5670_v25 = vsub.f32 1.0, %v5669_v14  ;;  %v5540_v1 = vor.u32 1.1754944e-38, %v5539_v47  ;;  %v9635_v58 = vpop.xlane.xlu2 %5090 }
 0x75b   : > { %6304 = vmatmul.msk.f32.gmra.mxu2 %vm425_vm1, %v5746_v22  ;;  %v5532_v13 = vadd.f32 %v9523_v12, %v5531_v7  ;;  %v9613_v22 = vpop.xlane.xlu0 %3710  ;;  %v5658_v7 = vadd.f32 %v9517_v38, %v5657_v0  ;;  %vm5538_vm9 = vcmp.eq.f32.partialorder %v5537_v33, 8.507059e+37  ;;  %v4280_v2 = vmul.f32 %v9541_v60, %v4279_v43  ;;  %v9654_v0 = vpop.f32.mrf.mxu1 }
 0x75c   : > { %v9576_v32 = vpop.eup %6795  ;;  %v5666_v21 = vor.u32 1.1754944e-38, %v5665_v15  ;;  %vm4269_vm11 = vweird.f32 %v9562_v52  ;;  %v5648_v24 = vsel %vm9646_vm10, %v9499_v26, %v5644_v30  ;;  %vm4283_vm15 = vweird.f32 %v9541_v60 }
 0x75d   : > { %v9584_v19 = vpop.xlane.xlu1 %5060  ;;  %v5543_v18 = vmul.f32 %v9576_v32, %v9529_v37  ;;  %v9609_v34 = vpop.eup %6797  ;;  %6239 = vmatmul.msk.f32.gmra.mxu1 %vm425_vm1, %v4368_v11  ;;  %v5536_v16 = vsel %vm9623_vm7, %v9523_v12, %v5532_v13  ;;  %v4266_v12 = vmul.f32 %v9562_v52, %v4265_v42  ;;  %v5662_v43 = vsel %vm9663_vm12, %v9517_v38, %v5658_v7 }
 0x75e   : > { %6801 = vrcp.f32 %v9584_v19  ;;  %v9630_v17 = vpop.eup %6799  ;;  %v4292_v50 = vmul.f32 %v9609_v34, %v9536_v36  ;;  %v5541_v14 = vsel %vm5538_vm9, %v5540_v1, %v5536_v16  ;;  %v5671_v11 = vmul.f32 %v9548_v49, %v5670_v25  ;;  %v5355_v42 = vpop.f32.mrf.mxu3 }
 0x75f   : > { %v5544_v23 = vsub.f32 1.0, %v5543_v18  ;;  %6803 = vrcp.f32 %v9613_v22  ;;  %v4300_v18 = vand.u32 2147483647, %v9536_v36  ;;  %v5739_v33 = vmul.f32 %v5541_v14, %v9386_v56 }
 0x760   : > { %6805 = vrcp.f32 %v9635_v58  ;;  %v9682_v54 = vmul.f32 %v9630_v17, %v9559_v5  ;;  %v5653_v38 = vsel %vm9595_vm3, %v9557_v59, %v5648_v24  ;;  %v4302_v25 = vand.u32 2147483648, %v9536_v36 }
 0x761   : > { %v5545_v45 = vmul.f32 %v9576_v32, %v5544_v23  ;;  %v4293_v23 = vsub.f32 1.0, %v4292_v50  ;;  %6297 = vmatmul.msk.f32.gmra.mxu0 %vm425_vm1, %v5739_v33  ;;  %v5553_v1 = vand.u32 2147483648, %v9529_v37  ;;  %v5747_v26 = vmul.f32 %v5653_v38, %v5355_v42 }
 0x762   : > { %v9694_v7 = vadd.f32 %v9541_v60, %v4280_v2  ;;  %vm5548_vm3 = vweird.f32 %v9576_v32  ;;  %v5551_v48 = vand.u32 2147483647, %v9529_v37  ;;  %v4267_v16 = vadd.f32 %v9562_v52, %v4266_v12 }
 0x763   : > { %v5546_v59 = vadd.f32 %v9576_v32, %v5545_v45  ;;  %v5667_v53 = vsel %vm9619_vm6, %v5666_v21, %v5662_v43  ;;  %vm5674_vm4 = vweird.f32 %v9548_v49  ;;  %6305 = vmatmul.msk.f32.gmra.mxu2 %vm425_vm1, %v5747_v26  ;;  %vm4282_vm5 = vweird.f32 %v9472_v41  ;;  %v9727_v45 = vpop.xlane.xlu0 %3713  ;;  %v5381_v43 = vpop.f32.mrf.mxu0 }
 0x764   : > { %v9640_v4 = vpop.eup %6801  ;;  %v9714_v51 = vmul.f32 %v9609_v34, %v4293_v23  ;;  %v5684_v14 = vsub.f32 1.0, %v9682_v54  ;;  %vm5547_vm7 = vweird.f32 %v9529_v37  ;;  %v9719_v62 = vadd.f32 %v9548_v49, %v5671_v11  ;;  %vm9750_vm9 = vmor %vm5673_vm13, %vm5674_vm4 }
 0x765   : > { %v9652_v47 = vpop.xlane.xlu1 %5063  ;;  %v5557_v15 = vmul.f32 %v9640_v4, %v9584_v19  ;;  %v9691_v30 = vpop.eup %6803  ;;  %6240 = vmatmul.msk.f32.gmra.mxu1 %vm425_vm1, %v9464_v57  ;;  %vm9731_vm6 = vmor %vm5547_vm7, %vm5548_vm3  ;;  %v5554_v13 = vor.u32 1.1754944e-38, %v5553_v1  ;;  %v5677_v37 = vand.u32 2147483647, %v9492_v28  ;;  %vm5552_vm8 = vcmp.eq.f32.partialorder %v5551_v48, 8.507059e+37 }
 0x766   : > { %6807 = vrcp.f32 %v9652_v47  ;;  %v9721_v21 = vpop.eup %6805  ;;  %v9725_v12 = vmul.f32 %v9691_v30, %v9613_v22  ;;  %v5567_v11 = vand.u32 2147483648, %v9584_v19  ;;  %v5550_v24 = vsel %vm9731_vm6, %v9576_v32, %v5546_v59  ;;  %v9757_v32 = vpop.f32.mrf.mxu1  ;;  %vm4270_vm13 = vmor %vm4268_vm14, %vm4269_vm11 }
 0x767   : > { %v5558_v56 = vsub.f32 1.0, %v5557_v15  ;;  %v5679_v15 = vand.u32 2147483648, %v9492_v28  ;;  %vm5562_vm10 = vweird.f32 %v9640_v4  ;;  %v5555_v38 = vsel %vm5552_vm8, %v5554_v13, %v5550_v24 }
 0x768   : > { %vm9761_vm12 = vcmp.eq.f32.partialorder %v4286_v61, 8.507059e+37  ;;  %v9767_v28 = vmul.f32 %v9721_v21, %v9635_v58  ;;  %v5676_v26 = vsel %vm9750_vm9, %v9548_v49, %v9719_v62  ;;  %v5740_v48 = vmul.f32 %v5555_v38, %v9410_v63 }
 0x769   : > { %v5559_v2 = vmul.f32 %v9640_v4, %v5558_v56  ;;  %v5565_v56 = vand.u32 2147483647, %v9584_v19  ;;  %v4307_v61 = vsub.f32 1.0, %v9725_v12  ;;  %vm5561_vm3 = vweird.f32 %v9584_v19 }
 0x76a   : > { %vm9783_vm4 = vcmp.eq.f32.partialorder %v5677_v37, 8.507059e+37  ;;  %vm9789_vm7 = vmor %vm5561_vm3, %vm5562_vm10  ;;  %v5568_v49 = vor.u32 1.1754944e-38, %v5567_v11  ;;  %6298 = vmatmul.msk.f32.gmra.mxu0 %vm425_vm1, %v5740_v48  ;;  %v4271_v62 = vsel %vm4270_vm13, %v9562_v52, %v4267_v16  ;;  %vm4296_vm14 = vweird.f32 %v9536_v36  ;;  %v10427_v52 = vld [vmem:[#allocation25_spill] sm:$0xff] }
 0x76b   : > { %v5560_v54 = vadd.f32 %v9640_v4, %v5559_v2  ;;  %v5748_v2 = vmul.f32 %v5667_v53, %v5381_v43  ;;  %vm5566_vm11 = vcmp.eq.f32.partialorder %v5565_v56, 8.507059e+37  ;;  %v5581_v53 = vand.u32 2147483648, %v9652_v47 }
 0x76c   : > { %v9744_v42 = vpop.eup %6807  ;;  %v4276_v19 = vsel %vm9697_vm2, %v9616_v29, %v4271_v62  ;;  %vm9813_vm2 = vmor %vm4282_vm5, %vm4283_vm15  ;;  %v5680_v50 = vor.u32 1.1754944e-38, %v5679_v15  ;;  %vm5575_vm8 = vweird.f32 %v9652_v47  ;;  %v5685_v11 = vmul.f32 %v9630_v17, %v5684_v14 }
 0x76d   : > { %v9737_v33 = vpop.xlane.xlu1 %5066  ;;  %v5571_v59 = vmul.f32 %v9744_v42, %v9652_v47  ;;  %6306 = vmatmul.msk.f32.gmra.mxu2 %vm425_vm1, %v5748_v2  ;;  %v5564_v12 = vsel %vm9789_vm7, %v9640_v4, %v5560_v54  ;;  %vm5576_vm6 = vweird.f32 %v9744_v42  ;;  %v4370_v16 = vmul.f32 %v4276_v19, %v10427_v52  ;;  %v5407_v4 = vpop.f32.mrf.mxu2 }
 0x76e   : > { %6809 = vrcp.f32 %v9737_v33  ;;  %v5569_v43 = vsel %vm5566_vm11, %v5568_v49, %v5564_v12  ;;  %v5579_v54 = vand.u32 2147483647, %v9652_v47  ;;  %v4285_v15 = vsel %vm9813_vm2, %v9541_v60, %v9694_v7  ;;  %vm9839_vm5 = vmor %vm5575_vm8, %vm5576_vm6  ;;  %v9853_v63 = vpop.f32.mrf.mxu1 }
 0x76f   : > { %6811 = vrcp.f32 %v9727_v45  ;;  %v5572_v3 = vsub.f32 1.0, %v5571_v59  ;;  %6241 = vmatmul.msk.f32.gmra.mxu1 %vm425_vm1, %v4370_v16  ;;  %v5741_v41 = vmul.f32 %v5569_v43, %v9275_v40  ;;  %vm4297_vm15 = vweird.f32 %v9609_v34  ;;  %v9835_v59 = vpop.xlane.xlu0 %3716  ;;  %v5433_v43 = vpop.f32.mrf.mxu3 }
 0x770   : > { %v5698_v14 = vsub.f32 1.0, %v9767_v28  ;;  %v5681_v38 = vsel %vm9783_vm4, %v5680_v50, %v5676_v26  ;;  %v5582_v60 = vor.u32 1.1754944e-38, %v5581_v53  ;;  %vm5688_vm9 = vweird.f32 %v9630_v17  ;;  %v10434_v53 = vld [vmem:[#allocation37_spill] sm:$0xff]  ;;  %vm9881_vm4 = vmor %vm4296_vm14, %vm4297_vm15 }
 0x771   : > { %v5573_v37 = vmul.f32 %v9744_v42, %v5572_v3  ;;  %v5749_v48 = vmul.f32 %v5681_v38, %v5407_v4  ;;  %v5686_v28 = vadd.f32 %v9630_v17, %v5685_v11  ;;  %v5693_v26 = vand.u32 2147483648, %v9559_v5 }
 0x772   : > { %v4290_v57 = vsel %vm9761_vm12, %v9604_v31, %v4285_v15  ;;  %v4295_v49 = vadd.f32 %v9609_v34, %v9714_v51  ;;  %v4308_v3 = vmul.f32 %v9691_v30, %v4307_v61  ;;  %vm5580_vm10 = vcmp.eq.f32.partialorder %v5579_v54, 8.507059e+37  ;;  %6299 = vmatmul.msk.f32.gmra.mxu0 %vm425_vm1, %v5741_v41 }
 0x773   : > { %v5574_v23 = vadd.f32 %v9744_v42, %v5573_v37  ;;  %6813 = vrcp.f32 %v9835_v59  ;;  %vm5687_vm13 = vweird.f32 %v9559_v5  ;;  %v5691_v1 = vand.u32 2147483647, %v9559_v5 }
 0x774   : > { %v9803_v13 = vpop.eup %6809  ;;  %v5699_v62 = vmul.f32 %v9721_v21, %v5698_v14  ;;  %vm9868_vm12 = vmor %vm5687_vm13, %vm5688_vm9  ;;  %v4371_v19 = vmul.f32 %v4290_v57, %v10434_v53  ;;  %v5694_v52 = vor.u32 1.1754944e-38, %v5693_v26  ;;  %v5595_v16 = vand.u32 2147483648, %v9737_v33 }
 0x775   : > { %v5585_v24 = vmul.f32 %v9803_v13, %v9737_v33  ;;  %v9829_v56 = vpop.eup %6811  ;;  %v5578_v7 = vsel %vm9839_vm5, %v9744_v42, %v5574_v23  ;;  %6307 = vmatmul.msk.f32.gmra.mxu2 %vm425_vm1, %v5749_v48  ;;  %vm5590_vm3 = vweird.f32 %v9803_v13  ;;  %v5690_v37 = vsel %vm9868_vm12, %v9630_v17, %v5686_v28  ;;  %v10441_v28 = vld [vmem:[#allocation26_spill] sm:$0xff] }
 0x776   : > { %v4320_v42 = vmul.f32 %v9829_v56, %v9727_v45  ;;  %v5583_v31 = vsel %vm5580_vm10, %v5582_v60, %v5578_v7  ;;  %vm5589_vm7 = vweird.f32 %v9737_v33  ;;  %v5593_v29 = vand.u32 2147483647, %v9737_v33  ;;  %v9919_v14 = vpop.f32.mrf.mxu1  ;;  %v10444_v33 = vld [vmem:[#allocation29_spill] sm:$0xff] }
 0x777   : > { %v5586_v47 = vsub.f32 1.0, %v5585_v24  ;;  %6242 = vmatmul.msk.f32.gmra.mxu1 %vm425_vm1, %v4371_v19  ;;  %v5742_v4 = vmul.f32 %v5583_v31, %v9436_v6  ;;  %v4299_v50 = vsel %vm9881_vm4, %v9609_v34, %v4295_v49  ;;  %vm4301_vm11 = vcmp.eq.f32.partialorder %v4300_v18, 8.507059e+37  ;;  %vm9904_vm6 = vmor %vm5589_vm7, %vm5590_vm3 }
 0x778   : > { %v4303_v17 = vor.u32 1.1754944e-38, %v4302_v25  ;;  %v4314_v11 = vand.u32 2147483647, %v9613_v22  ;;  %vm5692_vm14 = vcmp.eq.f32.partialorder %v5691_v1, 8.507059e+37  ;;  %v4321_v6 = vsub.f32 1.0, %v4320_v42  ;;  %v9915_v25 = vpop.xlane.xlu0 %3719 }
 0x779   : > { %v5587_v2 = vmul.f32 %v9803_v13, %v5586_v47  ;;  %vm5702_vm2 = vweird.f32 %v9721_v21  ;;  %v5695_v24 = vsel %vm5692_vm14, %v5694_v52, %v5690_v37  ;;  %v9912_v18 = vpop.eup %6813  ;;  %v5700_v36 = vadd.f32 %v9721_v21, %v5699_v62 }
 0x77a   : > { %v5750_v23 = vmul.f32 %v5695_v24, %v5433_v43  ;;  %v5596_v54 = vor.u32 1.1754944e-38, %v5595_v16  ;;  %v4304_v41 = vsel %vm4301_vm11, %v4303_v17, %v4299_v50  ;;  %v4309_v15 = vadd.f32 %v9691_v30, %v4308_v3  ;;  %6300 = vmatmul.msk.f32.gmra.mxu0 %vm425_vm1, %v5742_v4  ;;  %v5459_v3 = vpop.f32.mrf.mxu0 }
 0x77b   : > { %v5588_v61 = vadd.f32 %v9803_v13, %v5587_v2  ;;  %vm4311_vm8 = vweird.f32 %v9691_v30  ;;  %v5707_v38 = vand.u32 2147483648, %v9635_v58  ;;  %vm5594_vm15 = vcmp.eq.f32.partialorder %v5593_v29, 8.507059e+37 }
 0x77c   : > { %v9875_v12 = vpop.xlane.xlu2 %5093  ;;  %v4316_v40 = vand.u32 2147483648, %v9613_v22  ;;  %vm5701_vm5 = vweird.f32 %v9635_v58  ;;  %v5705_v47 = vand.u32 2147483647, %v9635_v58  ;;  %vm4310_vm9 = vweird.f32 %v9613_v22 }
 0x77d   : > { %6815 = vrcp.f32 %v9875_v12  ;;  %v5592_v34 = vsel %vm9904_vm6, %v9803_v13, %v5588_v61  ;;  %6308 = vmatmul.msk.f32.gmra.mxu2 %vm425_vm1, %v5750_v23  ;;  %vm9930_vm10 = vmor %vm5701_vm5, %vm5702_vm2  ;;  %v4372_v26 = vmul.f32 %v4304_v41, %v10441_v28  ;;  %v4322_v22 = vmul.f32 %v9829_v56, %v4321_v6 }
 0x77e   : > { %v5597_v48 = vsel %vm5594_vm15, %v5596_v54, %v5592_v34  ;;  %6817 = vrcp.f32 %v9915_v25  ;;  %vm9941_vm13 = vmor %vm4310_vm9, %vm4311_vm8  ;;  %v4334_v57 = vmul.f32 %v9912_v18, %v9835_v59  ;;  %v5704_v49 = vsel %vm9930_vm10, %v9721_v21, %v5700_v36  ;;  %v9970_v17 = vpop.f32.mrf.mxu1 }
 0x77f   : > { %v5708_v42 = vor.u32 1.1754944e-38, %v5707_v38  ;;  %6243 = vmatmul.msk.f32.gmra.mxu1 %vm425_vm1, %v4372_v26  ;;  %v5743_v31 = vmul.f32 %v5597_v48, %v9481_v44  ;;  %v4313_v62 = vsel %vm9941_vm13, %v9691_v30, %v4309_v15  ;;  %vm4315_vm12 = vcmp.eq.f32.partialorder %v4314_v11, 8.507059e+37 }
 0x780   : > { %v4317_v51 = vor.u32 1.1754944e-38, %v4316_v40  ;;  %vm5706_vm3 = vcmp.eq.f32.partialorder %v5705_v47, 8.507059e+37  ;;  %v5721_v61 = vand.u32 2147483648, %v9875_v12  ;;  %v5719_v19 = vand.u32 2147483647, %v9875_v12 }
 0x781   : > { %v5709_v53 = vsel %vm5706_vm3, %v5708_v42, %v5704_v49  ;;  %vm4325_vm7 = vweird.f32 %v9829_v56  ;;  %v4323_v44 = vadd.f32 %v9829_v56, %v4322_v22  ;;  %v4335_v16 = vsub.f32 1.0, %v4334_v57  ;;  %v10447_v57 = vld [vmem:[#allocation51_spill] sm:$0xff] }
 0x782   : > { %v5751_v5 = vmul.f32 %v5709_v53, %v5459_v3  ;;  %v4318_v37 = vsel %vm4315_vm12, %v4317_v51, %v4313_v62  ;;  %6301 = vmatmul.msk.f32.gmra.mxu0 %vm425_vm1, %v5743_v31  ;;  %vm5715_vm11 = vweird.f32 %v9875_v12  ;;  %vm4324_vm14 = vweird.f32 %v9727_v45 }
 0x783   : > { %v6816_v13 = vpop.eup %6815  ;;  %v4328_v29 = vand.u32 2147483647, %v9727_v45  ;;  %v4330_v4 = vand.u32 2147483648, %v9727_v45  ;;  %v5722_v50 = vor.u32 1.1754944e-38, %v5721_v61  ;;  %v4373_v6 = vmul.f32 %v4318_v37, %v10444_v33  ;;  %vm9976_vm8 = vmor %vm4324_vm14, %vm4325_vm7 }
 0x784   : > { %v5711_v7 = vmul.f32 %v6816_v13, %v9875_v12  ;;  %v9937_v2 = vpop.xlane.xlu2 %5096  ;;  %vm5716_vm4 = vweird.f32 %v6816_v13  ;;  %v9960_v52 = vpop.eup %6817  ;;  %vm5720_vm2 = vcmp.eq.f32.partialorder %v5719_v19, 8.507059e+37  ;;  %v4336_v34 = vmul.f32 %v9912_v18, %v4335_v16  ;;  %v10448_v19 = vld [vmem:[#allocation27_spill] sm:$0xff]  ;;  %v10451_v12 = vld [vmem:[#allocation28_spill] sm:$0xff] }
 0x785   : > { %6819 = vrcp.f32 %v9937_v2  ;;  %6309 = vmatmul.msk.f32.gmra.mxu2 %vm425_vm1, %v5751_v5  ;;  %vm5717_vm6 = vmor %vm5715_vm11, %vm5716_vm4  ;;  %v4348_v36 = vmul.f32 %v9960_v52, %v9915_v25  ;;  %v4327_v41 = vsel %vm9976_vm8, %v9829_v56, %v4323_v44  ;;  %v4331_v15 = vor.u32 1.1754944e-38, %v4330_v4 }
 0x786   : > { %v5712_v1 = vsub.f32 1.0, %v5711_v7  ;;  %v5735_v38 = vand.u32 2147483648, %v9937_v2  ;;  %vm4329_vm15 = vcmp.eq.f32.partialorder %v4328_v29, 8.507059e+37  ;;  %v5733_v47 = vand.u32 2147483647, %v9937_v2  ;;  %v9999_v42 = vpop.f32.mrf.mxu1 }
 0x787   : > { %6244 = vmatmul.msk.f32.gmra.mxu1 %vm425_vm1, %v4373_v6  ;;  %vm4339_vm9 = vweird.f32 %v9912_v18  ;;  %v4332_v48 = vsel %vm4329_vm15, %v4331_v15, %v4327_v41  ;;  %v4337_v60 = vadd.f32 %v9912_v18, %v4336_v34  ;;  %v4349_v7 = vsub.f32 1.0, %v4348_v36  ;;  %v10450_v6 = vld [vmem:[#allocation54_spill] sm:$0xff] }
 0x788   : > { %v5713_v21 = vmul.f32 %v6816_v13, %v5712_v1  ;;  %vm5729_vm10 = vweird.f32 %v9937_v2  ;;  %vm4338_vm13 = vweird.f32 %v9835_v59  ;;  %v4344_v56 = vand.u32 2147483648, %v9835_v59  ;;  %v5511_v1 = vpop.f32.mrf.mxu3 }
 0x789   : > { %v5736_v26 = vor.u32 1.1754944e-38, %v5735_v38  ;;  %v4342_v58 = vand.u32 2147483647, %v9835_v59  ;;  %vm5734_vm3 = vcmp.eq.f32.partialorder %v5733_v47, 8.507059e+37  ;;  %v4374_v49 = vmul.f32 %v4332_v48, %v10447_v57  ;;  %vm4340_vm4 = vmor %vm4338_vm13, %vm4339_vm9 }
 0x78a   : > { %v5714_v30 = vadd.f32 %v6816_v13, %v5713_v21  ;;  %v4341_v31 = vsel %vm4340_vm4, %v9912_v18, %v4337_v60  ;;  %v4345_v62 = vor.u32 1.1754944e-38, %v4344_v56  ;;  %vm4353_vm11 = vweird.f32 %v9960_v52 }
 0x78b   : > { %v6820_v43 = vpop.eup %6819  ;;  %v5485_v54 = vpop.f32.mrf.mxu2  ;;  %vm4343_vm7 = vcmp.eq.f32.partialorder %v4342_v58, 8.507059e+37  ;;  %v4358_v53 = vand.u32 2147483648, %v9915_v25  ;;  %vm4352_vm14 = vweird.f32 %v9915_v25  ;;  %v4356_v21 = vand.u32 2147483647, %v9915_v25 }
 0x78c   : > { %v5725_v11 = vmul.f32 %v6820_v43, %v9937_v2  ;;  %v5718_v24 = vsel %vm5717_vm6, %v6816_v13, %v5714_v30  ;;  %vm5730_vm5 = vweird.f32 %v6820_v43  ;;  %v4350_v2 = vmul.f32 %v9960_v52, %v4349_v7  ;;  %vm4354_vm6 = vmor %vm4352_vm14, %vm4353_vm11  ;;  %v10449_v30 = vld [vmem:[#allocation52_spill] sm:$0xff]  ;;  %v10453_v7 = vld [vmem:[#allocation33_spill] sm:$0xff] }
 0x78d   : > { %v5723_v45 = vsel %vm5720_vm2, %v5722_v50, %v5718_v24  ;;  %vm5731_vm12 = vmor %vm5729_vm10, %vm5730_vm5  ;;  %v4346_v59 = vsel %vm4343_vm7, %v4345_v62, %v4341_v31  ;;  %v4359_v44 = vor.u32 1.1754944e-38, %v4358_v53  ;;  %vm4357_vm2 = vcmp.eq.f32.partialorder %v4356_v21, 8.507059e+37  ;;  %v10455_v62 = vld [vmem:[#allocation36_spill] sm:$0xff] }
 0x78e   : > { %v5726_v23 = vsub.f32 1.0, %v5725_v11  ;;  %v5752_v13 = vmul.f32 %v5723_v45, %v5485_v54  ;;  %v4351_v61 = vadd.f32 %v9960_v52, %v4350_v2  ;;  %v4375_v5 = vmul.f32 %v4346_v59, %v10448_v19  ;;  %v10456_v19 = vld [vmem:[#allocation43_spill] sm:$0xff] }
 0x78f   : > { %6245 = vmatmul.msk.f32.gmra.mxu1 %vm425_vm1, %v4374_v49  ;;  %v3100_v24 = vadd.f32 %v10450_v6, %v9444_v27  ;;  %v3082_v45 = vadd.f32 %v10451_v12, %v9248_v9  ;;  %v10452_v9 = vld [vmem:[#allocation41_spill] sm:$0xff] }
 0x790   : > { %v5727_v40 = vmul.f32 %v6820_v43, %v5726_v23  ;;  %6310 = vmatmul.msk.f32.gmra.mxu2 %vm425_vm1, %v5752_v13  ;;  %v4355_v18 = vsel %vm4354_vm6, %v9960_v52, %v4351_v61  ;;  %v10026_v23 = vld [vmem:[%s10147_s4] ss:$0 sm:$0xff]  ;;  %v3103_v27 = vadd.f32 %v10452_v9, %v9519_v35  ;;  %v10461_v9 = vld [vmem:[#allocation46_spill] sm:$0xff] }
 0x791   : > { %v4360_v16 = vsel %vm4357_vm2, %v4359_v44, %v4355_v18 }
 0x792   : > { %v5728_v28 = vadd.f32 %v6820_v43, %v5727_v40 }
 0x794   : > { %v5732_v22 = vsel %vm5731_vm12, %v6820_v43, %v5728_v28  ;;  %v4376_v43 = vmul.f32 %v4360_v16, %v10449_v30  ;;  %v3085_v28 = vadd.f32 %v10453_v7, %v9261_v46  ;;  %v10457_v16 = vld [vmem:[#allocation42_spill] sm:$0xff] }
 0x795   : > { %v5737_v3 = vsel %vm5734_vm3, %v5736_v26, %v5732_v22  ;;  %v3091_v30 = vadd.f32 %v10457_v16, %v9308_v8 }
 0x796   : > { %v5753_v51 = vmul.f32 %v5737_v3, %v5511_v1  ;;  %v10454_v3 = vld [vmem:[#allocation57_spill] sm:$0xff] }
 0x797   : > { %6246 = vmatmul.msk.f32.gmra.mxu1 %vm425_vm1, %v4375_v5  ;;  %v3106_v2 = vadd.f32 %v10454_v3, %v9586_v55  ;;  %v3109_v5 = vadd.f32 %v10456_v19, %v9654_v0  ;;  %v10458_v0 = vld [vmem:[#allocation55_spill] sm:$0xff] }
 0x798   : > { %6311 = vmatmul.msk.f32.gmra.mxu2 %vm425_vm1, %v5753_v51  ;;  %v3088_v51 = vadd.f32 %v10455_v62, %v9281_v39 }
 0x79a   : > { %v10013_v37 = vpop.f32.mrf.mxu1 }
 0x79f   : > { %6247 = vmatmul.msk.f32.gmra.mxu1 %vm425_vm1, %v4376_v43 }
 0x7a2   : > { %v4442_v29 = vpop.f32.mrf.mxu1 }
 0x7a3   : > { %v4490_v54 = vadd.f32 %v4442_v29, %v3082_v45  ;;  %v10459_v45 = vld [vmem:[#allocation53_spill] sm:$0xff] }
 0x7aa   : > { %v4445_v4 = vpop.f32.mrf.mxu1 }
 0x7ab   : > { %v4491_v26 = vadd.f32 %v4445_v4, %v3085_v28 }
 0x7b0   : > { %v5837_v52 = vpop.f32.mrf.mxu2 }
 0x7b2   : > { %v4448_v50 = vpop.f32.mrf.mxu1 }
 0x7b3   : > { %v4492_v61 = vadd.f32 %v4448_v50, %v3088_v51  ;;  %v10464_v51 = vld [vmem:[#allocation31_spill] sm:$0xff] }
 0x7ba   : > { %v4451_v25 = vpop.f32.mrf.mxu1 }
 0x7bb   : > { %v4493_v43 = vadd.f32 %v4451_v25, %v3091_v30 }
 0x7c2   : > { %v4454_v11 = vpop.f32.mrf.mxu1 }
 0x7ca   : > { %v10017_v33 = vpop.f32.mrf.mxu1 }
 0x7d2   : > { %v4460_v34 = vpop.f32.mrf.mxu1 }
 0x7d3   : > { %v4496_v36 = vadd.f32 %v4460_v34, %v3100_v24  ;;  %v3112_v24 = vadd.f32 %v10458_v0, %v9757_v32  ;;  %v3094_v34 = vadd.f32 %v10459_v45, %v9341_v20 }
 0x7d5   : > { %v5873_v41 = vadd.f32 %v5837_v52, %v4496_v36  ;;  %v4494_v36 = vadd.f32 %v4454_v11, %v3094_v34 }
 0x7d6   : > { %v5819_v15 = vpop.f32.mrf.mxu0  ;;  %v5840_v13 = vpop.f32.mrf.mxu2 }
 0x7d7   : > { %v5867_v38 = vadd.f32 %v5819_v15, %v4490_v54  ;;  %v5893_v40 = vadd.f32 %v10026_v23, %v5873_v41 }
 0x7d9   : > { %v5887_v47 = vadd.f32 %v10026_v23, %v5867_v38  ;;  %5909 = vst.msk [vmem:[%s10032_s29 + $0x30] sm:$0xff] %vm304_vm0, %v5893_v40 }
 0x7da   : > { %v4463_v48 = vpop.f32.mrf.mxu1 }
 0x7db   : > { %5903 = vst.msk [vmem:[%s10032_s29] sm:$0xff] %vm304_vm0, %v5887_v47  ;;  %v4497_v60 = vadd.f32 %v4463_v48, %v3103_v27  ;;  %v3097_v27 = vadd.f32 %v10461_v9, %v9377_v10 }
 0x7dd   : > { %v5874_v56 = vadd.f32 %v5840_v13, %v4497_v60  ;;  %v10460_v13 = vld [vmem:[#allocation47_spill] sm:$0xff]  ;;  %v4495_v48 = vadd.f32 %v10017_v33, %v3097_v27 }
 0x7de   : > { %v5843_v58 = vpop.f32.mrf.mxu2  ;;  %v5822_v57 = vpop.f32.mrf.mxu0  ;;  %v3115_v40 = vadd.f32 %v10460_v13, %v9853_v63 }
 0x7df   : > { %v5894_v22 = vadd.f32 %v10026_v23, %v5874_v56  ;;  %v5868_v49 = vadd.f32 %v5822_v57, %v4491_v26  ;;  %v10462_v26 = vld [vmem:[#allocation48_spill] sm:$0xff] }
 0x7e1   : > { %5910 = vst.msk [vmem:[%s10032_s29 + $0x38] sm:$0xff] %vm304_vm0, %v5894_v22  ;;  %v5888_v35 = vadd.f32 %v10026_v23, %v5868_v49 }
 0x7e2   : > { %v4466_v1 = vpop.f32.mrf.mxu1 }
 0x7e3   : > { %v4498_v31 = vadd.f32 %v4466_v1, %v3106_v2  ;;  %5904 = vst.msk [vmem:[%s10032_s29 + $0x8] sm:$0xff] %vm304_vm0, %v5888_v35  ;;  %v10463_v2 = vld [vmem:[#allocation39_spill] sm:$0xff] }
 0x7e4   : > { %v3121_v35 = vadd.f32 %v10463_v2, %v9970_v17 }
 0x7e5   : > { %v5875_v46 = vadd.f32 %v5843_v58, %v4498_v31  ;;  %v3118_v58 = vadd.f32 %v10462_v26, %v9919_v14 }
 0x7e6   : > { %v5846_v53 = vpop.f32.mrf.mxu2 }
 0x7e7   : > { %v5895_v59 = vadd.f32 %v10026_v23, %v5875_v46  ;;  %v5825_v55 = vpop.f32.mrf.mxu0 }
 0x7e8   : > { %v5869_v21 = vadd.f32 %v5825_v55, %v4492_v61 }
 0x7e9   : > { %5911 = vst.msk [vmem:[%s10032_s29 + $0x40] sm:$0xff] %vm304_vm0, %v5895_v59  ;;  %v3124_v59 = vadd.f32 %v10464_v51, %v9999_v42 }
 0x7ea   : > { %v5889_v18 = vadd.f32 %v10026_v23, %v5869_v21  ;;  %v10465_v21 = vld [vmem:[#allocation40_spill] sm:$0xff] }
 0x7eb   : > { %v3127_v19 = vadd.f32 %v10465_v21, %v10013_v37 }
 0x7ec   : > { %v4469_v44 = vpop.f32.mrf.mxu1  ;;  %5905 = vst.msk [vmem:[%s10032_s29 + $0x10] sm:$0xff] %vm304_vm0, %v5889_v18 }
 0x7ed   : > { %v4499_v39 = vadd.f32 %v4469_v44, %v3109_v5 }
 0x7ef   : > { %v5876_v29 = vadd.f32 %v5846_v53, %v4499_v39  ;;  %v5828_v50 = vpop.f32.mrf.mxu0 }
 0x7f0   : > { %v5849_v4 = vpop.f32.mrf.mxu2  ;;  %v5870_v6 = vadd.f32 %v5828_v50, %v4493_v43 }
 0x7f1   : > { %v5896_v52 = vadd.f32 %v10026_v23, %v5876_v29 }
 0x7f2   : > { %v5890_v12 = vadd.f32 %v10026_v23, %v5870_v6 }
 0x7f3   : > { %5912 = vst.msk [vmem:[%s10032_s29 + $0x48] sm:$0xff] %vm304_vm0, %v5896_v52 }
 0x7f4   : > { %v4472_v8 = vpop.f32.mrf.mxu1  ;;  %5906 = vst.msk [vmem:[%s10032_s29 + $0x18] sm:$0xff] %vm304_vm0, %v5890_v12 }
 0x7f5   : > { %v4500_v25 = vadd.f32 %v4472_v8, %v3112_v24 }
 0x7f7   : > { %v5877_v54 = vadd.f32 %v5849_v4, %v4500_v25  ;;  %v5831_v15 = vpop.f32.mrf.mxu0 }
 0x7f8   : > { %v5852_v41 = vpop.f32.mrf.mxu2  ;;  %v5871_v32 = vadd.f32 %v5831_v15, %v4494_v36 }
 0x7f9   : > { %v5897_v38 = vadd.f32 %v10026_v23, %v5877_v54 }
 0x7fa   : > { %v5891_v47 = vadd.f32 %v10026_v23, %v5871_v32 }
 0x7fb   : > { %5913 = vst.msk [vmem:[%s10032_s29 + $0x50] sm:$0xff] %vm304_vm0, %v5897_v38 }
 0x7fc   : > { %v4475_v20 = vpop.f32.mrf.mxu1  ;;  %5907 = vst.msk [vmem:[%s10032_s29 + $0x20] sm:$0xff] %vm304_vm0, %v5891_v47 }
 0x7fd   : > { %v4501_v11 = vadd.f32 %v4475_v20, %v3115_v40 }
 0x7ff   : > { %v5878_v60 = vadd.f32 %v5852_v41, %v4501_v11  ;;  %v5834_v7 = vpop.f32.mrf.mxu0 }
 0x800   : > { %v5855_v28 = vpop.f32.mrf.mxu2  ;;  %v5872_v56 = vadd.f32 %v5834_v7, %v4495_v48 }
 0x801   : > { %v5898_v63 = vadd.f32 %v10026_v23, %v5878_v60 }
 0x802   : > { %v5892_v10 = vadd.f32 %v10026_v23, %v5872_v56 }
 0x803   : > { %5914 = vst.msk [vmem:[%s10032_s29 + $0x58] sm:$0xff] %vm304_vm0, %v5898_v63 }
 0x804   : > { %v4478_v22 = vpop.f32.mrf.mxu1  ;;  %5908 = vst.msk [vmem:[%s10032_s29 + $0x28] sm:$0xff] %vm304_vm0, %v5892_v10 }
 0x805   : > { %v4502_v57 = vadd.f32 %v4478_v22, %v3118_v58 }
 0x807   : > { %v5879_v33 = vadd.f32 %v5855_v28, %v4502_v57 }
 0x808   : > { %v5858_v3 = vpop.f32.mrf.mxu2 }
 0x809   : > { %v5899_v49 = vadd.f32 %v10026_v23, %v5879_v33 }
 0x80b   : > { %5915 = vst.msk [vmem:[%s10032_s29 + $0x60] sm:$0xff] %vm304_vm0, %v5899_v49 }
 0x80c   : > { %v4481_v14 = vpop.f32.mrf.mxu1 }
 0x80d   : > { %v4503_v1 = vadd.f32 %v4481_v14, %v3121_v35 }
 0x80f   : > { %v5880_v31 = vadd.f32 %v5858_v3, %v4503_v1 }
 0x811   : > { %v5900_v46 = vadd.f32 %v10026_v23, %v5880_v31 }
 0x813   : > { %v5861_v62 = vpop.f32.mrf.mxu2  ;;  %5916 = vst.msk [vmem:[%s10032_s29 + $0x68] sm:$0xff] %vm304_vm0, %v5900_v46 }
 0x814   : > { %v4484_v61 = vpop.f32.mrf.mxu1 }
 0x815   : > { %v4504_v53 = vadd.f32 %v4484_v61, %v3124_v59 }
 0x817   : > { %v5881_v55 = vadd.f32 %v5861_v62, %v4504_v53 }
 0x819   : > { %v5901_v17 = vadd.f32 %v10026_v23, %v5881_v55 }
 0x81b   : > { %5917 = vst.msk [vmem:[%s10032_s29 + $0x70] sm:$0xff] %vm304_vm0, %v5901_v17  ;;  %v5864_v5 = vpop.f32.mrf.mxu2 }
 0x81c   : > { %v4487_v42 = vpop.f32.mrf.mxu1 }
 0x81d   : > { %v4505_v18 = vadd.f32 %v4487_v42, %v3127_v19 }
 0x81f   : > { %v5882_v44 = vadd.f32 %v5864_v5, %v4505_v18 }
 0x821   : > { %v5902_v16 = vadd.f32 %v10026_v23, %v5882_v44 }
 0x823   : > { %5918 = vst.msk [vmem:[%s10032_s29 + $0x78] sm:$0xff] %vm304_vm0, %v5902_v16 }
 0x824   : > { %6938 = shalt.err (!%p6935_p10)
}
 0x825   : > { %s6998_s8 = smov 128   ;;  %s6999_s24 = smov 8  }
 0x826   : > { %6331 = dma.vmem_to_hbm [thread:$0]  (%p7102_p3), %s5933_s13, 2048, %s5935_s15, %s5920_s22, %s6998_s8, %s6998_s8, %s6999_s24  }
 0x827 PF: > { %s5949_s29 = sand.u32 1, %s6969_s18   ;;  %p10466_p12 = scmp.ge.s32.totalorder %s6981_s21, 2 }
 0x828   : > { %s5950_s10 = scalar_lea.sflag [#allocation4], %s5949_s29 }
 0x829   : > { %p6345_p13 = pnand %p10466_p12, %p7065_p6 }
 0x82b   : > { %p6346_p0 = pneg %p6345_p13 }
 0x82d   : > { %6964 = dma.done.wait (%p6346_p0), %s5950_s10, 2048  }
 0x82e   : > { %6966 = vsyncadd (%p6346_p0), %s5950_s10, 4294965248  ;;  %p19_p5 = scmp.ge.s32.totalorder %s7092_s14, 4   ;;  %s10467_s18 = smov %s6973_s19 }
 0x82f   : > { %s10468_s19 = smov %s6977_s20  ;;  %s10469_s20 = smov %s7108_s23 }
 0x830   : > { %s10470_s21 = smov %s7092_s14  ;;  %21 = sbr.rel (!%p19_p5) target bundleno = 6 (0x6), region = 93 }
 0x835   :  { %5956 = vsyncpa [#allocation3], 1 }
 0x836   :  { %5958 = vsyncpa [#allocation3 + $0x1], 1 }
 0x837   :  { %5959 = vsyncpa [#allocation6], 1 }
 0x838   :  { %5960 = vsyncpa [#allocation4], 1 }
 0x839   :  { %5962 = vsyncpa [#allocation4 + $0x1], 1 }

</bundles_post_ra>
